<compile_context>
chip_gen: v6e
topology: v6e:2x2x1
jax: 0.10.0
libtpu: 0.0.40
codegen_flags: <defaults>
</compile_context>

<pallas_src>
import numpy as np
import jax
import jax.numpy as jnp
from jax import lax
from jax.experimental import pallas as pl
from jax.experimental.pallas import tpu as pltpu


# ----------------------------- static geometry -----------------------------
_WP = 36                     # padded row width for conv1  (32 + 2*2)
_W2P = 20                    # padded row width for conv2  (16 + 2*2)

_NP1 = 1280                  # conv1 GEMM output width  (> max pool read 1147)
_NM1 = 1152                  # pool1 window-max width   (> max anchor 1110)
_XLEN = 1536                 # lane-padded flattened 36x36 input row (>= _NP1+148)
_NP2 = 316                   # conv2 GEMM output width  (= 400 - 84)
_NM2 = 295                   # pool2 window-max width   (> max anchor 294)

_OFFS1 = [kh * _WP + kw for kh in range(5) for kw in range(5)]    # conv1 taps
_OFFS2 = [kh * _W2P + kw for kh in range(5) for kw in range(5)]   # conv2 taps


def _build_pool1_sel():
    """[_NM1, 400] 0/1 matrix: pool-1 compaction + zero-pad(2) for conv2.

    Column pp = hi*20 + wi of the padded 20x20 conv2 input selects the 2x2
    pool anchor (2i)*36 + (2j) of the conv1 output (i = hi-2, j = wi-2) for
    interior pixels and is all-zero on the padding ring.
    """
    s = np.zeros((_NM1, 400), np.float32)
    for hi in range(20):
        for wi in range(20):
            if 2 <= hi < 18 and 2 <= wi < 18:
                i, j = hi - 2, wi - 2
                s[(2 * i) * _WP + (2 * j), hi * 20 + wi] = 1.0
    return s


def _build_pool2_sel():
    """[_NM2, 64] 0/1 matrix: pool-2 compaction of the conv2 output.

    Column m = i*8 + j selects anchor (2i)*20 + (2j); the resulting [32, 64]
    (channels x pixels) block flattens row-major to exactly torch's
    x.view(B, -1) order on the NCHW tensor.
    """
    s = np.zeros((_NM2, 64), np.float32)
    for i in range(8):
        for j in range(8):
            s[(2 * i) * _W2P + (2 * j), i * 8 + j] = 1.0
    return s


_POOL1_SEL = _build_pool1_sel()
_POOL2_SEL = _build_pool2_sel()


# ------------------------------ fused kernel -------------------------------

def _cnn_fused_kernel(x_ref, w1_ref, b1_ref, s1_ref, w2_ref, b2_ref,
                      s2_ref, wo_ref, bo_ref, o_ref, p1_buf, p2_buf):
    """Whole CNN forward for one image.

    x_ref : [1, 1, _XLEN] f32   zero-padded 36x36 image, row-major, zero tail
    w1_ref: [16, 25]      bf16  conv1 weights  [cout, kh*5+kw]
    b1_ref: [16, 1]       f32
    s1_ref: [_NM1, 400]   bf16  pool1 selection (+pad) matrix
    w2_ref: [32, 400]     bf16  conv2 weights  [cout, (kh*5+kw)*16 + cin]
    b2_ref: [32, 1]       f32
    s2_ref: [_NM2, 64]    f32   pool2 selection matrix
    wo_ref: [2048, 10]    f32   linear weights (torch wo.T; order already matches)
    bo_ref: [1, 10]       f32
    o_ref : [1, 1, 10]    f32   softmax output
    p1_buf: [25, _NP1]    f32   VMEM scratch, conv1 im2col
    p2_buf: [400, _NP2]   f32   VMEM scratch, conv2 im2col
    """
    f32 = jnp.float32
    bf16 = jnp.bfloat16

    xrow = x_ref[0]                                              # [1, _XLEN]

    # ---- conv1: im2col in VMEM, single K=25 GEMM, + bias + ReLU ----
    for t, off in enumerate(_OFFS1):
        p1_buf[t, :] = xrow[0, off:off + _NP1]
    h1 = jnp.dot(w1_ref[...], p1_buf[...].astype(bf16),
                 preferred_element_type=f32)                     # [16, _NP1]
    h1 = jnp.maximum(h1 + b1_ref[...], 0.0)

    # ---- maxpool1 (2x2/2) + zero-pad(2), via max-of-4-shifts + selection GEMM
    m1 = jnp.maximum(
        jnp.maximum(h1[:, 0:_NM1], h1[:, 1:_NM1 + 1]),
        jnp.maximum(h1[:, _WP:_NM1 + _WP], h1[:, _WP + 1:_NM1 + _WP + 1]))
    x2 = jnp.dot(m1.astype(bf16), s1_ref[...],
                 preferred_element_type=f32)                     # [16, 400]

    # ---- conv2: im2col in VMEM, single K=400 GEMM, + bias + ReLU ----
    for t, off in enumerate(_OFFS2):
        p2_buf[t * 16:(t + 1) * 16, :] = x2[:, off:off + _NP2]
    h2 = jnp.dot(w2_ref[...], p2_buf[...].astype(bf16),
                 preferred_element_type=f32)                     # [32, _NP2]
    h2 = jnp.maximum(h2 + b2_ref[...], 0.0)

    # ---- maxpool2 (2x2/2) -> [32, 64] in torch CHW-flatten order ----
    m2 = jnp.maximum(
        jnp.maximum(h2[:, 0:_NM2], h2[:, 1:_NM2 + 1]),
        jnp.maximum(h2[:, _W2P:_NM2 + _W2P], h2[:, _W2P + 1:_NM2 + _W2P + 1]))
    q2 = jnp.dot(m2, s2_ref[...], preferred_element_type=f32)    # [32, 64]

    # ---- flatten (channel-major == torch .view) + Linear + softmax (f32) ----
    feat = jnp.concatenate([q2[c:c + 1, :] for c in range(32)], axis=1)  # [1, 2048]
    logits = jnp.dot(feat, wo_ref[...], preferred_element_type=f32) + bo_ref[...]
    z = logits - jnp.max(logits, axis=-1, keepdims=True)
    e = jnp.exp(z)
    o_ref[0] = e / jnp.sum(e, axis=-1, keepdims=True)


# ------------------------------ wrapper (glue) ------------------------------

def cnn_forward(x_nchw, params):
    """x_nchw: [B, 1, 32, 32] f32; params in torch layouts. Returns [B, 10]."""
    w1, b1, w2, b2, wo, bo = params
    B = x_nchw.shape[0]

    # input glue: NCHW -> zero-pad(2) -> flatten rows -> lane-padded row
    xp = jnp.pad(x_nchw[:, 0], ((0, 0), (2, 2), (2, 2)))          # [B, 36, 36]
    xrow = jnp.pad(xp.reshape(B, _WP * _WP),
                   ((0, 0), (0, _XLEN - _WP * _WP)))
    xrow = xrow.reshape(B, 1, _XLEN).astype(jnp.float32)

    # weights: torch layouts -> GEMM layouts (tiny, one-time per trace)
    w1f = w1.reshape(16, 25).astype(jnp.bfloat16)                          # [16, 25]
    w2f = jnp.transpose(w2, (0, 2, 3, 1)).reshape(32, 400).astype(jnp.bfloat16)
    b1c = b1.reshape(16, 1).astype(jnp.float32)
    b2c = b2.reshape(32, 1).astype(jnp.float32)
    wot = wo.T.astype(jnp.float32)                                         # [2048, 10]
    bor = bo.reshape(1, 10).astype(jnp.float32)
    s1 = jnp.asarray(_POOL1_SEL, dtype=jnp.bfloat16)                       # [1152, 400]
    s2 = jnp.asarray(_POOL2_SEL, dtype=jnp.float32)                        # [295, 64]

    out = pl.pallas_call(
        _cnn_fused_kernel,
        out_shape=jax.ShapeDtypeStruct((B, 1, 10), jnp.float32),
        grid_spec=pltpu.PrefetchScalarGridSpec(
            num_scalar_prefetch=0,
            grid=(B,),
            in_specs=[
                pl.BlockSpec((1, 1, _XLEN), lambda b: (b, 0, 0)),
                pl.BlockSpec((16, 25), lambda b: (0, 0)),
                pl.BlockSpec((16, 1), lambda b: (0, 0)),
                pl.BlockSpec((_NM1, 400), lambda b: (0, 0)),
                pl.BlockSpec((32, 400), lambda b: (0, 0)),
                pl.BlockSpec((32, 1), lambda b: (0, 0)),
                pl.BlockSpec((_NM2, 64), lambda b: (0, 0)),
                pl.BlockSpec((2048, 10), lambda b: (0, 0)),
                pl.BlockSpec((1, 10), lambda b: (0, 0)),
            ],
            out_specs=pl.BlockSpec((1, 1, 10), lambda b: (b, 0, 0)),
            scratch_shapes=[
                pltpu.VMEM((25, _NP1), jnp.float32),
                pltpu.VMEM((400, _NP2), jnp.float32),
            ],
        ),
        compiler_params=pltpu.CompilerParams(
            dimension_semantics=("parallel",)),
    )(xrow, w1f, b1c, s1, w2f, b2c, s2, wot, bor)
    return out.reshape(B, 10)


# --------------------------- reference & init -------------------------------

def cnn_reference(x_nchw, params):
    """Pure-JAX f32 reference matching the PyTorch forward."""
    w1, b1, w2, b2, wo, bo = params

    def conv(x, w, b):
        y = lax.conv_general_dilated(
            x, w, (1, 1), [(2, 2), (2, 2)],
            dimension_numbers=("NCHW", "OIHW", "NCHW"))
        return jnp.maximum(y + b[None, :, None, None], 0.0)

    def pool(x):
        return lax.reduce_window(x, -jnp.inf, lax.max,
                                 (1, 1, 2, 2), (1, 1, 2, 2), "VALID")

    y = pool(conv(x_nchw, w1, b1))
    y = pool(conv(y, w2, b2))
    y = y.reshape(y.shape[0], -1)
    logits = y @ wo.T + bo
    return jax.nn.softmax(logits, axis=1)


def init_params(key):
    """Deterministic PyTorch-style uniform(+-1/sqrt(fan_in)) init, torch layouts."""
    ks = jax.random.split(key, 6)

    def u(k, shape, fan_in):
        bound = 1.0 / jnp.sqrt(jnp.float32(fan_in))
        return jax.random.uniform(k, shape, jnp.float32, -bound, bound)

    w1 = u(ks[0], (16, 1, 5, 5), 1 * 25)
    b1 = u(ks[1], (16,), 1 * 25)
    w2 = u(ks[2], (32, 16, 5, 5), 16 * 25)
    b2 = u(ks[3], (32,), 16 * 25)
    wo = u(ks[4], (10, 32 * 8 * 8), 32 * 8 * 8)
    bo = u(ks[5], (10,), 32 * 8 * 8)
    return (w1, b1, w2, b2, wo, bo)


if __name__ == "__main__":
    key = jax.random.PRNGKey(0)
    kx, kp = jax.random.split(key)
    x = jax.random.normal(kx, (2, 1, 32, 32), jnp.float32)   # NCHW input
    params = init_params(kp)

    out = jax.block_until_ready(jax.jit(cnn_forward)(x, params))
    ref = jax.block_until_ready(cnn_reference(x, params))

    assert out.shape == (2, 10) and out.dtype == jnp.float32
    assert bool(jnp.all(jnp.isfinite(out)))
    assert jnp.allclose(jnp.sum(out, axis=1), 1.0, atol=1e-4)
    # bf16 conv GEMM operands (f32 accumulation, f32 linear/softmax) -> small tol
    assert jnp.allclose(out, ref, atol=3e-3, rtol=0), (out, ref)
    print("KERNEL_OK")
</pallas_src>

<mosaic_0001>
module attributes {stable_mosaic.version = 11 : i64} {
  func.func @_cnn_fused_kernel(%arg0: i32, %arg1: memref<1x1x1536xf32, #tpu.memory_space<vmem>>, %arg2: memref<16x25xbf16, #tpu.memory_space<vmem>>, %arg3: memref<16x1xf32, #tpu.memory_space<vmem>>, %arg4: memref<1152x400xbf16, #tpu.memory_space<vmem>>, %arg5: memref<32x400xbf16, #tpu.memory_space<vmem>>, %arg6: memref<32x1xf32, #tpu.memory_space<vmem>>, %arg7: memref<295x64xf32, #tpu.memory_space<vmem>>, %arg8: memref<2048x10xf32, #tpu.memory_space<vmem>>, %arg9: memref<1x10xf32, #tpu.memory_space<vmem>>, %arg10: memref<1x1x10xf32, #tpu.memory_space<vmem>>, %arg11: memref<25x1280xf32, #tpu.memory_space<vmem>>, %arg12: memref<400x316xf32, #tpu.memory_space<vmem>>) attributes {dimension_semantics = [#tpu.dimension_semantics<parallel>], iteration_bounds = array<i64: 2>, scalar_prefetch = 0 : i64, scratch_operands = 2 : i64, tpu.core_type = #tpu.core_type<tc>, window_params = [{transform_indices = @transform_0, window_bounds = array<i64: 1, 1, 1536>}, {pipeline_mode = #tpu.pipeline_mode<synchronous>, transform_indices = @transform_1, window_bounds = array<i64: 16, 25>}, {pipeline_mode = #tpu.pipeline_mode<synchronous>, transform_indices = @transform_2, window_bounds = array<i64: 16, 1>}, {pipeline_mode = #tpu.pipeline_mode<synchronous>, transform_indices = @transform_3, window_bounds = array<i64: 1152, 400>}, {pipeline_mode = #tpu.pipeline_mode<synchronous>, transform_indices = @transform_4, window_bounds = array<i64: 32, 400>}, {pipeline_mode = #tpu.pipeline_mode<synchronous>, transform_indices = @transform_5, window_bounds = array<i64: 32, 1>}, {pipeline_mode = #tpu.pipeline_mode<synchronous>, transform_indices = @transform_6, window_bounds = array<i64: 295, 64>}, {pipeline_mode = #tpu.pipeline_mode<synchronous>, transform_indices = @transform_7, window_bounds = array<i64: 2048, 10>}, {pipeline_mode = #tpu.pipeline_mode<synchronous>, transform_indices = @transform_8, window_bounds = array<i64: 1, 10>}, {transform_indices = @transform_9, window_bounds = array<i64: 1, 1, 10>}]} {
    %c0 = arith.constant 0 : index
    %c0_0 = arith.constant 0 : index
    %c0_1 = arith.constant 0 : index
    %0 = vector.load %arg1[%c0, %c0_0, %c0_1] : memref<1x1x1536xf32, #tpu.memory_space<vmem>>, vector<1x1x1536xf32>
    %1 = vector.shape_cast %0 : vector<1x1x1536xf32> to vector<1x1536xf32>
    %2 = vector.extract_strided_slice %1 {offsets = [0, 0], sizes = [1, 1280], strides = [1, 1]} : vector<1x1536xf32> to vector<1x1280xf32>
    %3 = vector.shape_cast %2 : vector<1x1280xf32> to vector<1280xf32>
    %c0_2 = arith.constant 0 : index
    %c0_3 = arith.constant 0 : index
    %4 = vector.load %arg11[%c0_2, %c0_3] : memref<25x1280xf32, #tpu.memory_space<vmem>>, vector<1x1280xf32>
    %5 = vector.shape_cast %4 : vector<1x1280xf32> to vector<1280xf32>
    %6 = vector.shape_cast %3 : vector<1280xf32> to vector<1x1280xf32>
    tpu.vector_store %arg11[%c0_2, %c0_3], %6 {strides = array<i32>} : memref<25x1280xf32, #tpu.memory_space<vmem>>, vector<1x1280xf32>,
    %7 = vector.extract_strided_slice %1 {offsets = [0, 1], sizes = [1, 1280], strides = [1, 1]} : vector<1x1536xf32> to vector<1x1280xf32>
    %8 = vector.shape_cast %7 : vector<1x1280xf32> to vector<1280xf32>
    %c1 = arith.constant 1 : index
    %c0_4 = arith.constant 0 : index
    %9 = vector.load %arg11[%c1, %c0_4] : memref<25x1280xf32, #tpu.memory_space<vmem>>, vector<1x1280xf32>
    %10 = vector.shape_cast %9 : vector<1x1280xf32> to vector<1280xf32>
    %11 = vector.shape_cast %8 : vector<1280xf32> to vector<1x1280xf32>
    tpu.vector_store %arg11[%c1, %c0_4], %11 {strides = array<i32>} : memref<25x1280xf32, #tpu.memory_space<vmem>>, vector<1x1280xf32>,
    %12 = vector.extract_strided_slice %1 {offsets = [0, 2], sizes = [1, 1280], strides = [1, 1]} : vector<1x1536xf32> to vector<1x1280xf32>
    %13 = vector.shape_cast %12 : vector<1x1280xf32> to vector<1280xf32>
    %c2 = arith.constant 2 : index
    %c0_5 = arith.constant 0 : index
    %14 = vector.load %arg11[%c2, %c0_5] : memref<25x1280xf32, #tpu.memory_space<vmem>>, vector<1x1280xf32>
    %15 = vector.shape_cast %14 : vector<1x1280xf32> to vector<1280xf32>
    %16 = vector.shape_cast %13 : vector<1280xf32> to vector<1x1280xf32>
    tpu.vector_store %arg11[%c2, %c0_5], %16 {strides = array<i32>} : memref<25x1280xf32, #tpu.memory_space<vmem>>, vector<1x1280xf32>,
    %17 = vector.extract_strided_slice %1 {offsets = [0, 3], sizes = [1, 1280], strides = [1, 1]} : vector<1x1536xf32> to vector<1x1280xf32>
    %18 = vector.shape_cast %17 : vector<1x1280xf32> to vector<1280xf32>
    %c3 = arith.constant 3 : index
    %c0_6 = arith.constant 0 : index
    %19 = vector.load %arg11[%c3, %c0_6] : memref<25x1280xf32, #tpu.memory_space<vmem>>, vector<1x1280xf32>
    %20 = vector.shape_cast %19 : vector<1x1280xf32> to vector<1280xf32>
    %21 = vector.shape_cast %18 : vector<1280xf32> to vector<1x1280xf32>
    tpu.vector_store %arg11[%c3, %c0_6], %21 {strides = array<i32>} : memref<25x1280xf32, #tpu.memory_space<vmem>>, vector<1x1280xf32>,
    %22 = vector.extract_strided_slice %1 {offsets = [0, 4], sizes = [1, 1280], strides = [1, 1]} : vector<1x1536xf32> to vector<1x1280xf32>
    %23 = vector.shape_cast %22 : vector<1x1280xf32> to vector<1280xf32>
    %c4 = arith.constant 4 : index
    %c0_7 = arith.constant 0 : index
    %24 = vector.load %arg11[%c4, %c0_7] : memref<25x1280xf32, #tpu.memory_space<vmem>>, vector<1x1280xf32>
    %25 = vector.shape_cast %24 : vector<1x1280xf32> to vector<1280xf32>
    %26 = vector.shape_cast %23 : vector<1280xf32> to vector<1x1280xf32>
    tpu.vector_store %arg11[%c4, %c0_7], %26 {strides = array<i32>} : memref<25x1280xf32, #tpu.memory_space<vmem>>, vector<1x1280xf32>,
    %27 = vector.extract_strided_slice %1 {offsets = [0, 36], sizes = [1, 1280], strides = [1, 1]} : vector<1x1536xf32> to vector<1x1280xf32>
    %28 = vector.shape_cast %27 : vector<1x1280xf32> to vector<1280xf32>
    %c5 = arith.constant 5 : index
    %c0_8 = arith.constant 0 : index
    %29 = vector.load %arg11[%c5, %c0_8] : memref<25x1280xf32, #tpu.memory_space<vmem>>, vector<1x1280xf32>
    %30 = vector.shape_cast %29 : vector<1x1280xf32> to vector<1280xf32>
    %31 = vector.shape_cast %28 : vector<1280xf32> to vector<1x1280xf32>
    tpu.vector_store %arg11[%c5, %c0_8], %31 {strides = array<i32>} : memref<25x1280xf32, #tpu.memory_space<vmem>>, vector<1x1280xf32>,
    %32 = vector.extract_strided_slice %1 {offsets = [0, 37], sizes = [1, 1280], strides = [1, 1]} : vector<1x1536xf32> to vector<1x1280xf32>
    %33 = vector.shape_cast %32 : vector<1x1280xf32> to vector<1280xf32>
    %c6 = arith.constant 6 : index
    %c0_9 = arith.constant 0 : index
    %34 = vector.load %arg11[%c6, %c0_9] : memref<25x1280xf32, #tpu.memory_space<vmem>>, vector<1x1280xf32>
    %35 = vector.shape_cast %34 : vector<1x1280xf32> to vector<1280xf32>
    %36 = vector.shape_cast %33 : vector<1280xf32> to vector<1x1280xf32>
    tpu.vector_store %arg11[%c6, %c0_9], %36 {strides = array<i32>} : memref<25x1280xf32, #tpu.memory_space<vmem>>, vector<1x1280xf32>,
    %37 = vector.extract_strided_slice %1 {offsets = [0, 38], sizes = [1, 1280], strides = [1, 1]} : vector<1x1536xf32> to vector<1x1280xf32>
    %38 = vector.shape_cast %37 : vector<1x1280xf32> to vector<1280xf32>
    %c7 = arith.constant 7 : index
    %c0_10 = arith.constant 0 : index
    %39 = vector.load %arg11[%c7, %c0_10] : memref<25x1280xf32, #tpu.memory_space<vmem>>, vector<1x1280xf32>
    %40 = vector.shape_cast %39 : vector<1x1280xf32> to vector<1280xf32>
    %41 = vector.shape_cast %38 : vector<1280xf32> to vector<1x1280xf32>
    tpu.vector_store %arg11[%c7, %c0_10], %41 {strides = array<i32>} : memref<25x1280xf32, #tpu.memory_space<vmem>>, vector<1x1280xf32>,
    %42 = vector.extract_strided_slice %1 {offsets = [0, 39], sizes = [1, 1280], strides = [1, 1]} : vector<1x1536xf32> to vector<1x1280xf32>
    %43 = vector.shape_cast %42 : vector<1x1280xf32> to vector<1280xf32>
    %c8 = arith.constant 8 : index
    %c0_11 = arith.constant 0 : index
    %44 = vector.load %arg11[%c8, %c0_11] : memref<25x1280xf32, #tpu.memory_space<vmem>>, vector<1x1280xf32>
    %45 = vector.shape_cast %44 : vector<1x1280xf32> to vector<1280xf32>
    %46 = vector.shape_cast %43 : vector<1280xf32> to vector<1x1280xf32>
    tpu.vector_store %arg11[%c8, %c0_11], %46 {strides = array<i32>} : memref<25x1280xf32, #tpu.memory_space<vmem>>, vector<1x1280xf32>,
    %47 = vector.extract_strided_slice %1 {offsets = [0, 40], sizes = [1, 1280], strides = [1, 1]} : vector<1x1536xf32> to vector<1x1280xf32>
    %48 = vector.shape_cast %47 : vector<1x1280xf32> to vector<1280xf32>
    %c9 = arith.constant 9 : index
    %c0_12 = arith.constant 0 : index
    %49 = vector.load %arg11[%c9, %c0_12] : memref<25x1280xf32, #tpu.memory_space<vmem>>, vector<1x1280xf32>
    %50 = vector.shape_cast %49 : vector<1x1280xf32> to vector<1280xf32>
    %51 = vector.shape_cast %48 : vector<1280xf32> to vector<1x1280xf32>
    tpu.vector_store %arg11[%c9, %c0_12], %51 {strides = array<i32>} : memref<25x1280xf32, #tpu.memory_space<vmem>>, vector<1x1280xf32>,
    %52 = vector.extract_strided_slice %1 {offsets = [0, 72], sizes = [1, 1280], strides = [1, 1]} : vector<1x1536xf32> to vector<1x1280xf32>
    %53 = vector.shape_cast %52 : vector<1x1280xf32> to vector<1280xf32>
    %c10 = arith.constant 10 : index
    %c0_13 = arith.constant 0 : index
    %54 = vector.load %arg11[%c10, %c0_13] : memref<25x1280xf32, #tpu.memory_space<vmem>>, vector<1x1280xf32>
    %55 = vector.shape_cast %54 : vector<1x1280xf32> to vector<1280xf32>
    %56 = vector.shape_cast %53 : vector<1280xf32> to vector<1x1280xf32>
    tpu.vector_store %arg11[%c10, %c0_13], %56 {strides = array<i32>} : memref<25x1280xf32, #tpu.memory_space<vmem>>, vector<1x1280xf32>,
    %57 = vector.extract_strided_slice %1 {offsets = [0, 73], sizes = [1, 1280], strides = [1, 1]} : vector<1x1536xf32> to vector<1x1280xf32>
    %58 = vector.shape_cast %57 : vector<1x1280xf32> to vector<1280xf32>
    %c11 = arith.constant 11 : index
    %c0_14 = arith.constant 0 : index
    %59 = vector.load %arg11[%c11, %c0_14] : memref<25x1280xf32, #tpu.memory_space<vmem>>, vector<1x1280xf32>
    %60 = vector.shape_cast %59 : vector<1x1280xf32> to vector<1280xf32>
    %61 = vector.shape_cast %58 : vector<1280xf32> to vector<1x1280xf32>
    tpu.vector_store %arg11[%c11, %c0_14], %61 {strides = array<i32>} : memref<25x1280xf32, #tpu.memory_space<vmem>>, vector<1x1280xf32>,
    %62 = vector.extract_strided_slice %1 {offsets = [0, 74], sizes = [1, 1280], strides = [1, 1]} : vector<1x1536xf32> to vector<1x1280xf32>
    %63 = vector.shape_cast %62 : vector<1x1280xf32> to vector<1280xf32>
    %c12 = arith.constant 12 : index
    %c0_15 = arith.constant 0 : index
    %64 = vector.load %arg11[%c12, %c0_15] : memref<25x1280xf32, #tpu.memory_space<vmem>>, vector<1x1280xf32>
    %65 = vector.shape_cast %64 : vector<1x1280xf32> to vector<1280xf32>
    %66 = vector.shape_cast %63 : vector<1280xf32> to vector<1x1280xf32>
    tpu.vector_store %arg11[%c12, %c0_15], %66 {strides = array<i32>} : memref<25x1280xf32, #tpu.memory_space<vmem>>, vector<1x1280xf32>,
    %67 = vector.extract_strided_slice %1 {offsets = [0, 75], sizes = [1, 1280], strides = [1, 1]} : vector<1x1536xf32> to vector<1x1280xf32>
    %68 = vector.shape_cast %67 : vector<1x1280xf32> to vector<1280xf32>
    %c13 = arith.constant 13 : index
    %c0_16 = arith.constant 0 : index
    %69 = vector.load %arg11[%c13, %c0_16] : memref<25x1280xf32, #tpu.memory_space<vmem>>, vector<1x1280xf32>
    %70 = vector.shape_cast %69 : vector<1x1280xf32> to vector<1280xf32>
    %71 = vector.shape_cast %68 : vector<1280xf32> to vector<1x1280xf32>
    tpu.vector_store %arg11[%c13, %c0_16], %71 {strides = array<i32>} : memref<25x1280xf32, #tpu.memory_space<vmem>>, vector<1x1280xf32>,
    %72 = vector.extract_strided_slice %1 {offsets = [0, 76], sizes = [1, 1280], strides = [1, 1]} : vector<1x1536xf32> to vector<1x1280xf32>
    %73 = vector.shape_cast %72 : vector<1x1280xf32> to vector<1280xf32>
    %c14 = arith.constant 14 : index
    %c0_17 = arith.constant 0 : index
    %74 = vector.load %arg11[%c14, %c0_17] : memref<25x1280xf32, #tpu.memory_space<vmem>>, vector<1x1280xf32>
    %75 = vector.shape_cast %74 : vector<1x1280xf32> to vector<1280xf32>
    %76 = vector.shape_cast %73 : vector<1280xf32> to vector<1x1280xf32>
    tpu.vector_store %arg11[%c14, %c0_17], %76 {strides = array<i32>} : memref<25x1280xf32, #tpu.memory_space<vmem>>, vector<1x1280xf32>,
    %77 = vector.extract_strided_slice %1 {offsets = [0, 108], sizes = [1, 1280], strides = [1, 1]} : vector<1x1536xf32> to vector<1x1280xf32>
    %78 = vector.shape_cast %77 : vector<1x1280xf32> to vector<1280xf32>
    %c15 = arith.constant 15 : index
    %c0_18 = arith.constant 0 : index
    %79 = vector.load %arg11[%c15, %c0_18] : memref<25x1280xf32, #tpu.memory_space<vmem>>, vector<1x1280xf32>
    %80 = vector.shape_cast %79 : vector<1x1280xf32> to vector<1280xf32>
    %81 = vector.shape_cast %78 : vector<1280xf32> to vector<1x1280xf32>
    tpu.vector_store %arg11[%c15, %c0_18], %81 {strides = array<i32>} : memref<25x1280xf32, #tpu.memory_space<vmem>>, vector<1x1280xf32>,
    %82 = vector.extract_strided_slice %1 {offsets = [0, 109], sizes = [1, 1280], strides = [1, 1]} : vector<1x1536xf32> to vector<1x1280xf32>
    %83 = vector.shape_cast %82 : vector<1x1280xf32> to vector<1280xf32>
    %c16 = arith.constant 16 : index
    %c0_19 = arith.constant 0 : index
    %84 = vector.load %arg11[%c16, %c0_19] : memref<25x1280xf32, #tpu.memory_space<vmem>>, vector<1x1280xf32>
    %85 = vector.shape_cast %84 : vector<1x1280xf32> to vector<1280xf32>
    %86 = vector.shape_cast %83 : vector<1280xf32> to vector<1x1280xf32>
    tpu.vector_store %arg11[%c16, %c0_19], %86 {strides = array<i32>} : memref<25x1280xf32, #tpu.memory_space<vmem>>, vector<1x1280xf32>,
    %87 = vector.extract_strided_slice %1 {offsets = [0, 110], sizes = [1, 1280], strides = [1, 1]} : vector<1x1536xf32> to vector<1x1280xf32>
    %88 = vector.shape_cast %87 : vector<1x1280xf32> to vector<1280xf32>
    %c17 = arith.constant 17 : index
    %c0_20 = arith.constant 0 : index
    %89 = vector.load %arg11[%c17, %c0_20] : memref<25x1280xf32, #tpu.memory_space<vmem>>, vector<1x1280xf32>
    %90 = vector.shape_cast %89 : vector<1x1280xf32> to vector<1280xf32>
    %91 = vector.shape_cast %88 : vector<1280xf32> to vector<1x1280xf32>
    tpu.vector_store %arg11[%c17, %c0_20], %91 {strides = array<i32>} : memref<25x1280xf32, #tpu.memory_space<vmem>>, vector<1x1280xf32>,
    %92 = vector.extract_strided_slice %1 {offsets = [0, 111], sizes = [1, 1280], strides = [1, 1]} : vector<1x1536xf32> to vector<1x1280xf32>
    %93 = vector.shape_cast %92 : vector<1x1280xf32> to vector<1280xf32>
    %c18 = arith.constant 18 : index
    %c0_21 = arith.constant 0 : index
    %94 = vector.load %arg11[%c18, %c0_21] : memref<25x1280xf32, #tpu.memory_space<vmem>>, vector<1x1280xf32>
    %95 = vector.shape_cast %94 : vector<1x1280xf32> to vector<1280xf32>
    %96 = vector.shape_cast %93 : vector<1280xf32> to vector<1x1280xf32>
    tpu.vector_store %arg11[%c18, %c0_21], %96 {strides = array<i32>} : memref<25x1280xf32, #tpu.memory_space<vmem>>, vector<1x1280xf32>,
    %97 = vector.extract_strided_slice %1 {offsets = [0, 112], sizes = [1, 1280], strides = [1, 1]} : vector<1x1536xf32> to vector<1x1280xf32>
    %98 = vector.shape_cast %97 : vector<1x1280xf32> to vector<1280xf32>
    %c19 = arith.constant 19 : index
    %c0_22 = arith.constant 0 : index
    %99 = vector.load %arg11[%c19, %c0_22] : memref<25x1280xf32, #tpu.memory_space<vmem>>, vector<1x1280xf32>
    %100 = vector.shape_cast %99 : vector<1x1280xf32> to vector<1280xf32>
    %101 = vector.shape_cast %98 : vector<1280xf32> to vector<1x1280xf32>
    tpu.vector_store %arg11[%c19, %c0_22], %101 {strides = array<i32>} : memref<25x1280xf32, #tpu.memory_space<vmem>>, vector<1x1280xf32>,
    %102 = vector.extract_strided_slice %1 {offsets = [0, 144], sizes = [1, 1280], strides = [1, 1]} : vector<1x1536xf32> to vector<1x1280xf32>
    %103 = vector.shape_cast %102 : vector<1x1280xf32> to vector<1280xf32>
    %c20 = arith.constant 20 : index
    %c0_23 = arith.constant 0 : index
    %104 = vector.load %arg11[%c20, %c0_23] : memref<25x1280xf32, #tpu.memory_space<vmem>>, vector<1x1280xf32>
    %105 = vector.shape_cast %104 : vector<1x1280xf32> to vector<1280xf32>
    %106 = vector.shape_cast %103 : vector<1280xf32> to vector<1x1280xf32>
    tpu.vector_store %arg11[%c20, %c0_23], %106 {strides = array<i32>} : memref<25x1280xf32, #tpu.memory_space<vmem>>, vector<1x1280xf32>,
    %107 = vector.extract_strided_slice %1 {offsets = [0, 145], sizes = [1, 1280], strides = [1, 1]} : vector<1x1536xf32> to vector<1x1280xf32>
    %108 = vector.shape_cast %107 : vector<1x1280xf32> to vector<1280xf32>
    %c21 = arith.constant 21 : index
    %c0_24 = arith.constant 0 : index
    %109 = vector.load %arg11[%c21, %c0_24] : memref<25x1280xf32, #tpu.memory_space<vmem>>, vector<1x1280xf32>
    %110 = vector.shape_cast %109 : vector<1x1280xf32> to vector<1280xf32>
    %111 = vector.shape_cast %108 : vector<1280xf32> to vector<1x1280xf32>
    tpu.vector_store %arg11[%c21, %c0_24], %111 {strides = array<i32>} : memref<25x1280xf32, #tpu.memory_space<vmem>>, vector<1x1280xf32>,
    %112 = vector.extract_strided_slice %1 {offsets = [0, 146], sizes = [1, 1280], strides = [1, 1]} : vector<1x1536xf32> to vector<1x1280xf32>
    %113 = vector.shape_cast %112 : vector<1x1280xf32> to vector<1280xf32>
    %c22 = arith.constant 22 : index
    %c0_25 = arith.constant 0 : index
    %114 = vector.load %arg11[%c22, %c0_25] : memref<25x1280xf32, #tpu.memory_space<vmem>>, vector<1x1280xf32>
    %115 = vector.shape_cast %114 : vector<1x1280xf32> to vector<1280xf32>
    %116 = vector.shape_cast %113 : vector<1280xf32> to vector<1x1280xf32>
    tpu.vector_store %arg11[%c22, %c0_25], %116 {strides = array<i32>} : memref<25x1280xf32, #tpu.memory_space<vmem>>, vector<1x1280xf32>,
    %117 = vector.extract_strided_slice %1 {offsets = [0, 147], sizes = [1, 1280], strides = [1, 1]} : vector<1x1536xf32> to vector<1x1280xf32>
    %118 = vector.shape_cast %117 : vector<1x1280xf32> to vector<1280xf32>
    %c23 = arith.constant 23 : index
    %c0_26 = arith.constant 0 : index
    %119 = vector.load %arg11[%c23, %c0_26] : memref<25x1280xf32, #tpu.memory_space<vmem>>, vector<1x1280xf32>
    %120 = vector.shape_cast %119 : vector<1x1280xf32> to vector<1280xf32>
    %121 = vector.shape_cast %118 : vector<1280xf32> to vector<1x1280xf32>
    tpu.vector_store %arg11[%c23, %c0_26], %121 {strides = array<i32>} : memref<25x1280xf32, #tpu.memory_space<vmem>>, vector<1x1280xf32>,
    %122 = vector.extract_strided_slice %1 {offsets = [0, 148], sizes = [1, 1280], strides = [1, 1]} : vector<1x1536xf32> to vector<1x1280xf32>
    %123 = vector.shape_cast %122 : vector<1x1280xf32> to vector<1280xf32>
    %c24 = arith.constant 24 : index
    %c0_27 = arith.constant 0 : index
    %124 = vector.load %arg11[%c24, %c0_27] : memref<25x1280xf32, #tpu.memory_space<vmem>>, vector<1x1280xf32>
    %125 = vector.shape_cast %124 : vector<1x1280xf32> to vector<1280xf32>
    %126 = vector.shape_cast %123 : vector<1280xf32> to vector<1x1280xf32>
    tpu.vector_store %arg11[%c24, %c0_27], %126 {strides = array<i32>} : memref<25x1280xf32, #tpu.memory_space<vmem>>, vector<1x1280xf32>,
    %c0_28 = arith.constant 0 : index
    %c0_29 = arith.constant 0 : index
    %127 = vector.load %arg2[%c0_28, %c0_29] : memref<16x25xbf16, #tpu.memory_space<vmem>>, vector<16x25xbf16>
    %c0_30 = arith.constant 0 : index
    %c0_31 = arith.constant 0 : index
    %128 = vector.load %arg11[%c0_30, %c0_31] : memref<25x1280xf32, #tpu.memory_space<vmem>>, vector<25x1280xf32>
    %129 = arith.truncf %128 : vector<25x1280xf32> to vector<25x1280xbf16>
    %cst = arith.constant dense<0.000000e+00> : vector<16x1280xf32>
    %130 = tpu.matmul %127, %129, %cst {dimension_numbers = #tpu.dot_dimension_numbers<[1], [0], [0], [1], [0, 0, 1, 1], [], []>} : vector<16x25xbf16>, vector<25x1280xbf16>, vector<16x1280xf32> -> vector<16x1280xf32>
    %c0_32 = arith.constant 0 : index
    %c0_33 = arith.constant 0 : index
    %131 = vector.load %arg3[%c0_32, %c0_33] : memref<16x1xf32, #tpu.memory_space<vmem>>, vector<16x1xf32>
    %132 = vector.broadcast %131 : vector<16x1xf32> to vector<16x1280xf32>
    %133 = arith.addf %130, %132 : vector<16x1280xf32>
    %cst_34 = arith.constant 0.000000e+00 : f32
    %134 = vector.broadcast %cst_34 : f32 to vector<16x1280xf32>
    %135 = arith.maximumf %133, %134 : vector<16x1280xf32>
    %136 = vector.extract_strided_slice %135 {offsets = [0, 0], sizes = [16, 1152], strides = [1, 1]} : vector<16x1280xf32> to vector<16x1152xf32>
    %137 = vector.extract_strided_slice %135 {offsets = [0, 1], sizes = [16, 1152], strides = [1, 1]} : vector<16x1280xf32> to vector<16x1152xf32>
    %138 = arith.maximumf %136, %137 : vector<16x1152xf32>
    %139 = vector.extract_strided_slice %135 {offsets = [0, 36], sizes = [16, 1152], strides = [1, 1]} : vector<16x1280xf32> to vector<16x1152xf32>
    %140 = vector.extract_strided_slice %135 {offsets = [0, 37], sizes = [16, 1152], strides = [1, 1]} : vector<16x1280xf32> to vector<16x1152xf32>
    %141 = arith.maximumf %139, %140 : vector<16x1152xf32>
    %142 = arith.maximumf %138, %141 : vector<16x1152xf32>
    %143 = arith.truncf %142 : vector<16x1152xf32> to vector<16x1152xbf16>
    %c0_35 = arith.constant 0 : index
    %c0_36 = arith.constant 0 : index
    %144 = vector.load %arg4[%c0_35, %c0_36] : memref<1152x400xbf16, #tpu.memory_space<vmem>>, vector<1152x400xbf16>
    %cst_37 = arith.constant dense<0.000000e+00> : vector<16x400xf32>
    %145 = tpu.matmul %143, %144, %cst_37 {dimension_numbers = #tpu.dot_dimension_numbers<[1], [0], [0], [1], [0, 0, 1, 1], [], []>} : vector<16x1152xbf16>, vector<1152x400xbf16>, vector<16x400xf32> -> vector<16x400xf32>
    %146 = vector.extract_strided_slice %145 {offsets = [0, 0], sizes = [16, 316], strides = [1, 1]} : vector<16x400xf32> to vector<16x316xf32>
    %c0_38 = arith.constant 0 : index
    %c0_39 = arith.constant 0 : index
    %147 = vector.load %arg12[%c0_38, %c0_39] : memref<400x316xf32, #tpu.memory_space<vmem>>, vector<16x316xf32>
    tpu.vector_store %arg12[%c0_38, %c0_39], %146 {strides = array<i32>} : memref<400x316xf32, #tpu.memory_space<vmem>>, vector<16x316xf32>,
    %148 = vector.extract_strided_slice %145 {offsets = [0, 1], sizes = [16, 316], strides = [1, 1]} : vector<16x400xf32> to vector<16x316xf32>
    %c16_40 = arith.constant 16 : index
    %c0_41 = arith.constant 0 : index
    %149 = vector.load %arg12[%c16_40, %c0_41] : memref<400x316xf32, #tpu.memory_space<vmem>>, vector<16x316xf32>
    tpu.vector_store %arg12[%c16_40, %c0_41], %148 {strides = array<i32>} : memref<400x316xf32, #tpu.memory_space<vmem>>, vector<16x316xf32>,
    %150 = vector.extract_strided_slice %145 {offsets = [0, 2], sizes = [16, 316], strides = [1, 1]} : vector<16x400xf32> to vector<16x316xf32>
    %c32 = arith.constant 32 : index
    %c0_42 = arith.constant 0 : index
    %151 = vector.load %arg12[%c32, %c0_42] : memref<400x316xf32, #tpu.memory_space<vmem>>, vector<16x316xf32>
    tpu.vector_store %arg12[%c32, %c0_42], %150 {strides = array<i32>} : memref<400x316xf32, #tpu.memory_space<vmem>>, vector<16x316xf32>,
    %152 = vector.extract_strided_slice %145 {offsets = [0, 3], sizes = [16, 316], strides = [1, 1]} : vector<16x400xf32> to vector<16x316xf32>
    %c48 = arith.constant 48 : index
    %c0_43 = arith.constant 0 : index
    %153 = vector.load %arg12[%c48, %c0_43] : memref<400x316xf32, #tpu.memory_space<vmem>>, vector<16x316xf32>
    tpu.vector_store %arg12[%c48, %c0_43], %152 {strides = array<i32>} : memref<400x316xf32, #tpu.memory_space<vmem>>, vector<16x316xf32>,
    %154 = vector.extract_strided_slice %145 {offsets = [0, 4], sizes = [16, 316], strides = [1, 1]} : vector<16x400xf32> to vector<16x316xf32>
    %c64 = arith.constant 64 : index
    %c0_44 = arith.constant 0 : index
    %155 = vector.load %arg12[%c64, %c0_44] : memref<400x316xf32, #tpu.memory_space<vmem>>, vector<16x316xf32>
    tpu.vector_store %arg12[%c64, %c0_44], %154 {strides = array<i32>} : memref<400x316xf32, #tpu.memory_space<vmem>>, vector<16x316xf32>,
    %156 = vector.extract_strided_slice %145 {offsets = [0, 20], sizes = [16, 316], strides = [1, 1]} : vector<16x400xf32> to vector<16x316xf32>
    %c80 = arith.constant 80 : index
    %c0_45 = arith.constant 0 : index
    %157 = vector.load %arg12[%c80, %c0_45] : memref<400x316xf32, #tpu.memory_space<vmem>>, vector<16x316xf32>
    tpu.vector_store %arg12[%c80, %c0_45], %156 {strides = array<i32>} : memref<400x316xf32, #tpu.memory_space<vmem>>, vector<16x316xf32>,
    %158 = vector.extract_strided_slice %145 {offsets = [0, 21], sizes = [16, 316], strides = [1, 1]} : vector<16x400xf32> to vector<16x316xf32>
    %c96 = arith.constant 96 : index
    %c0_46 = arith.constant 0 : index
    %159 = vector.load %arg12[%c96, %c0_46] : memref<400x316xf32, #tpu.memory_space<vmem>>, vector<16x316xf32>
    tpu.vector_store %arg12[%c96, %c0_46], %158 {strides = array<i32>} : memref<400x316xf32, #tpu.memory_space<vmem>>, vector<16x316xf32>,
    %160 = vector.extract_strided_slice %145 {offsets = [0, 22], sizes = [16, 316], strides = [1, 1]} : vector<16x400xf32> to vector<16x316xf32>
    %c112 = arith.constant 112 : index
    %c0_47 = arith.constant 0 : index
    %161 = vector.load %arg12[%c112, %c0_47] : memref<400x316xf32, #tpu.memory_space<vmem>>, vector<16x316xf32>
    tpu.vector_store %arg12[%c112, %c0_47], %160 {strides = array<i32>} : memref<400x316xf32, #tpu.memory_space<vmem>>, vector<16x316xf32>,
    %162 = vector.extract_strided_slice %145 {offsets = [0, 23], sizes = [16, 316], strides = [1, 1]} : vector<16x400xf32> to vector<16x316xf32>
    %c128 = arith.constant 128 : index
    %c0_48 = arith.constant 0 : index
    %163 = vector.load %arg12[%c128, %c0_48] : memref<400x316xf32, #tpu.memory_space<vmem>>, vector<16x316xf32>
    tpu.vector_store %arg12[%c128, %c0_48], %162 {strides = array<i32>} : memref<400x316xf32, #tpu.memory_space<vmem>>, vector<16x316xf32>,
    %164 = vector.extract_strided_slice %145 {offsets = [0, 24], sizes = [16, 316], strides = [1, 1]} : vector<16x400xf32> to vector<16x316xf32>
    %c144 = arith.constant 144 : index
    %c0_49 = arith.constant 0 : index
    %165 = vector.load %arg12[%c144, %c0_49] : memref<400x316xf32, #tpu.memory_space<vmem>>, vector<16x316xf32>
    tpu.vector_store %arg12[%c144, %c0_49], %164 {strides = array<i32>} : memref<400x316xf32, #tpu.memory_space<vmem>>, vector<16x316xf32>,
    %166 = vector.extract_strided_slice %145 {offsets = [0, 40], sizes = [16, 316], strides = [1, 1]} : vector<16x400xf32> to vector<16x316xf32>
    %c160 = arith.constant 160 : index
    %c0_50 = arith.constant 0 : index
    %167 = vector.load %arg12[%c160, %c0_50] : memref<400x316xf32, #tpu.memory_space<vmem>>, vector<16x316xf32>
    tpu.vector_store %arg12[%c160, %c0_50], %166 {strides = array<i32>} : memref<400x316xf32, #tpu.memory_space<vmem>>, vector<16x316xf32>,
    %168 = vector.extract_strided_slice %145 {offsets = [0, 41], sizes = [16, 316], strides = [1, 1]} : vector<16x400xf32> to vector<16x316xf32>
    %c176 = arith.constant 176 : index
    %c0_51 = arith.constant 0 : index
    %169 = vector.load %arg12[%c176, %c0_51] : memref<400x316xf32, #tpu.memory_space<vmem>>, vector<16x316xf32>
    tpu.vector_store %arg12[%c176, %c0_51], %168 {strides = array<i32>} : memref<400x316xf32, #tpu.memory_space<vmem>>, vector<16x316xf32>,
    %170 = vector.extract_strided_slice %145 {offsets = [0, 42], sizes = [16, 316], strides = [1, 1]} : vector<16x400xf32> to vector<16x316xf32>
    %c192 = arith.constant 192 : index
    %c0_52 = arith.constant 0 : index
    %171 = vector.load %arg12[%c192, %c0_52] : memref<400x316xf32, #tpu.memory_space<vmem>>, vector<16x316xf32>
    tpu.vector_store %arg12[%c192, %c0_52], %170 {strides = array<i32>} : memref<400x316xf32, #tpu.memory_space<vmem>>, vector<16x316xf32>,
    %172 = vector.extract_strided_slice %145 {offsets = [0, 43], sizes = [16, 316], strides = [1, 1]} : vector<16x400xf32> to vector<16x316xf32>
    %c208 = arith.constant 208 : index
    %c0_53 = arith.constant 0 : index
    %173 = vector.load %arg12[%c208, %c0_53] : memref<400x316xf32, #tpu.memory_space<vmem>>, vector<16x316xf32>
    tpu.vector_store %arg12[%c208, %c0_53], %172 {strides = array<i32>} : memref<400x316xf32, #tpu.memory_space<vmem>>, vector<16x316xf32>,
    %174 = vector.extract_strided_slice %145 {offsets = [0, 44], sizes = [16, 316], strides = [1, 1]} : vector<16x400xf32> to vector<16x316xf32>
    %c224 = arith.constant 224 : index
    %c0_54 = arith.constant 0 : index
    %175 = vector.load %arg12[%c224, %c0_54] : memref<400x316xf32, #tpu.memory_space<vmem>>, vector<16x316xf32>
    tpu.vector_store %arg12[%c224, %c0_54], %174 {strides = array<i32>} : memref<400x316xf32, #tpu.memory_space<vmem>>, vector<16x316xf32>,
    %176 = vector.extract_strided_slice %145 {offsets = [0, 60], sizes = [16, 316], strides = [1, 1]} : vector<16x400xf32> to vector<16x316xf32>
    %c240 = arith.constant 240 : index
    %c0_55 = arith.constant 0 : index
    %177 = vector.load %arg12[%c240, %c0_55] : memref<400x316xf32, #tpu.memory_space<vmem>>, vector<16x316xf32>
    tpu.vector_store %arg12[%c240, %c0_55], %176 {strides = array<i32>} : memref<400x316xf32, #tpu.memory_space<vmem>>, vector<16x316xf32>,
    %178 = vector.extract_strided_slice %145 {offsets = [0, 61], sizes = [16, 316], strides = [1, 1]} : vector<16x400xf32> to vector<16x316xf32>
    %c256 = arith.constant 256 : index
    %c0_56 = arith.constant 0 : index
    %179 = vector.load %arg12[%c256, %c0_56] : memref<400x316xf32, #tpu.memory_space<vmem>>, vector<16x316xf32>
    tpu.vector_store %arg12[%c256, %c0_56], %178 {strides = array<i32>} : memref<400x316xf32, #tpu.memory_space<vmem>>, vector<16x316xf32>,
    %180 = vector.extract_strided_slice %145 {offsets = [0, 62], sizes = [16, 316], strides = [1, 1]} : vector<16x400xf32> to vector<16x316xf32>
    %c272 = arith.constant 272 : index
    %c0_57 = arith.constant 0 : index
    %181 = vector.load %arg12[%c272, %c0_57] : memref<400x316xf32, #tpu.memory_space<vmem>>, vector<16x316xf32>
    tpu.vector_store %arg12[%c272, %c0_57], %180 {strides = array<i32>} : memref<400x316xf32, #tpu.memory_space<vmem>>, vector<16x316xf32>,
    %182 = vector.extract_strided_slice %145 {offsets = [0, 63], sizes = [16, 316], strides = [1, 1]} : vector<16x400xf32> to vector<16x316xf32>
    %c288 = arith.constant 288 : index
    %c0_58 = arith.constant 0 : index
    %183 = vector.load %arg12[%c288, %c0_58] : memref<400x316xf32, #tpu.memory_space<vmem>>, vector<16x316xf32>
    tpu.vector_store %arg12[%c288, %c0_58], %182 {strides = array<i32>} : memref<400x316xf32, #tpu.memory_space<vmem>>, vector<16x316xf32>,
    %184 = vector.extract_strided_slice %145 {offsets = [0, 64], sizes = [16, 316], strides = [1, 1]} : vector<16x400xf32> to vector<16x316xf32>
    %c304 = arith.constant 304 : index
    %c0_59 = arith.constant 0 : index
    %185 = vector.load %arg12[%c304, %c0_59] : memref<400x316xf32, #tpu.memory_space<vmem>>, vector<16x316xf32>
    tpu.vector_store %arg12[%c304, %c0_59], %184 {strides = array<i32>} : memref<400x316xf32, #tpu.memory_space<vmem>>, vector<16x316xf32>,
    %186 = vector.extract_strided_slice %145 {offsets = [0, 80], sizes = [16, 316], strides = [1, 1]} : vector<16x400xf32> to vector<16x316xf32>
    %c320 = arith.constant 320 : index
    %c0_60 = arith.constant 0 : index
    %187 = vector.load %arg12[%c320, %c0_60] : memref<400x316xf32, #tpu.memory_space<vmem>>, vector<16x316xf32>
    tpu.vector_store %arg12[%c320, %c0_60], %186 {strides = array<i32>} : memref<400x316xf32, #tpu.memory_space<vmem>>, vector<16x316xf32>,
    %188 = vector.extract_strided_slice %145 {offsets = [0, 81], sizes = [16, 316], strides = [1, 1]} : vector<16x400xf32> to vector<16x316xf32>
    %c336 = arith.constant 336 : index
    %c0_61 = arith.constant 0 : index
    %189 = vector.load %arg12[%c336, %c0_61] : memref<400x316xf32, #tpu.memory_space<vmem>>, vector<16x316xf32>
    tpu.vector_store %arg12[%c336, %c0_61], %188 {strides = array<i32>} : memref<400x316xf32, #tpu.memory_space<vmem>>, vector<16x316xf32>,
    %190 = vector.extract_strided_slice %145 {offsets = [0, 82], sizes = [16, 316], strides = [1, 1]} : vector<16x400xf32> to vector<16x316xf32>
    %c352 = arith.constant 352 : index
    %c0_62 = arith.constant 0 : index
    %191 = vector.load %arg12[%c352, %c0_62] : memref<400x316xf32, #tpu.memory_space<vmem>>, vector<16x316xf32>
    tpu.vector_store %arg12[%c352, %c0_62], %190 {strides = array<i32>} : memref<400x316xf32, #tpu.memory_space<vmem>>, vector<16x316xf32>,
    %192 = vector.extract_strided_slice %145 {offsets = [0, 83], sizes = [16, 316], strides = [1, 1]} : vector<16x400xf32> to vector<16x316xf32>
    %c368 = arith.constant 368 : index
    %c0_63 = arith.constant 0 : index
    %193 = vector.load %arg12[%c368, %c0_63] : memref<400x316xf32, #tpu.memory_space<vmem>>, vector<16x316xf32>
    tpu.vector_store %arg12[%c368, %c0_63], %192 {strides = array<i32>} : memref<400x316xf32, #tpu.memory_space<vmem>>, vector<16x316xf32>,
    %194 = vector.extract_strided_slice %145 {offsets = [0, 84], sizes = [16, 316], strides = [1, 1]} : vector<16x400xf32> to vector<16x316xf32>
    %c384 = arith.constant 384 : index
    %c0_64 = arith.constant 0 : index
    %195 = vector.load %arg12[%c384, %c0_64] : memref<400x316xf32, #tpu.memory_space<vmem>>, vector<16x316xf32>
    tpu.vector_store %arg12[%c384, %c0_64], %194 {strides = array<i32>} : memref<400x316xf32, #tpu.memory_space<vmem>>, vector<16x316xf32>,
    %c0_65 = arith.constant 0 : index
    %c0_66 = arith.constant 0 : index
    %196 = vector.load %arg5[%c0_65, %c0_66] : memref<32x400xbf16, #tpu.memory_space<vmem>>, vector<32x400xbf16>
    %c0_67 = arith.constant 0 : index
    %c0_68 = arith.constant 0 : index
    %197 = vector.load %arg12[%c0_67, %c0_68] : memref<400x316xf32, #tpu.memory_space<vmem>>, vector<400x316xf32>
    %198 = arith.truncf %197 : vector<400x316xf32> to vector<400x316xbf16>
    %cst_69 = arith.constant dense<0.000000e+00> : vector<32x316xf32>
    %199 = tpu.matmul %196, %198, %cst_69 {dimension_numbers = #tpu.dot_dimension_numbers<[1], [0], [0], [1], [0, 0, 1, 1], [], []>} : vector<32x400xbf16>, vector<400x316xbf16>, vector<32x316xf32> -> vector<32x316xf32>
    %c0_70 = arith.constant 0 : index
    %c0_71 = arith.constant 0 : index
    %200 = vector.load %arg6[%c0_70, %c0_71] : memref<32x1xf32, #tpu.memory_space<vmem>>, vector<32x1xf32>
    %201 = vector.broadcast %200 : vector<32x1xf32> to vector<32x316xf32>
    %202 = arith.addf %199, %201 : vector<32x316xf32>
    %cst_72 = arith.constant 0.000000e+00 : f32
    %203 = vector.broadcast %cst_72 : f32 to vector<32x316xf32>
    %204 = arith.maximumf %202, %203 : vector<32x316xf32>
    %205 = vector.extract_strided_slice %204 {offsets = [0, 0], sizes = [32, 295], strides = [1, 1]} : vector<32x316xf32> to vector<32x295xf32>
    %206 = vector.extract_strided_slice %204 {offsets = [0, 1], sizes = [32, 295], strides = [1, 1]} : vector<32x316xf32> to vector<32x295xf32>
    %207 = arith.maximumf %205, %206 : vector<32x295xf32>
    %208 = vector.extract_strided_slice %204 {offsets = [0, 20], sizes = [32, 295], strides = [1, 1]} : vector<32x316xf32> to vector<32x295xf32>
    %209 = vector.extract_strided_slice %204 {offsets = [0, 21], sizes = [32, 295], strides = [1, 1]} : vector<32x316xf32> to vector<32x295xf32>
    %210 = arith.maximumf %208, %209 : vector<32x295xf32>
    %211 = arith.maximumf %207, %210 : vector<32x295xf32>
    %c0_73 = arith.constant 0 : index
    %c0_74 = arith.constant 0 : index
    %212 = vector.load %arg7[%c0_73, %c0_74] : memref<295x64xf32, #tpu.memory_space<vmem>>, vector<295x64xf32>
    %cst_75 = arith.constant dense<0.000000e+00> : vector<32x64xf32>
    %213 = tpu.matmul %211, %212, %cst_75 {dimension_numbers = #tpu.dot_dimension_numbers<[1], [0], [0], [1], [0, 0, 1, 1], [], []>} : vector<32x295xf32>, vector<295x64xf32>, vector<32x64xf32> -> vector<32x64xf32>
    %214 = vector.extract_strided_slice %213 {offsets = [0, 0], sizes = [1, 64], strides = [1, 1]} : vector<32x64xf32> to vector<1x64xf32>
    %215 = vector.extract_strided_slice %213 {offsets = [1, 0], sizes = [1, 64], strides = [1, 1]} : vector<32x64xf32> to vector<1x64xf32>
    %216 = vector.extract_strided_slice %213 {offsets = [2, 0], sizes = [1, 64], strides = [1, 1]} : vector<32x64xf32> to vector<1x64xf32>
    %217 = vector.extract_strided_slice %213 {offsets = [3, 0], sizes = [1, 64], strides = [1, 1]} : vector<32x64xf32> to vector<1x64xf32>
    %218 = vector.extract_strided_slice %213 {offsets = [4, 0], sizes = [1, 64], strides = [1, 1]} : vector<32x64xf32> to vector<1x64xf32>
    %219 = vector.extract_strided_slice %213 {offsets = [5, 0], sizes = [1, 64], strides = [1, 1]} : vector<32x64xf32> to vector<1x64xf32>
    %220 = vector.extract_strided_slice %213 {offsets = [6, 0], sizes = [1, 64], strides = [1, 1]} : vector<32x64xf32> to vector<1x64xf32>
    %221 = vector.extract_strided_slice %213 {offsets = [7, 0], sizes = [1, 64], strides = [1, 1]} : vector<32x64xf32> to vector<1x64xf32>
    %222 = vector.extract_strided_slice %213 {offsets = [8, 0], sizes = [1, 64], strides = [1, 1]} : vector<32x64xf32> to vector<1x64xf32>
    %223 = vector.extract_strided_slice %213 {offsets = [9, 0], sizes = [1, 64], strides = [1, 1]} : vector<32x64xf32> to vector<1x64xf32>
    %224 = vector.extract_strided_slice %213 {offsets = [10, 0], sizes = [1, 64], strides = [1, 1]} : vector<32x64xf32> to vector<1x64xf32>
    %225 = vector.extract_strided_slice %213 {offsets = [11, 0], sizes = [1, 64], strides = [1, 1]} : vector<32x64xf32> to vector<1x64xf32>
    %226 = vector.extract_strided_slice %213 {offsets = [12, 0], sizes = [1, 64], strides = [1, 1]} : vector<32x64xf32> to vector<1x64xf32>
    %227 = vector.extract_strided_slice %213 {offsets = [13, 0], sizes = [1, 64], strides = [1, 1]} : vector<32x64xf32> to vector<1x64xf32>
    %228 = vector.extract_strided_slice %213 {offsets = [14, 0], sizes = [1, 64], strides = [1, 1]} : vector<32x64xf32> to vector<1x64xf32>
    %229 = vector.extract_strided_slice %213 {offsets = [15, 0], sizes = [1, 64], strides = [1, 1]} : vector<32x64xf32> to vector<1x64xf32>
    %230 = vector.extract_strided_slice %213 {offsets = [16, 0], sizes = [1, 64], strides = [1, 1]} : vector<32x64xf32> to vector<1x64xf32>
    %231 = vector.extract_strided_slice %213 {offsets = [17, 0], sizes = [1, 64], strides = [1, 1]} : vector<32x64xf32> to vector<1x64xf32>
    %232 = vector.extract_strided_slice %213 {offsets = [18, 0], sizes = [1, 64], strides = [1, 1]} : vector<32x64xf32> to vector<1x64xf32>
    %233 = vector.extract_strided_slice %213 {offsets = [19, 0], sizes = [1, 64], strides = [1, 1]} : vector<32x64xf32> to vector<1x64xf32>
    %234 = vector.extract_strided_slice %213 {offsets = [20, 0], sizes = [1, 64], strides = [1, 1]} : vector<32x64xf32> to vector<1x64xf32>
    %235 = vector.extract_strided_slice %213 {offsets = [21, 0], sizes = [1, 64], strides = [1, 1]} : vector<32x64xf32> to vector<1x64xf32>
    %236 = vector.extract_strided_slice %213 {offsets = [22, 0], sizes = [1, 64], strides = [1, 1]} : vector<32x64xf32> to vector<1x64xf32>
    %237 = vector.extract_strided_slice %213 {offsets = [23, 0], sizes = [1, 64], strides = [1, 1]} : vector<32x64xf32> to vector<1x64xf32>
    %238 = vector.extract_strided_slice %213 {offsets = [24, 0], sizes = [1, 64], strides = [1, 1]} : vector<32x64xf32> to vector<1x64xf32>
    %239 = vector.extract_strided_slice %213 {offsets = [25, 0], sizes = [1, 64], strides = [1, 1]} : vector<32x64xf32> to vector<1x64xf32>
    %240 = vector.extract_strided_slice %213 {offsets = [26, 0], sizes = [1, 64], strides = [1, 1]} : vector<32x64xf32> to vector<1x64xf32>
    %241 = vector.extract_strided_slice %213 {offsets = [27, 0], sizes = [1, 64], strides = [1, 1]} : vector<32x64xf32> to vector<1x64xf32>
    %242 = vector.extract_strided_slice %213 {offsets = [28, 0], sizes = [1, 64], strides = [1, 1]} : vector<32x64xf32> to vector<1x64xf32>
    %243 = vector.extract_strided_slice %213 {offsets = [29, 0], sizes = [1, 64], strides = [1, 1]} : vector<32x64xf32> to vector<1x64xf32>
    %244 = vector.extract_strided_slice %213 {offsets = [30, 0], sizes = [1, 64], strides = [1, 1]} : vector<32x64xf32> to vector<1x64xf32>
    %245 = vector.extract_strided_slice %213 {offsets = [31, 0], sizes = [1, 64], strides = [1, 1]} : vector<32x64xf32> to vector<1x64xf32>
    %246 = tpu.concatenate %214, %215, %216, %217, %218, %219, %220, %221, %222, %223, %224, %225, %226, %227, %228, %229 in 1 : vector<1x64xf32>, vector<1x64xf32>, vector<1x64xf32>, vector<1x64xf32>, vector<1x64xf32>, vector<1x64xf32>, vector<1x64xf32>, vector<1x64xf32>, vector<1x64xf32>, vector<1x64xf32>, vector<1x64xf32>, vector<1x64xf32>, vector<1x64xf32>, vector<1x64xf32>, vector<1x64xf32>, vector<1x64xf32> -> vector<1x1024xf32>
    %247 = tpu.concatenate %230, %231, %232, %233, %234, %235, %236, %237, %238, %239, %240, %241, %242, %243, %244, %245 in 1 : vector<1x64xf32>, vector<1x64xf32>, vector<1x64xf32>, vector<1x64xf32>, vector<1x64xf32>, vector<1x64xf32>, vector<1x64xf32>, vector<1x64xf32>, vector<1x64xf32>, vector<1x64xf32>, vector<1x64xf32>, vector<1x64xf32>, vector<1x64xf32>, vector<1x64xf32>, vector<1x64xf32>, vector<1x64xf32> -> vector<1x1024xf32>
    %248 = tpu.concatenate %246, %247 in 1 : vector<1x1024xf32>, vector<1x1024xf32> -> vector<1x2048xf32>
    %c0_76 = arith.constant 0 : index
    %c0_77 = arith.constant 0 : index
    %249 = vector.load %arg8[%c0_76, %c0_77] : memref<2048x10xf32, #tpu.memory_space<vmem>>, vector<2048x10xf32>
    %cst_78 = arith.constant dense<0.000000e+00> : vector<1x10xf32>
    %250 = tpu.matmul %248, %249, %cst_78 {dimension_numbers = #tpu.dot_dimension_numbers<[1], [0], [0], [1], [0, 0, 1, 1], [], []>} : vector<1x2048xf32>, vector<2048x10xf32>, vector<1x10xf32> -> vector<1x10xf32>
    %c0_79 = arith.constant 0 : index
    %c0_80 = arith.constant 0 : index
    %251 = vector.load %arg9[%c0_79, %c0_80] : memref<1x10xf32, #tpu.memory_space<vmem>>, vector<1x10xf32>
    %252 = arith.addf %250, %251 : vector<1x10xf32>
    %cst_81 = arith.constant dense<0xFF800000> : vector<1xf32>
    %253 = vector.multi_reduction <maximumf>, %252, %cst_81 [1] : vector<1x10xf32> to vector<1xf32>
    %254 = vector.shape_cast %253 : vector<1xf32> to vector<1x1xf32>
    %255 = vector.broadcast %254 : vector<1x1xf32> to vector<1x10xf32>
    %256 = arith.subf %252, %255 : vector<1x10xf32>
    %257 = math.exp %256 : vector<1x10xf32>
    %cst_82 = arith.constant dense<0.000000e+00> : vector<1xf32>
    %258 = vector.multi_reduction <add>, %257, %cst_82 [1] : vector<1x10xf32> to vector<1xf32>
    %259 = vector.shape_cast %258 : vector<1xf32> to vector<1x1xf32>
    %260 = vector.broadcast %259 : vector<1x1xf32> to vector<1x10xf32>
    %261 = arith.divf %257, %260 : vector<1x10xf32>
    %c0_83 = arith.constant 0 : index
    %c0_84 = arith.constant 0 : index
    %c0_85 = arith.constant 0 : index
    %262 = vector.load %arg10[%c0_83, %c0_84, %c0_85] : memref<1x1x10xf32, #tpu.memory_space<vmem>>, vector<1x1x10xf32>
    %263 = vector.shape_cast %262 : vector<1x1x10xf32> to vector<1x10xf32>
    %264 = vector.shape_cast %261 : vector<1x10xf32> to vector<1x1x10xf32>
    tpu.vector_store %arg10[%c0_83, %c0_84, %c0_85], %264 {strides = array<i32>} : memref<1x1x10xf32, #tpu.memory_space<vmem>>, vector<1x1x10xf32>,
    return
  }
  func.func @transform_0(%arg0: i32) -> (i32, i32, i32) {
    %c0_i32 = arith.constant 0 : i32
    %c0_i32_0 = arith.constant 0 : i32
    %c0_i32_1 = arith.constant 0 : i32
    return %arg0, %c0_i32, %c0_i32_0 : i32, i32, i32
  }
  func.func @transform_1(%arg0: i32) -> (i32, i32) {
    %c0_i32 = arith.constant 0 : i32
    %c0_i32_0 = arith.constant 0 : i32
    %c0_i32_1 = arith.constant 0 : i32
    return %c0_i32, %c0_i32_0 : i32, i32
  }
  func.func @transform_2(%arg0: i32) -> (i32, i32) {
    %c0_i32 = arith.constant 0 : i32
    %c0_i32_0 = arith.constant 0 : i32
    %c0_i32_1 = arith.constant 0 : i32
    return %c0_i32, %c0_i32_0 : i32, i32
  }
  func.func @transform_3(%arg0: i32) -> (i32, i32) {
    %c0_i32 = arith.constant 0 : i32
    %c0_i32_0 = arith.constant 0 : i32
    %c0_i32_1 = arith.constant 0 : i32
    return %c0_i32, %c0_i32_0 : i32, i32
  }
  func.func @transform_4(%arg0: i32) -> (i32, i32) {
    %c0_i32 = arith.constant 0 : i32
    %c0_i32_0 = arith.constant 0 : i32
    %c0_i32_1 = arith.constant 0 : i32
    return %c0_i32, %c0_i32_0 : i32, i32
  }
  func.func @transform_5(%arg0: i32) -> (i32, i32) {
    %c0_i32 = arith.constant 0 : i32
    %c0_i32_0 = arith.constant 0 : i32
    %c0_i32_1 = arith.constant 0 : i32
    return %c0_i32, %c0_i32_0 : i32, i32
  }
  func.func @transform_6(%arg0: i32) -> (i32, i32) {
    %c0_i32 = arith.constant 0 : i32
    %c0_i32_0 = arith.constant 0 : i32
    %c0_i32_1 = arith.constant 0 : i32
    return %c0_i32, %c0_i32_0 : i32, i32
  }
  func.func @transform_7(%arg0: i32) -> (i32, i32) {
    %c0_i32 = arith.constant 0 : i32
    %c0_i32_0 = arith.constant 0 : i32
    %c0_i32_1 = arith.constant 0 : i32
    return %c0_i32, %c0_i32_0 : i32, i32
  }
  func.func @transform_8(%arg0: i32) -> (i32, i32) {
    %c0_i32 = arith.constant 0 : i32
    %c0_i32_0 = arith.constant 0 : i32
    %c0_i32_1 = arith.constant 0 : i32
    return %c0_i32, %c0_i32_0 : i32, i32
  }
  func.func @transform_9(%arg0: i32) -> (i32, i32, i32) {
    %c0_i32 = arith.constant 0 : i32
    %c0_i32_0 = arith.constant 0 : i32
    %c0_i32_1 = arith.constant 0 : i32
    return %arg0, %c0_i32, %c0_i32_0 : i32, i32, i32
  }
}

</mosaic_0001>

<bundles_post_ra>
// kernel: cnn_forward.1
= control target key start
LH: loop header
LB: loop body
LE: loop exit
PB: predicated region body
PF: predicated region fallthrough
CT: control target
= control target key end

     0   :  { %s11518_s0 = inlined_call_operand.vmem [shape: f32[2,1,1536], index: 0, kind: input, shape index: {}]   ;;  %s11519_s1 = inlined_call_operand.vmem [shape: bf16[16,25], index: 1, kind: input, shape index: {}]   ;;  %s11520_s2 = inlined_call_operand.vmem [shape: f32[16,1], index: 2, kind: input, shape index: {}]   ;;  %s11521_s3 = inlined_call_operand.vmem [shape: bf16[1152,400], index: 3, kind: input, shape index: {}]   ;;  %s11522_s4 = inlined_call_operand.vmem [shape: bf16[32,400], index: 4, kind: input, shape index: {}]   ;;  %s11523_s5 = inlined_call_operand.vmem [shape: f32[32,1], index: 5, kind: input, shape index: {}]   ;;  %s11524_s6 = inlined_call_operand.vmem [shape: f32[295,64], index: 6, kind: input, shape index: {}]   ;;  %s11525_s7 = inlined_call_operand.vmem [shape: f32[2048,10], index: 7, kind: input, shape index: {}]   ;;  %s11526_s8 = inlined_call_operand.vmem [shape: f32[1,10], index: 8, kind: input, shape index: {}]   ;;  %s11527_s9 = inlined_call_operand.hbm [shape: f32[2,1,10], index: 9, kind: output, shape index: {}]  }
   0x1   :  { %11604 = sst [smem:[#allocation53_spill]] %s11518_s0 }
   0x2   :  { %11605 = sst [smem:[#allocation54_spill]] %s11519_s1 }
   0x3   :  { %11606 = sst [smem:[#allocation55_spill]] %s11520_s2 }
   0x4   :  { %11607 = sst [smem:[#allocation56_spill]] %s11521_s3 }
   0x5   :  { %11608 = sst [smem:[#allocation57_spill]] %s11527_s9 }
   0x6   :  { %14 = vsyncpa [#allocation5], 0 }
   0x7   :  { %16 = vsyncpa [#allocation5 + $0x1], 0  ;;  %s7724_s30 = smov 0   ;;  %s7726_s10 = smov 0  }
   0x8   :  { %s7728_s11 = smov 0   ;;  %s7730_s12 = smov 0  }
   0x9 LB: > { %11609 = sst [smem:[#allocation7_spill]] %s7615_s30  ;;  %s7745_s13 = sadd.s32 4294967295, %s7627_s12   ;;  %s7627_s12 = sphi %s7730_s12, %s11790_s12   ;;  %s7623_s11 = sphi %s7728_s11, %s11792_s11   ;;  %s7619_s10 = sphi %s7726_s10, %s11794_s10   ;;  %s7615_s30 = sphi %s7724_s30, %s11793_s30  }
   0xa   : > { %11610 = sst [smem:[#allocation8_spill]] %s7623_s11  ;;  %s6158_s14 = sadd.s32 4294967294, %s7627_s12  }
   0xb   : > { %11611 = sst [smem:[#allocation9_spill]] %s7627_s12  ;;  %s7749_s15 = sadd.s32 1, %s7627_s12  }
   0xc   : > { %11612 = sst [smem:[#allocation10_spill]] %s7749_s15  ;;  %s223_s16 = sadd.s32 1, %s7623_s11 }
   0xd   : > { %s220_s17 = ssub.s32 %s7627_s12, %s7749_s15  ;;  %p233_p0 = scmp.ne.s32.totalorder %s7623_s11, %s7619_s10 }
   0xe   : > { %p221_p1 = scmp.eq.s32.totalorder %s220_s17, 0  ;;  %p234_p2 = scmp.eq.s32.totalorder %s7745_s13, 1 }
   0xf   : > { %p239_p3 = scmp.ne.s32.totalorder %s7619_s10, %s7615_s30  ;;  %p240_p4 = scmp.eq.s32.totalorder %s6158_s14, 1 }
  0x10   : > { %s7760_s18 = scalar_select %p221_p1, %s7623_s11, %s223_s16  }
  0x11   : > { %p7762_p5 = por %p234_p2, %p233_p0  ;;  %p7766_p6 = por %p240_p4, %p239_p3 }
  0x12   : > { %11613 = sst [smem:[#allocation11_spill]] %s7760_s18  ;;  %p6161_p7 = scmp.ge.s32.totalorder %s7627_s12, 1 }
  0x13   : > { %s11614_s19 = scalar_select %p7762_p5, 1, 0 }
  0x14   : > { %s11616_s20 = scalar_select %p7766_p6, 1, 0 }
  0x15   : > { %11615 = sst [smem:[#allocation12_spill]] %s11614_s19  ;;  %p289_p8 = scmp.lt.s32.totalorder %s7627_s12, 3 }
  0x16   : > { %11617 = sst [smem:[#allocation13_spill]] %s11616_s20 }
  0x17   : > { %p290_p9 = pnand %p6161_p7, %p289_p8 }
  0x19   : > { %293 = sbr.rel (%p290_p9) target bundleno = 3002 (0xbba), region = 56 }
  0x1e   : > { %p323_p10 = scmp.lt.s32.totalorder %s7745_s13, 1  ;;  %v332_v0 = vlaneseq  ;;  %s11618_s0 = sld [smem:[#allocation53_spill]]  ;;  %v11583_v4 = vmov 0   ;;  %vm11585_vm1 = vcmask 1046528   ;;  %vm637_vm2 = vcmask 146432  }
  0x1f   : > { %s7629_s26 = smov 18   ;;  %s7630_s27 = smov 19   ;;  %939 = vmatprep.mubr.bf16.mxu0 %v11583_v4  ;;  %982 = vmatprep.mubr.bf16.mxu1 %v11583_v4  ;;  %vm619_vm3 = vcmask 154624   ;;  %vm655_vm4 = vcmask 138240   ;;  %vm11586_vm5 = vcmask 130048   ;;  %vm695_vm6 = vcmask 916480  }
  0x20   : > { %s324_s21 = scalar_select %p323_p10, %s7745_s13, 1  ;;  %vm7781_vm0 = vcmp.lt.s32.totalorder %v332_v0, 256  ;;  %6937 = vset.pattern.permute.xlu0 %v11583_v4  ;;  %6938 = vset.pattern.permute.xlu1 %v11583_v4  ;;  %vm693_vm7 = vcmask 1045504   ;;  %vm716_vm8 = vcmask 908288   ;;  %vm737_vm9 = vcmask 900096  }
  0x21   : > { %s7631_s28 = smov 17   ;;  %s7632_s29 = smov 16   ;;  %vm758_vm10 = vcmask 891904   ;;  %vm11597_vm11 = vcmask 883712   ;;  %vm349_vm12 = vcmask 1039360   ;;  %vm873_vm13 = vcmask 1043456  }
  0x22   : > { %s6853_s22 = smul.u32 12, %s324_s21  ;;  %s7633_s14 = smov 112   ;;  %vm11600_vm14 = vcmask 1031168   ;;  %vm874_vm15 = vcmask 1044480  }
  0x23   : > { %s7634_s16 = smov 111   ;;  %s7635_s17 = smov 110  }
  0x24   : > { %s326_s25 = scalar_lea.vmem %s11618_s0, %s6853_s22  ;;  %s7636_s21 = smov 109  }
  0x25   : > { %v7777_v1 = vld [vmem:[%s326_s25] sm:$0xff]  ;;  %v7779_v2 = vld [vmem:[%s326_s25 + $0x8] sm:$0xf]  ;;  %s11536_s22 = smov 108   ;;  %s11566_s23 = smov 127  }
  0x26   : > { %630 = vrot.lane.b32.xlu1 %v7777_v1, %s7629_s26  ;;  %330 = vst [vmem:[#allocation2] ss:$8 sm:$0xf] %v7777_v1  ;;  %331 = vst [vmem:[#allocation2] ss:$8 sm:$0xf0] %v7777_v1  ;;  %612 = vrot.lane.b32.xlu0 %v7777_v1, %s7630_s27 }
  0x27   : > { %337 = vst.msk [vmem:[#allocation2 + $0x40] ss:$8 sm:$0x3] %vm7781_vm0, %v7779_v2  ;;  %s11530_s24 = smov 126   ;;  %s11532_s25 = smov 125  }
  0x28   : > { %s11621_s2 = sld [smem:[#allocation55_spill]]  ;;  %s11636_s0 = smov 86  }
  0x29   : > { %s11622_s1 = sld [smem:[#allocation54_spill]]  ;;  %s11640_s18 = smov 107  }
  0x2a   : > { %632 = vrot.lane.b32.xlu1 %v7779_v2, %s7629_s26  ;;  %614 = vrot.lane.b32.xlu0 %v7779_v2, %s7630_s27  ;;  %s11534_s26 = smov 124   ;;  %s7642_s27 = smov 92  }
  0x2b   : > { %s11623_s3 = sld [smem:[#allocation56_spill]]  ;;  %s11641_s11 = smov 66  }
  0x2c   : > { %s11642_s15 = smov 67   ;;  %s11643_s20 = smov 104  }
  0x2d   : > { %s11644_s30 = smov 44   ;;  %s11645_s12 = smov 127  }
  0x2e   : > { %650 = vrot.lane.b32.xlu1 %v7779_v2, %s7631_s28  ;;  %648 = vrot.lane.b32.xlu0 %v7777_v1, %s7631_s28  ;;  %s7643_s28 = smov 91   ;;  %v852_v5 = vld [vmem:[%s11621_s2] sm:$0xff]  ;;  %v853_v6 = vld [vmem:[%s11621_s2 + $0x8] sm:$0xff]  ;;  %s11638_s2 = smov 106  }
  0x2f   : > { %s7672_s9 = smov 105   ;;  %s11646_s19 = smov 45  }
  0x32   : > { %668 = vrot.lane.b32.xlu1 %v7779_v2, %s7632_s29  ;;  %666 = vrot.lane.b32.xlu0 %v7777_v1, %s7632_s29  ;;  %s7644_s29 = smov 90  }
  0x36   : > { %686 = vrot.lane.b32.xlu1 %v7779_v2, %s7633_s14  ;;  %684 = vrot.lane.b32.xlu0 %v7777_v1, %s7633_s14  ;;  %s7645_s14 = smov 89  }
  0x3a   : > { %708 = vrot.lane.b32.xlu1 %v7779_v2, %s7634_s16  ;;  %706 = vrot.lane.b32.xlu0 %v7777_v1, %s7634_s16  ;;  %s11528_s16 = smov 88  }
  0x3e   : > { %729 = vrot.lane.b32.xlu1 %v7779_v2, %s7635_s17  ;;  %727 = vrot.lane.b32.xlu0 %v7777_v1, %s7635_s17  ;;  %s7647_s17 = smov 56  }
  0x42   : > { %750 = vrot.lane.b32.xlu1 %v7779_v2, %s7636_s21  ;;  %748 = vrot.lane.b32.xlu0 %v7777_v1, %s7636_s21  ;;  %s7648_s21 = smov 55  }
  0x46   : > { %771 = vrot.lane.b32.xlu1 %v7779_v2, %s11536_s22  ;;  %769 = vrot.lane.b32.xlu0 %v7777_v1, %s11536_s22  ;;  %s11570_s22 = smov 107  }
  0x4a   : > { %343 = vrot.lane.b32.xlu1 %v7779_v2, %s11566_s23  ;;  %341 = vrot.lane.b32.xlu0 %v7777_v1, %s11566_s23 }
  0x4e   : > { %362 = vrot.lane.b32.xlu1 %v7779_v2, %s11530_s24  ;;  %360 = vrot.lane.b32.xlu0 %v7777_v1, %s11530_s24  ;;  %s11550_s24 = smov 84  }
  0x52   : > { %380 = vrot.lane.b32.xlu1 %v7779_v2, %s11532_s25  ;;  %378 = vrot.lane.b32.xlu0 %v7777_v1, %s11532_s25  ;;  %s11572_s25 = smov 106  }
  0x56   : > { %398 = vrot.lane.b32.xlu1 %v7779_v2, %s11534_s26  ;;  %396 = vrot.lane.b32.xlu0 %v7777_v1, %s11534_s26  ;;  %s11624_s26 = smov 108  }
  0x5a   : > { %416 = vrot.lane.b32.xlu1 %v7779_v2, %s7642_s27  ;;  %414 = vrot.lane.b32.xlu0 %v7777_v1, %s7642_s27 }
  0x5e   : > { %434 = vrot.lane.b32.xlu1 %v7779_v2, %s7643_s28  ;;  %432 = vrot.lane.b32.xlu0 %v7777_v1, %s7643_s28  ;;  %s7649_s28 = smov 54  }
  0x62   : > { %452 = vrot.lane.b32.xlu1 %v7779_v2, %s7644_s29  ;;  %450 = vrot.lane.b32.xlu0 %v7777_v1, %s7644_s29  ;;  %s7650_s29 = smov 53  }
  0x66   : > { %470 = vrot.lane.b32.xlu1 %v7779_v2, %s7645_s14  ;;  %468 = vrot.lane.b32.xlu0 %v7777_v1, %s7645_s14  ;;  %s7651_s14 = smov 52  }
  0x6a   : > { %488 = vrot.lane.b32.xlu1 %v7779_v2, %s11528_s16  ;;  %486 = vrot.lane.b32.xlu0 %v7777_v1, %s11528_s16  ;;  %s11540_s16 = smov 68  }
  0x6e   : > { %506 = vrot.lane.b32.xlu1 %v7779_v2, %s7647_s17  ;;  %504 = vrot.lane.b32.xlu0 %v7777_v1, %s7647_s17  ;;  %s7652_s17 = smov 20  }
  0x72   : > { %524 = vrot.lane.b32.xlu1 %v7779_v2, %s7648_s21  ;;  %522 = vrot.lane.b32.xlu0 %v7777_v1, %s7648_s21  ;;  %s11542_s21 = smov 47  }
  0x76   : > { %542 = vrot.lane.b32.xlu1 %v7779_v2, %s7649_s28  ;;  %540 = vrot.lane.b32.xlu0 %v7777_v1, %s7649_s28  ;;  %s11625_s28 = smov 124  }
  0x7a   : > { %560 = vrot.lane.b32.xlu1 %v7779_v2, %s7650_s29  ;;  %558 = vrot.lane.b32.xlu0 %v7777_v1, %s7650_s29  ;;  %s11626_s29 = smov 125  }
  0x7e   : > { %578 = vrot.lane.b32.xlu1 %v7779_v2, %s7651_s14  ;;  %576 = vrot.lane.b32.xlu0 %v7777_v1, %s7651_s14  ;;  %s11627_s14 = smov 126  }
  0x82   : > { %596 = vrot.lane.b32.xlu1 %v7779_v2, %s7652_s17  ;;  %594 = vrot.lane.b32.xlu0 %v7777_v1, %s7652_s17  ;;  %s11564_s17 = smov 45  }
  0x86   : > { %856 = vperm.xlu0 %6937, %v852_v5   ;;  %861 = vperm.xlu1 %6938, %v853_v6  }
  0x98   : > { %v631_v7 = vpop.permute.xlu1 %630  ;;  %v613_v8 = vpop.permute.xlu0 %612 }
  0x99   : > { %v634_v11 = vrot.slane %v631_v7, 1  ;;  %v616_v12 = vrot.slane %v613_v8, 1 }
  0x9c   : > { %v633_v9 = vpop.permute.xlu1 %632  ;;  %v615_v10 = vpop.permute.xlu0 %614 }
  0x9d   : > { %v635_v13 = vrot.slane %v633_v9, 1  ;;  %v617_v14 = vrot.slane %v615_v10, 1 }
  0x9f   : > { %v636_v15 = vsel %vm11585_vm1, %v634_v11, %v635_v13  ;;  %v639_v16 = vsel %vm637_vm2, %v633_v9, %v635_v13  ;;  %v618_v17 = vsel %vm11585_vm1, %v616_v12, %v617_v14  ;;  %v621_v18 = vsel %vm619_vm3, %v615_v10, %v617_v14 }
  0xa0   : > { %v638_v19 = vsel %vm637_vm2, %v631_v7, %v636_v15  ;;  %646 = vst.msk [vmem:[#allocation2 + $0xe1] ss:$8 sm:$0x3] %vm7781_vm0, %v639_v16  ;;  %v620_v20 = vsel %vm619_vm3, %v613_v8, %v618_v17  ;;  %628 = vst.msk [vmem:[#allocation2 + $0xe0] ss:$8 sm:$0x3] %vm7781_vm0, %v621_v18  ;;  %v651_v21 = vpop.permute.xlu1 %650  ;;  %v649_v22 = vpop.permute.xlu0 %648 }
  0xa1   : > { %643 = vst [vmem:[#allocation2 + $0xa1] ss:$8 sm:$0xf] %v638_v19  ;;  %644 = vst [vmem:[#allocation2 + $0xa1] ss:$8 sm:$0xf0] %v638_v19 }
  0xa2   : > { %625 = vst [vmem:[#allocation2 + $0xa0] ss:$8 sm:$0xf] %v620_v20  ;;  %626 = vst [vmem:[#allocation2 + $0xa0] ss:$8 sm:$0xf0] %v620_v20 }
  0xa3   : > { %v653_v23 = vrot.slane %v651_v21, 1  ;;  %v652_v24 = vrot.slane %v649_v22, 1  ;;  %vm385_vm2 = vcmask 1022976   ;;  %vm403_vm3 = vcmask 1014784  }
  0xa4   : > { %v669_v28 = vpop.permute.xlu1 %668  ;;  %v667_v29 = vpop.permute.xlu0 %666 }
  0xa5   : > { %v657_v25 = vsel %vm655_vm4, %v651_v21, %v653_v23  ;;  %v654_v26 = vsel %vm11585_vm1, %v652_v24, %v653_v23  ;;  %v671_v30 = vrot.slane %v669_v28, 1  ;;  %v670_v31 = vrot.slane %v667_v29, 1 }
  0xa6   : > { %664 = vst.msk [vmem:[#allocation2 + $0xe2] ss:$8 sm:$0x3] %vm7781_vm0, %v657_v25  ;;  %v656_v27 = vsel %vm655_vm4, %v649_v22, %v654_v26  ;;  %vm421_vm4 = vcmask 752640  }
  0xa7   : > { %661 = vst [vmem:[#allocation2 + $0xa2] ss:$8 sm:$0xf] %v656_v27  ;;  %662 = vst [vmem:[#allocation2 + $0xa2] ss:$8 sm:$0xf0] %v656_v27  ;;  %v675_v32 = vsel %vm11586_vm5, %v669_v28, %v671_v30  ;;  %v672_v33 = vsel %vm11585_vm1, %v670_v31, %v671_v30 }
  0xa8   : > { %682 = vst.msk [vmem:[#allocation2 + $0xe3] ss:$8 sm:$0x3] %vm7781_vm0, %v675_v32  ;;  %v674_v34 = vsel %vm11586_vm5, %v667_v29, %v672_v33  ;;  %v687_v35 = vpop.permute.xlu1 %686  ;;  %v685_v36 = vpop.permute.xlu0 %684  ;;  %v7654_v32 = vmov 65535   ;;  %vm11588_vm5 = vcmask 695296  }
  0xa9   : > { %679 = vst [vmem:[#allocation2 + $0xa3] ss:$8 sm:$0xf] %v674_v34  ;;  %680 = vst [vmem:[#allocation2 + $0xa3] ss:$8 sm:$0xf0] %v674_v34 }
  0xaa   : > { %v689_v37 = vrot.slane %v687_v35, 1  ;;  %v691_v38 = vrot.slane %v687_v35, 2  ;;  %v688_v39 = vrot.slane %v685_v36, 1  ;;  %v690_v40 = vrot.slane %v685_v36, 2 }
  0xab   : > { %v875_v33 = vsel %vm873_vm13, 4294967295, %v7654_v32  ;;  %vm529_vm13 = vcmask 449536  }
  0xac   : > { %v697_v41 = vsel %vm695_vm6, %v689_v37, %v691_v38  ;;  %v692_v42 = vsel %vm11585_vm1, %v688_v39, %v689_v37  ;;  %v694_v43 = vsel %vm693_vm7, %v690_v40, %v691_v38  ;;  %v709_v45 = vpop.permute.xlu1 %708  ;;  %v707_v46 = vpop.permute.xlu0 %706  ;;  %v7905_v39 = vsel %vm874_vm15, %v875_v33, 0 }
  0xad   : > { %704 = vst.msk [vmem:[#allocation2 + $0xe4] ss:$8 sm:$0x3] %vm7781_vm0, %v697_v41  ;;  %v696_v44 = vsel %vm695_vm6, %v692_v42, %v694_v43  ;;  %v711_v47 = vrot.slane %v709_v45, 1  ;;  %v713_v48 = vrot.slane %v709_v45, 2  ;;  %v710_v49 = vrot.slane %v707_v46, 1 }
  0xae   : > { %701 = vst [vmem:[#allocation2 + $0xa4] ss:$8 sm:$0xf] %v696_v44  ;;  %702 = vst [vmem:[#allocation2 + $0xa4] ss:$8 sm:$0xf0] %v696_v44 }
  0xaf   : > { %v712_v50 = vrot.slane %v707_v46, 2  ;;  %v718_v51 = vsel %vm716_vm8, %v711_v47, %v713_v48  ;;  %v714_v52 = vsel %vm11585_vm1, %v710_v49, %v711_v47  ;;  %vm439_vm6 = vcmask 744448  }
  0xb0   : > { %725 = vst.msk [vmem:[#allocation2 + $0xe5] ss:$8 sm:$0x3] %vm7781_vm0, %v718_v51  ;;  %v730_v55 = vpop.permute.xlu1 %729  ;;  %v728_v56 = vpop.permute.xlu0 %727  ;;  %vm547_vm15 = vcmask 441344  }
  0xb1   : > { %v715_v53 = vsel %vm693_vm7, %v712_v50, %v713_v48  ;;  %v732_v57 = vrot.slane %v730_v55, 1  ;;  %v734_v58 = vrot.slane %v730_v55, 2  ;;  %v731_v59 = vrot.slane %v728_v56, 1 }
  0xb2   : > { %v717_v54 = vsel %vm716_vm8, %v714_v52, %v715_v53  ;;  %v733_v60 = vrot.slane %v728_v56, 2  ;;  %vm475_vm8 = vcmask 728064  }
  0xb3   : > { %722 = vst [vmem:[#allocation2 + $0xa5] ss:$8 sm:$0xf] %v717_v54  ;;  %723 = vst [vmem:[#allocation2 + $0xa5] ss:$8 sm:$0xf0] %v717_v54  ;;  %v739_v61 = vsel %vm737_vm9, %v732_v57, %v734_v58  ;;  %v735_v62 = vsel %vm11585_vm1, %v731_v59, %v732_v57 }
  0xb4   : > { %v736_v63 = vsel %vm693_vm7, %v733_v60, %v734_v58  ;;  %746 = vst.msk [vmem:[#allocation2 + $0xe6] ss:$8 sm:$0x3] %vm7781_vm0, %v739_v61  ;;  %v751_v1 = vpop.permute.xlu1 %750  ;;  %v749_v2 = vpop.permute.xlu0 %748 }
  0xb5   : > { %v738_v0 = vsel %vm737_vm9, %v735_v62, %v736_v63  ;;  %v753_v5 = vrot.slane %v751_v1, 1  ;;  %v755_v6 = vrot.slane %v751_v1, 2  ;;  %v752_v7 = vrot.slane %v749_v2, 1 }
  0xb6   : > { %743 = vst [vmem:[#allocation2 + $0xa6] ss:$8 sm:$0xf] %v738_v0  ;;  %744 = vst [vmem:[#allocation2 + $0xa6] ss:$8 sm:$0xf0] %v738_v0 }
  0xb7   : > { %v754_v8 = vrot.slane %v749_v2, 2  ;;  %v760_v9 = vsel %vm758_vm10, %v753_v5, %v755_v6  ;;  %v756_v10 = vsel %vm11585_vm1, %v752_v7, %v753_v5  ;;  %vm11593_vm9 = vcmask 719872  }
  0xb8   : > { %767 = vst.msk [vmem:[#allocation2 + $0xe7] ss:$8 sm:$0x3] %vm7781_vm0, %v760_v9  ;;  %v772_v13 = vpop.permute.xlu1 %771  ;;  %v770_v14 = vpop.permute.xlu0 %769 }
  0xb9   : > { %v757_v11 = vsel %vm693_vm7, %v754_v8, %v755_v6  ;;  %v774_v15 = vrot.slane %v772_v13, 1  ;;  %v776_v16 = vrot.slane %v772_v13, 2  ;;  %v773_v17 = vrot.slane %v770_v14, 1 }
  0xba   : > { %v759_v12 = vsel %vm758_vm10, %v756_v10, %v757_v11  ;;  %v775_v18 = vrot.slane %v770_v14, 2  ;;  %vm511_vm10 = vcmask 457728  }
  0xbb   : > { %764 = vst [vmem:[#allocation2 + $0xa7] ss:$8 sm:$0xf] %v759_v12  ;;  %765 = vst [vmem:[#allocation2 + $0xa7] ss:$8 sm:$0xf0] %v759_v12  ;;  %v781_v19 = vsel %vm11597_vm11, %v774_v15, %v776_v16  ;;  %v777_v20 = vsel %vm11585_vm1, %v773_v17, %v774_v15 }
  0xbc   : > { %v778_v21 = vsel %vm693_vm7, %v775_v18, %v776_v16  ;;  %788 = vst.msk [vmem:[#allocation2 + $0x130] ss:$8 sm:$0x3] %vm7781_vm0, %v781_v19  ;;  %v344_v23 = vpop.permute.xlu1 %343  ;;  %v342_v24 = vpop.permute.xlu0 %341  ;;  %vm457_vm7 = vcmask 736256  }
  0xbd   : > { %v780_v22 = vsel %vm11597_vm11, %v777_v20, %v778_v21  ;;  %v346_v25 = vrot.slane %v344_v23, 1  ;;  %v345_v26 = vrot.slane %v342_v24, 1 }
  0xbe   : > { %785 = vst [vmem:[#allocation2 + $0xf0] ss:$8 sm:$0xf] %v780_v22  ;;  %786 = vst [vmem:[#allocation2 + $0xf0] ss:$8 sm:$0xf0] %v780_v22 }
  0xbf   : > { %v351_v27 = vsel %vm349_vm12, %v344_v23, %v346_v25  ;;  %v348_v28 = vsel %vm11585_vm1, %v345_v26, %v346_v25 }
  0xc0   : > { %358 = vst.msk [vmem:[#allocation2 + $0x41] ss:$8 sm:$0x3] %vm7781_vm0, %v351_v27  ;;  %v350_v29 = vsel %vm349_vm12, %v342_v24, %v348_v28  ;;  %v363_v30 = vpop.permute.xlu1 %362  ;;  %v361_v31 = vpop.permute.xlu0 %360 }
  0xc1   : > { %355 = vst [vmem:[#allocation2 + $0x1] ss:$8 sm:$0xf] %v350_v29  ;;  %356 = vst [vmem:[#allocation2 + $0x1] ss:$8 sm:$0xf0] %v350_v29 }
  0xc2   : > { %v365_v34 = vrot.slane %v363_v30, 1  ;;  %v364_v35 = vrot.slane %v361_v31, 1  ;;  %v813_v38 = vld [vmem:[#allocation2 + $0xa8] sm:$0xff]  ;;  %v815_v40 = vld [vmem:[#allocation2 + $0xb8] sm:$0xff]  ;;  %v812_v51 = vld [vmem:[#allocation2 + $0xa0] sm:$0xff] }
  0xc3   : > { %v814_v52 = vld [vmem:[#allocation2 + $0xb0] sm:$0xff] }
  0xc4   : > { %v369_v36 = vsel %vm11600_vm14, %v363_v30, %v365_v34  ;;  %v366_v37 = vsel %vm11585_vm1, %v364_v35, %v365_v34  ;;  %v381_v42 = vpop.permute.xlu1 %380  ;;  %v379_v43 = vpop.permute.xlu0 %378 }
  0xc5   : > { %376 = vst.msk [vmem:[#allocation2 + $0x42] ss:$8 sm:$0x3] %vm7781_vm0, %v369_v36  ;;  %v368_v41 = vsel %vm11600_vm14, %v361_v31, %v366_v37  ;;  %v823_v44 = vld [vmem:[#allocation2 + $0xf8] sm:$0x1]  ;;  %v383_v47 = vrot.slane %v381_v42, 1 }
  0xc6   : > { %v825_v45 = vld [vmem:[#allocation2 + $0x108] sm:$0x1]  ;;  %v822_v46 = vld [vmem:[#allocation2 + $0xf0] sm:$0x1]  ;;  %v382_v48 = vrot.slane %v379_v43, 1  ;;  %v843_v49 = vpack.c.bf16 %v823_v44, %v813_v38 }
  0xc7   : > { %373 = vst [vmem:[#allocation2 + $0x2] ss:$8 sm:$0xf] %v368_v41  ;;  %374 = vst [vmem:[#allocation2 + $0x2] ss:$8 sm:$0xf0] %v368_v41  ;;  %v845_v50 = vpack.c.bf16 %v825_v45, %v815_v40  ;;  %v842_v54 = vpack.c.bf16 %v822_v46, %v812_v51  ;;  %v387_v56 = vsel %vm385_vm2, %v381_v42, %v383_v47 }
  0xc8   : > { %v824_v53 = vld [vmem:[#allocation2 + $0x100] sm:$0x1]  ;;  %v384_v57 = vsel %vm11585_vm1, %v382_v48, %v383_v47  ;;  %v881_v58 = vand.u32 %v7905_v39, %v843_v49  ;;  %394 = vst.msk [vmem:[#allocation2 + $0x43] ss:$8 sm:$0x3] %vm7781_vm0, %v387_v56  ;;  %v399_v61 = vpop.permute.xlu1 %398  ;;  %v397_v62 = vpop.permute.xlu0 %396 }
  0xc9   : > { %v844_v55 = vpack.c.bf16 %v824_v53, %v814_v52  ;;  %v887_v59 = vand.u32 %v7905_v39, %v845_v50  ;;  %v386_v60 = vsel %vm385_vm2, %v379_v43, %v384_v57  ;;  %v878_v63 = vand.u32 %v7905_v39, %v842_v54 }
  0xca   : > { %391 = vst [vmem:[#allocation2 + $0x3] ss:$8 sm:$0xf] %v386_v60  ;;  %392 = vst [vmem:[#allocation2 + $0x3] ss:$8 sm:$0xf0] %v386_v60  ;;  %919 = vmatprep.subr.bf16.mxu0 %v881_v58 }
  0xcb   : > { %v884_v0 = vand.u32 %v7905_v39, %v844_v55  ;;  %v401_v1 = vrot.slane %v399_v61, 1  ;;  %v400_v2 = vrot.slane %v397_v62, 1  ;;  %962 = vmatprep.subr.bf16.mxu1 %v887_v59  ;;  %920 = vmatpush1.bf16.msra.mxu0 %v878_v63 }
  0xcc   : > { %v417_v8 = vpop.permute.xlu1 %416  ;;  %v415_v9 = vpop.permute.xlu0 %414 }
  0xcd   : > { %963 = vmatpush1.bf16.msra.mxu1 %v884_v0  ;;  %v405_v5 = vsel %vm403_vm3, %v399_v61, %v401_v1  ;;  %v402_v6 = vsel %vm11585_vm1, %v400_v2, %v401_v1  ;;  %v419_v10 = vrot.slane %v417_v8, 1  ;;  %v418_v11 = vrot.slane %v415_v9, 1 }
  0xce   : > { %412 = vst.msk [vmem:[#allocation2 + $0x44] ss:$8 sm:$0x3] %vm7781_vm0, %v405_v5  ;;  %v404_v7 = vsel %vm403_vm3, %v397_v62, %v402_v6 }
  0xcf   : > { %409 = vst [vmem:[#allocation2 + $0x4] ss:$8 sm:$0xf] %v404_v7  ;;  %410 = vst [vmem:[#allocation2 + $0x4] ss:$8 sm:$0xf0] %v404_v7  ;;  %v423_v12 = vsel %vm421_vm4, %v417_v8, %v419_v10  ;;  %v420_v13 = vsel %vm11585_vm1, %v418_v11, %v419_v10 }
  0xd0   : > { %430 = vst.msk [vmem:[#allocation2 + $0x45] ss:$8 sm:$0x3] %vm7781_vm0, %v423_v12  ;;  %v422_v14 = vsel %vm421_vm4, %v415_v9, %v420_v13  ;;  %v435_v15 = vpop.permute.xlu1 %434  ;;  %v433_v16 = vpop.permute.xlu0 %432 }
  0xd1   : > { %427 = vst [vmem:[#allocation2 + $0x5] ss:$8 sm:$0xf] %v422_v14  ;;  %428 = vst [vmem:[#allocation2 + $0x5] ss:$8 sm:$0xf0] %v422_v14 }
  0xd2   : > { %v437_v17 = vrot.slane %v435_v15, 1  ;;  %v436_v18 = vrot.slane %v433_v16, 1 }
  0xd4   : > { %v441_v19 = vsel %vm439_vm6, %v435_v15, %v437_v17  ;;  %v438_v20 = vsel %vm11585_vm1, %v436_v18, %v437_v17  ;;  %v453_v22 = vpop.permute.xlu1 %452  ;;  %v451_v23 = vpop.permute.xlu0 %450 }
  0xd5   : > { %448 = vst.msk [vmem:[#allocation2 + $0x46] ss:$8 sm:$0x3] %vm7781_vm0, %v441_v19  ;;  %v440_v21 = vsel %vm439_vm6, %v433_v16, %v438_v20  ;;  %v455_v24 = vrot.slane %v453_v22, 1  ;;  %v454_v25 = vrot.slane %v451_v23, 1  ;;  %vm565_vm6 = vcmask 433152  }
  0xd6   : > { %445 = vst [vmem:[#allocation2 + $0x6] ss:$8 sm:$0xf] %v440_v21  ;;  %446 = vst [vmem:[#allocation2 + $0x6] ss:$8 sm:$0xf0] %v440_v21 }
  0xd7   : > { %v459_v26 = vsel %vm457_vm7, %v453_v22, %v455_v24  ;;  %v456_v27 = vsel %vm11585_vm1, %v454_v25, %v455_v24  ;;  %v827_v24 = vld [vmem:[#allocation2 + $0x118] sm:$0x1]  ;;  %v829_v25 = vld [vmem:[#allocation2 + $0x128] sm:$0x1] }
  0xd8   : > { %466 = vst.msk [vmem:[#allocation2 + $0x47] ss:$8 sm:$0x3] %vm7781_vm0, %v459_v26  ;;  %v458_v28 = vsel %vm457_vm7, %v451_v23, %v456_v27  ;;  %v471_v29 = vpop.permute.xlu1 %470  ;;  %v469_v30 = vpop.permute.xlu0 %468  ;;  %vm583_vm7 = vcmask 424960   ;;  %v817_v26 = vld [vmem:[#allocation2 + $0xc8] sm:$0xff]  ;;  %v819_v27 = vld [vmem:[#allocation2 + $0xd8] sm:$0xff] }
  0xd9   : > { %463 = vst [vmem:[#allocation2 + $0x7] ss:$8 sm:$0xf] %v458_v28  ;;  %464 = vst [vmem:[#allocation2 + $0x7] ss:$8 sm:$0xf0] %v458_v28 }
  0xda   : > { %v473_v31 = vrot.slane %v471_v29, 1  ;;  %v472_v32 = vrot.slane %v469_v30, 1  ;;  %v826_v28 = vld [vmem:[#allocation2 + $0x110] sm:$0x1] }
  0xdc   : > { %v477_v33 = vsel %vm475_vm8, %v471_v29, %v473_v31  ;;  %v474_v34 = vsel %vm11585_vm1, %v472_v32, %v473_v31  ;;  %v489_v36 = vpop.permute.xlu1 %488  ;;  %v487_v37 = vpop.permute.xlu0 %486  ;;  %v828_v29 = vld [vmem:[#allocation2 + $0x120] sm:$0x1] }
  0xdd   : > { %484 = vst.msk [vmem:[#allocation2 + $0x90] ss:$8 sm:$0x3] %vm7781_vm0, %v477_v33  ;;  %v476_v35 = vsel %vm475_vm8, %v469_v30, %v474_v34  ;;  %v491_v38 = vrot.slane %v489_v36, 1  ;;  %v490_v40 = vrot.slane %v487_v37, 1  ;;  %vm601_vm8 = vcmask 162816  }
  0xde   : > { %481 = vst [vmem:[#allocation2 + $0x50] ss:$8 sm:$0xf] %v476_v35  ;;  %482 = vst [vmem:[#allocation2 + $0x50] ss:$8 sm:$0xf0] %v476_v35  ;;  %v847_v33 = vpack.c.bf16 %v827_v24, %v817_v26  ;;  %v849_v34 = vpack.c.bf16 %v829_v25, %v819_v27 }
  0xdf   : > { %v495_v41 = vsel %vm11593_vm9, %v489_v36, %v491_v38  ;;  %v492_v42 = vsel %vm11585_vm1, %v490_v40, %v491_v38  ;;  %v816_v35 = vld [vmem:[#allocation2 + $0xc0] sm:$0xff] }
  0xe0   : > { %502 = vst.msk [vmem:[#allocation2 + $0x91] ss:$8 sm:$0x3] %vm7781_vm0, %v495_v41  ;;  %v494_v43 = vsel %vm11593_vm9, %v487_v37, %v492_v42  ;;  %v507_v44 = vpop.permute.xlu1 %506  ;;  %v505_v45 = vpop.permute.xlu0 %504  ;;  %v793_v30 = vld [vmem:[#allocation2 + $0x8] sm:$0xff]  ;;  %v795_v31 = vld [vmem:[#allocation2 + $0x18] sm:$0xff]  ;;  %v792_v32 = vld [vmem:[#allocation2] sm:$0xff] }
  0xe1   : > { %499 = vst [vmem:[#allocation2 + $0x51] ss:$8 sm:$0xf] %v494_v43  ;;  %500 = vst [vmem:[#allocation2 + $0x51] ss:$8 sm:$0xf0] %v494_v43 }
  0xe2   : > { %v509_v46 = vrot.slane %v507_v44, 1  ;;  %v508_v47 = vrot.slane %v505_v45, 1  ;;  %v794_v42 = vld [vmem:[#allocation2 + $0x10] sm:$0xff] }
  0xe4   : > { %v513_v48 = vsel %vm511_vm10, %v507_v44, %v509_v46  ;;  %v510_v49 = vsel %vm11585_vm1, %v508_v47, %v509_v46  ;;  %v525_v51 = vpop.permute.xlu1 %524  ;;  %v523_v52 = vpop.permute.xlu0 %522  ;;  %v818_v44 = vld [vmem:[#allocation2 + $0xd0] sm:$0xff]  ;;  %v846_v46 = vpack.c.bf16 %v826_v28, %v816_v35 }
  0xe5   : > { %520 = vst.msk [vmem:[#allocation2 + $0x92] ss:$8 sm:$0x3] %vm7781_vm0, %v513_v48  ;;  %v512_v50 = vsel %vm511_vm10, %v505_v45, %v510_v49  ;;  %v527_v53 = vrot.slane %v525_v51, 1  ;;  %v526_v54 = vrot.slane %v523_v52, 1  ;;  %v848_v47 = vpack.c.bf16 %v828_v29, %v818_v44 }
  0xe6   : > { %517 = vst [vmem:[#allocation2 + $0x52] ss:$8 sm:$0xf] %v512_v50  ;;  %518 = vst [vmem:[#allocation2 + $0x52] ss:$8 sm:$0xf0] %v512_v50  ;;  %v893_v48 = vand.u32 %v7905_v39, %v847_v33  ;;  %v899_v49 = vand.u32 %v7905_v39, %v849_v34 }
  0xe7   : > { %v531_v55 = vsel %vm529_vm13, %v525_v51, %v527_v53  ;;  %v528_v56 = vsel %vm11585_vm1, %v526_v54, %v527_v53  ;;  %v7119_v50 = vld [vmem:[%s11622_s1] sm:$0xff]   ;;  %v831_v53 = vld [vmem:[#allocation2 + $0x138] sm:$0x1]  ;;  %v890_v54 = vand.u32 %v7905_v39, %v846_v46  ;;  %s11637_s1 = smov 65   ;;  %vm3735_vm10 = vcmask 867328  }
  0xe8   : > { %538 = vst.msk [vmem:[#allocation2 + $0x93] ss:$8 sm:$0x3] %vm7781_vm0, %v531_v55  ;;  %v530_v57 = vsel %vm529_vm13, %v523_v52, %v528_v56  ;;  %v543_v58 = vpop.permute.xlu1 %542  ;;  %v541_v59 = vpop.permute.xlu0 %540  ;;  %v896_v55 = vand.u32 %v7905_v39, %v848_v47  ;;  %v797_v56 = vld [vmem:[#allocation2 + $0x28] sm:$0xff]  ;;  %vm3706_vm13 = vcmask 875520  }
  0xe9   : > { %535 = vst [vmem:[#allocation2 + $0x53] ss:$8 sm:$0xf] %v530_v57  ;;  %536 = vst [vmem:[#allocation2 + $0x53] ss:$8 sm:$0xf0] %v530_v57 }
  0xea   : > { %v545_v60 = vrot.slane %v543_v58, 1  ;;  %v544_v61 = vrot.slane %v541_v59, 1  ;;  %v799_v57 = vld [vmem:[#allocation2 + $0x38] sm:$0xff] }
  0xec   : > { %v549_v62 = vsel %vm547_vm15, %v543_v58, %v545_v60  ;;  %v546_v63 = vsel %vm11585_vm1, %v544_v61, %v545_v60  ;;  %v561_v1 = vpop.permute.xlu1 %560  ;;  %v559_v2 = vpop.permute.xlu0 %558  ;;  %v821_v58 = vld [vmem:[#allocation2 + $0xe8] sm:$0xff] }
  0xed   : > { %556 = vst.msk [vmem:[#allocation2 + $0x94] ss:$8 sm:$0x3] %vm7781_vm0, %v549_v62  ;;  %v548_v0 = vsel %vm547_vm15, %v541_v59, %v546_v63  ;;  %v563_v5 = vrot.slane %v561_v1, 1  ;;  %v562_v6 = vrot.slane %v559_v2, 1  ;;  %v851_v63 = vpack.c.bf16 %v831_v53, %v821_v58 }
  0xee   : > { %553 = vst [vmem:[#allocation2 + $0x54] ss:$8 sm:$0xf] %v548_v0  ;;  %554 = vst [vmem:[#allocation2 + $0x54] ss:$8 sm:$0xf0] %v548_v0 }
  0xef   : > { %v567_v7 = vsel %vm565_vm6, %v561_v1, %v563_v5  ;;  %v564_v8 = vsel %vm11585_vm1, %v562_v6, %v563_v5  ;;  %v830_v0 = vld [vmem:[#allocation2 + $0x130] sm:$0x1]  ;;  %v796_v1 = vld [vmem:[#allocation2 + $0x20] sm:$0xff]  ;;  %vm4222_vm15 = vcmask 367616  }
  0xf0   : > { %574 = vst.msk [vmem:[#allocation2 + $0x95] ss:$8 sm:$0x3] %vm7781_vm0, %v567_v7  ;;  %v566_v9 = vsel %vm565_vm6, %v559_v2, %v564_v8  ;;  %v579_v10 = vpop.permute.xlu1 %578  ;;  %v577_v11 = vpop.permute.xlu0 %576  ;;  %v798_v2 = vld [vmem:[#allocation2 + $0x30] sm:$0xff]  ;;  %v820_v5 = vld [vmem:[#allocation2 + $0xe0] sm:$0xff]  ;;  %vm4187_vm6 = vcmask 375808  }
  0xf1   : > { %571 = vst [vmem:[#allocation2 + $0x55] ss:$8 sm:$0xf] %v566_v9  ;;  %572 = vst [vmem:[#allocation2 + $0x55] ss:$8 sm:$0xf0] %v566_v9  ;;  %v850_v8 = vpack.c.bf16 %v830_v0, %v820_v5  ;;  %v905_v9 = vand.u32 %v7905_v39, %v851_v63 }
  0xf2   : > { %v581_v12 = vrot.slane %v579_v10, 1  ;;  %v580_v13 = vrot.slane %v577_v11, 1 }
  0xf4   : > { %v585_v14 = vsel %vm583_vm7, %v579_v10, %v581_v12  ;;  %v582_v15 = vsel %vm11585_vm1, %v580_v13, %v581_v12  ;;  %v597_v17 = vpop.permute.xlu1 %596  ;;  %v595_v18 = vpop.permute.xlu0 %594  ;;  %v801_v12 = vld [vmem:[#allocation2 + $0x48] sm:$0xff] }
  0xf5   : > { %592 = vst.msk [vmem:[#allocation2 + $0x96] ss:$8 sm:$0x3] %vm7781_vm0, %v585_v14  ;;  %v584_v16 = vsel %vm583_vm7, %v577_v11, %v582_v15  ;;  %v599_v19 = vrot.slane %v597_v17, 1  ;;  %v598_v20 = vrot.slane %v595_v18, 1  ;;  %v902_v11 = vand.u32 %v7905_v39, %v850_v8  ;;  %v800_v15 = vld [vmem:[#allocation2 + $0x40] sm:$0xff] }
  0xf6   : > { %589 = vst [vmem:[#allocation2 + $0x56] ss:$8 sm:$0xf] %v584_v16  ;;  %590 = vst [vmem:[#allocation2 + $0x56] ss:$8 sm:$0xf0] %v584_v16 }
  0xf7   : > { %v603_v21 = vsel %vm601_vm8, %v597_v17, %v599_v19  ;;  %v600_v22 = vsel %vm11585_vm1, %v598_v20, %v599_v19  ;;  %vm3966_vm7 = vcmask 556032   ;;  %vm11603_vm1 = vcmask 392192  }
  0xf8   : > { %610 = vst.msk [vmem:[#allocation2 + $0x97] ss:$8 sm:$0x3] %vm7781_vm0, %v603_v21  ;;  %v602_v23 = vsel %vm601_vm8, %v595_v18, %v600_v22  ;;  %vm869_vm0 = vcmask 203776   ;;  %vm4152_vm8 = vcmask 384000  }
  0xf9   : > { %607 = vst [vmem:[#allocation2 + $0x57] ss:$8 sm:$0xf] %v602_v23  ;;  %608 = vst [vmem:[#allocation2 + $0x57] ss:$8 sm:$0xf0] %v602_v23 }
  0xff   : > { %v811_v10 = vld [vmem:[#allocation2 + $0x98] sm:$0xff]  ;;  %v810_v14 = vld [vmem:[#allocation2 + $0x90] sm:$0xff] }
 0x100   : > { %v803_v36 = vld [vmem:[#allocation2 + $0x58] sm:$0xff]  ;;  %v805_v37 = vld [vmem:[#allocation2 + $0x68] sm:$0xff]  ;;  %v802_v38 = vld [vmem:[#allocation2 + $0x50] sm:$0xff]  ;;  %v841_v13 = vpack.c.bf16 %v811_v10, %v801_v12  ;;  %v840_v16 = vpack.c.bf16 %v810_v14, %v800_v15 }
 0x101   : > { %v833_v3 = vpack.c.bf16 %v803_v36, %v793_v30  ;;  %v835_v40 = vpack.c.bf16 %v805_v37, %v795_v31  ;;  %v832_v41 = vpack.c.bf16 %v802_v38, %v792_v32  ;;  %v804_v43 = vld [vmem:[#allocation2 + $0x60] sm:$0xff]  ;;  %v807_v51 = vld [vmem:[#allocation2 + $0x78] sm:$0xff]  ;;  %v809_v52 = vld [vmem:[#allocation2 + $0x88] sm:$0xff]  ;;  %v7978_v17 = vpop.permute.xlu0 %856  ;;  %v7983_v20 = vpop.permute.xlu1 %861 }
 0x102   : > { %v834_v45 = vpack.c.bf16 %v804_v43, %v794_v42  ;;  %v837_v59 = vpack.c.bf16 %v807_v51, %v797_v56  ;;  %v839_v60 = vpack.c.bf16 %v809_v52, %v799_v57  ;;  %v806_v61 = vld [vmem:[#allocation2 + $0x70] sm:$0xff]  ;;  %v808_v62 = vld [vmem:[#allocation2 + $0x80] sm:$0xff] }
 0x103   : > { %921 = vmatprep.subr.bf16.mxu0 %v833_v3  ;;  %964 = vmatprep.subr.bf16.mxu1 %v835_v40  ;;  %v836_v6 = vpack.c.bf16 %v806_v61, %v796_v1  ;;  %v838_v7 = vpack.c.bf16 %v808_v62, %v798_v2  ;;  %v7120_v12 = vld [vmem:[%s11623_s3 + $0xe0] ss:$16 sps:$4 sm:$0xff]   ;;  %v7125_v14 = vld [vmem:[%s11623_s3 + $0xc4] ss:$16 sps:$4 sm:$0xff]  }
 0x104   : > { %922 = vmatpush1.bf16.msra.mxu0 %v832_v41  ;;  %965 = vmatpush1.bf16.msra.mxu1 %v834_v45  ;;  %v7126_v15 = vld [vmem:[%s11623_s3 + $0x2e0] ss:$16 sps:$4 sm:$0xff]  }
 0x105   : > { %1005 = vmatprep.subr.bf16.mxu0 %v893_v48  ;;  %1048 = vmatprep.subr.bf16.mxu1 %v899_v49 }
 0x107   : > { %6163 = vmatmul.mubr.msk.bf16.vlgmr.msra.gmra.mxu0 %vm869_vm0, %v7119_v50  ;;  %6164 = vmatmul.mubr.msk.bf16.vlgmr.msra.gmra.mxu1 %vm869_vm0, %v7119_v50 }
 0x108   : > { %1006 = vmatpush1.bf16.msra.mxu0 %v890_v54  ;;  %1049 = vmatpush1.bf16.msra.mxu1 %v896_v55 }
 0x109   : > { %1007 = vmatprep.subr.bf16.mxu0 %v837_v59  ;;  %1050 = vmatprep.subr.bf16.mxu1 %v839_v60 }
 0x10a   : > { %1025 = vmatprep.mubr.bf16.mxu0 %v11583_v4  ;;  %1068 = vmatprep.mubr.bf16.mxu1 %v11583_v4 }
 0x10c   : > { %1008 = vmatpush1.bf16.msra.mxu0 %v836_v6  ;;  %1051 = vmatpush1.bf16.msra.mxu1 %v838_v7 }
 0x10d   : > { %1091 = vmatprep.subr.bf16.mxu0 %v905_v9 }
 0x10f   : > { %6165 = vmatmul.mubr.msk.bf16.vlgmr.msra.gmra.mxu0 %vm869_vm0, %v7119_v50  ;;  %6166 = vmatmul.mubr.msk.bf16.vlgmr.msra.gmra.mxu1 %vm869_vm0, %v7119_v50 }
 0x110   : > { %1092 = vmatpush1.bf16.msra.mxu0 %v902_v11  ;;  %1111 = vmatprep.mubr.bf16.mxu0 %v11583_v4 }
 0x111   : > { %1093 = vmatprep.subr.bf16.mxu0 %v841_v13  ;;  %v7122_v13 = vld [vmem:[%s11623_s3 + $0xe4] ss:$16 sps:$4 sm:$0xff]  }
 0x112   : > { %3111 = vmatprep.subr.bf16.mxu1 %v7122_v13  ;;  %v7159_v13 = vld [vmem:[%s11623_s3] ss:$16 sps:$4 sm:$0xff]  }
 0x113   : > { %3112 = vmatpush1.bf16.msra.mxu1 %v7120_v12  ;;  %v7170_v12 = vld [vmem:[%s11623_s3 + $0x204] ss:$16 sps:$4 sm:$0xff]  }
 0x114   : > { %1094 = vmatpush1.bf16.msra.mxu0 %v840_v16  ;;  %v7128_v16 = vld [vmem:[%s11623_s3 + $0x2e4] ss:$16 sps:$4 sm:$0xff]   ;;  %3113 = vmatprep.subr.bf16.mxu1 %v7125_v14 }
 0x115   : > { %3154 = vmatprep.subr.bf16.mxu0 %v7128_v16  ;;  %v7167_v14 = vld [vmem:[%s11623_s3 + $0x1e4] ss:$16 sps:$4 sm:$0xff]  }
 0x116   : > { %v7176_v16 = vld [vmem:[%s11623_s3 + $0x3e4] ss:$16 sps:$4 sm:$0xff]  }
 0x117   : > { %6167 = vmatmul.mubr.msk.bf16.vlgmr.msra.gmra.mxu0 %vm869_vm0, %v7119_v50  ;;  %vm11587_vm0 = vcmask 687104  }
 0x118   : > { %3155 = vmatpush1.bf16.msra.mxu0 %v7126_v15  ;;  %v7168_v15 = vld [vmem:[%s11623_s3 + $0x200] ss:$16 sps:$4 sm:$0xff]  }
 0x1c7   : > { %v941_v18 = vpop.f32.mrf.mxu0  ;;  %v984_v39 = vpop.f32.mrf.mxu1 }
 0x1c8   : > { %v7981_v19 = vadd.f32 %v984_v39, %v7978_v17  ;;  %v7986_v21 = vadd.f32 %v941_v18, %v7978_v17  ;;  %v7123_v18 = vld [vmem:[%s11623_s3 + $0xc0] ss:$16 sps:$4 sm:$0xff]   ;;  %v7134_v39 = vld [vmem:[%s11623_s3 + $0x2c4] ss:$16 sps:$4 sm:$0xff]  }
 0x1c9   : > { %v943_v22 = vpop.f32.mrf.mxu0  ;;  %v986_v23 = vpop.f32.mrf.mxu1  ;;  %3156 = vmatprep.subr.bf16.mxu0 %v7134_v39  ;;  %3114 = vmatpush1.bf16.msra.mxu1 %v7123_v18  ;;  %v7165_v18 = vld [vmem:[%s11623_s3 + $0x1e0] ss:$16 sps:$4 sm:$0xff]   ;;  %v7173_v39 = vld [vmem:[%s11623_s3 + $0x1c4] ss:$16 sps:$4 sm:$0xff]  }
 0x1ca   : > { %v1124_v24 = vmax.f32 %v7981_v19, 0.0  ;;  %v7990_v25 = vadd.f32 %v943_v22, %v7978_v17  ;;  %v1122_v30 = vmax.f32 %v7986_v21, 0.0  ;;  %v8005_v35 = vadd.f32 %v986_v23, %v7978_v17  ;;  %v7131_v22 = vld [vmem:[%s11623_s3 + $0xa4] ss:$16 sps:$4 sm:$0xff]   ;;  %v7132_v23 = vld [vmem:[%s11623_s3 + $0x2c0] ss:$16 sps:$4 sm:$0xff]  }
 0x1cb   : > { %v945_v26 = vpop.f32.mrf.mxu0  ;;  %v988_v27 = vpop.f32.mrf.mxu1  ;;  %3115 = vmatprep.subr.bf16.mxu1 %v7131_v22  ;;  %3157 = vmatpush1.bf16.msra.mxu0 %v7132_v23  ;;  %v7174_v22 = vld [vmem:[%s11623_s3 + $0x3e0] ss:$16 sps:$4 sm:$0xff]   ;;  %v7182_v23 = vld [vmem:[%s11623_s3 + $0x3c4] ss:$16 sps:$4 sm:$0xff]  }
 0x1cc   : > { %v1123_v28 = vmax.f32 %v7990_v25, 0.0  ;;  %v7994_v29 = vadd.f32 %v945_v26, %v7983_v20  ;;  %v7998_v31 = vadd.f32 %v988_v27, %v7983_v20  ;;  %v1125_v48 = vmax.f32 %v8005_v35, 0.0  ;;  %v7140_v26 = vld [vmem:[%s11623_s3 + $0x2a4] ss:$16 sps:$4 sm:$0xff]   ;;  %v7129_v27 = vld [vmem:[%s11623_s3 + $0xa0] ss:$16 sps:$4 sm:$0xff]  }
 0x1cd   : > { %v947_v32 = vpop.f32.mrf.mxu0  ;;  %v990_v33 = vpop.f32.mrf.mxu1  ;;  %3158 = vmatprep.subr.bf16.mxu0 %v7140_v26  ;;  %3116 = vmatpush1.bf16.msra.mxu1 %v7129_v27  ;;  %v7171_v26 = vld [vmem:[%s11623_s3 + $0x1c0] ss:$16 sps:$4 sm:$0xff]   ;;  %v7179_v27 = vld [vmem:[%s11623_s3 + $0x1a4] ss:$16 sps:$4 sm:$0xff]  }
 0x1ce   : > { %v6939_v34 = vpack.i.bf16 %v1124_v24, %v1123_v28  ;;  %v1132_v36 = vmax.f32 %v7994_v29, 0.0  ;;  %v8009_v37 = vadd.f32 %v947_v32, %v7983_v20  ;;  %v8012_v38 = vadd.f32 %v990_v33, %v7983_v20  ;;  %v7137_v32 = vld [vmem:[%s11623_s3 + $0x84] ss:$16 sps:$4 sm:$0xff]   ;;  %v7138_v33 = vld [vmem:[%s11623_s3 + $0x2a0] ss:$16 sps:$4 sm:$0xff]  }
 0x1cf   : > { %v1027_v3 = vpop.f32.mrf.mxu0  ;;  %v1070_v40 = vpop.f32.mrf.mxu1  ;;  %v1134_v44 = vmax.f32 %v7998_v31, 0.0  ;;  %3117 = vmatprep.subr.bf16.mxu1 %v7137_v32  ;;  %3159 = vmatpush1.bf16.msra.mxu0 %v7138_v33  ;;  %v7180_v32 = vld [vmem:[%s11623_s3 + $0x3c0] ss:$16 sps:$4 sm:$0xff]   ;;  %v7188_v33 = vld [vmem:[%s11623_s3 + $0x3a4] ss:$16 sps:$4 sm:$0xff]  }
 0x1d0   : > { %v6944_v41 = vpack.i.bf16 %v1132_v36, %v1122_v30  ;;  %v1133_v42 = vmax.f32 %v8009_v37, 0.0  ;;  %v8020_v43 = vadd.f32 %v1027_v3, %v7978_v17  ;;  %6940 = vrot.lane.b32.xlu1 %v6939_v34, %s11566_s23  ;;  %v1135_v45 = vmax.f32 %v8012_v38, 0.0  ;;  %v7146_v34 = vld [vmem:[%s11623_s3 + $0x284] ss:$16 sps:$4 sm:$0xff]   ;;  %v7135_v3 = vld [vmem:[%s11623_s3 + $0x80] ss:$16 sps:$4 sm:$0xff]  }
 0x1d1   : > { %v1029_v46 = vpop.f32.mrf.mxu0  ;;  %v1072_v47 = vpop.f32.mrf.mxu1  ;;  %v8062_v0 = vadd.f32 %v1070_v40, %v7978_v17  ;;  %v7143_v40 = vld [vmem:[%s11623_s3 + $0x64] ss:$16 sps:$4 sm:$0xff]   ;;  %3160 = vmatprep.subr.bf16.mxu0 %v7146_v34  ;;  %3118 = vmatpush1.bf16.msra.mxu1 %v7135_v3  ;;  %v7177_v34 = vld [vmem:[%s11623_s3 + $0x1a0] ss:$16 sps:$4 sm:$0xff]  }
 0x1d2   : > { %v8027_v49 = vadd.f32 %v1029_v46, %v7978_v17  ;;  %6945 = vrot.lane.b32.xlu0 %v6944_v41, %s11566_s23  ;;  %v6954_v50 = vpack.i.bf16 %v1135_v45, %v1134_v44  ;;  %v6949_v53 = vpack.i.bf16 %v1133_v42, %v1125_v48  ;;  %v1126_v54 = vmax.f32 %v8020_v43, 0.0  ;;  %v7144_v41 = vld [vmem:[%s11623_s3 + $0x280] ss:$16 sps:$4 sm:$0xff]   ;;  %v7152_v46 = vld [vmem:[%s11623_s3 + $0x264] ss:$16 sps:$4 sm:$0xff]   ;;  %3119 = vmatprep.subr.bf16.mxu1 %v7143_v40 }
 0x1d3   : > { %v1031_v51 = vpop.f32.mrf.mxu0  ;;  %v1074_v52 = vpop.f32.mrf.mxu1  ;;  %v8052_v61 = vadd.f32 %v1072_v47, %v7978_v17  ;;  %v1128_v10 = vmax.f32 %v8062_v0, 0.0  ;;  %v7141_v47 = vld [vmem:[%s11623_s3 + $0x60] ss:$16 sps:$4 sm:$0xff]   ;;  %3161 = vmatpush1.bf16.msra.mxu0 %v7144_v41  ;;  %v7185_v3 = vld [vmem:[%s11623_s3 + $0x184] ss:$16 sps:$4 sm:$0xff]  }
 0x1d4   : > { %v1127_v55 = vmax.f32 %v8027_v49, 0.0  ;;  %v8041_v56 = vadd.f32 %v1031_v51, %v7983_v20  ;;  %v8044_v57 = vadd.f32 %v1074_v52, %v7983_v20  ;;  %6955 = vrot.lane.b32.xlu1 %v6954_v50, %s11566_s23  ;;  %v7149_v50 = vld [vmem:[%s11623_s3 + $0x44] ss:$16 sps:$4 sm:$0xff]   ;;  %v7150_v51 = vld [vmem:[%s11623_s3 + $0x260] ss:$16 sps:$4 sm:$0xff]   ;;  %3162 = vmatprep.subr.bf16.mxu0 %v7152_v46 }
 0x1d5   : > { %v1033_v58 = vpop.f32.mrf.mxu0  ;;  %v1076_v59 = vpop.f32.mrf.mxu1  ;;  %v1129_v7 = vmax.f32 %v8052_v61, 0.0  ;;  %v7158_v52 = vld [vmem:[%s11623_s3 + $0x244] ss:$16 sps:$4 sm:$0xff]   ;;  %3120 = vmatpush1.bf16.msra.mxu1 %v7141_v47  ;;  %v7186_v40 = vld [vmem:[%s11623_s3 + $0x3a0] ss:$16 sps:$4 sm:$0xff]  }
 0x1d6   : > { %v6959_v60 = vpack.i.bf16 %v1127_v55, %v1126_v54  ;;  %v8055_v62 = vadd.f32 %v1033_v58, %v7983_v20  ;;  %6950 = vrot.lane.b32.xlu0 %v6949_v53, %s11566_s23  ;;  %v8059_v63 = vadd.f32 %v1076_v59, %v7983_v20  ;;  %v1136_v1 = vmax.f32 %v8041_v56, 0.0  ;;  %v7147_v53 = vld [vmem:[%s11623_s3 + $0x40] ss:$16 sps:$4 sm:$0xff]   ;;  %3121 = vmatprep.subr.bf16.mxu1 %v7149_v50  ;;  %v7155_v58 = vld [vmem:[%s11623_s3 + $0x24] ss:$16 sps:$4 sm:$0xff]  }
 0x1d7   : > { %v1138_v5 = vmax.f32 %v8044_v57, 0.0  ;;  %v6969_v11 = vpack.i.bf16 %v1129_v7, %v1128_v10  ;;  %3163 = vmatpush1.bf16.msra.mxu0 %v7150_v51  ;;  %v7156_v59 = vld [vmem:[%s11623_s3 + $0x240] ss:$16 sps:$4 sm:$0xff]   ;;  %v7194_v41 = vld [vmem:[%s11623_s3 + $0x384] ss:$16 sps:$4 sm:$0xff]  }
 0x1d8   : > { %v1137_v2 = vmax.f32 %v8055_v62, 0.0  ;;  %v1139_v6 = vmax.f32 %v8059_v63, 0.0  ;;  %6960 = vrot.lane.b32.xlu1 %v6959_v60, %s11566_s23  ;;  %3164 = vmatprep.subr.bf16.mxu0 %v7158_v52  ;;  %v7164_v60 = vld [vmem:[%s11623_s3 + $0x224] ss:$16 sps:$4 sm:$0xff]   ;;  %v7183_v46 = vld [vmem:[%s11623_s3 + $0x180] ss:$16 sps:$4 sm:$0xff]  }
 0x1d9   : > { %3122 = vmatpush1.bf16.msra.mxu1 %v7147_v53  ;;  %v7191_v47 = vld [vmem:[%s11623_s3 + $0x164] ss:$16 sps:$4 sm:$0xff]   ;;  %v7192_v50 = vld [vmem:[%s11623_s3 + $0x380] ss:$16 sps:$4 sm:$0xff]  }
 0x1da   : > { %v6964_v8 = vpack.i.bf16 %v1137_v2, %v1136_v1  ;;  %v6974_v9 = vpack.i.bf16 %v1139_v6, %v1138_v5  ;;  %3123 = vmatprep.subr.bf16.mxu1 %v7155_v58  ;;  %v7189_v51 = vld [vmem:[%s11623_s3 + $0x160] ss:$16 sps:$4 sm:$0xff]   ;;  %v7197_v52 = vld [vmem:[%s11623_s3 + $0x144] ss:$16 sps:$4 sm:$0xff]   ;;  %v1113_v58 = vpop.f32.mrf.mxu0 }
 0x1db   : > { %3165 = vmatpush1.bf16.msra.mxu0 %v7156_v59  ;;  %v7195_v53 = vld [vmem:[%s11623_s3 + $0x140] ss:$16 sps:$4 sm:$0xff]  }
 0x1dc   : > { %6965 = vrot.lane.b32.xlu0 %v6964_v8, %s11566_s23  ;;  %6975 = vrot.lane.b32.xlu1 %v6974_v9, %s11566_s23  ;;  %v7153_v8 = vld [vmem:[%s11623_s3 + $0x20] ss:$16 sps:$4 sm:$0xff]   ;;  %v7161_v9 = vld [vmem:[%s11623_s3 + $0x4] ss:$16 sps:$4 sm:$0xff]  }
 0x1dd   : > { %3166 = vmatprep.subr.bf16.mxu0 %v7164_v60  ;;  %3124 = vmatpush1.bf16.msra.mxu1 %v7153_v8  ;;  %v7210_v29 = vld [vmem:[%s11623_s3 + $0x320] ss:$16 sps:$4 sm:$0xff]  }
 0x1de   : > { %3125 = vmatprep.subr.bf16.mxu1 %v7161_v9  ;;  %v7198_v9 = vld [vmem:[%s11623_s3 + $0x360] ss:$16 sps:$4 sm:$0xff]  }
 0x1df   : > { %v7219_v61 = vld [vmem:[%s11623_s3 + $0x4c0] ss:$16 sps:$4 sm:$0xff]  }
 0x1e0   : > { %6970 = vrot.lane.b32.xlu0 %v6969_v11, %s11566_s23  ;;  %v7162_v11 = vld [vmem:[%s11623_s3 + $0x220] ss:$16 sps:$4 sm:$0xff]  }
 0x1e1   : > { %3167 = vmatpush1.bf16.msra.mxu0 %v7162_v11  ;;  %3126 = vmatpush1.bf16.msra.mxu1 %v7159_v13  ;;  %v7200_v11 = vld [vmem:[%s11623_s3 + $0x364] ss:$16 sps:$4 sm:$0xff]  }
 0x1e2   : > { %3168 = vmatprep.subr.bf16.mxu0 %v7170_v12  ;;  %3127 = vmatprep.subr.bf16.mxu1 %v7167_v14  ;;  %v7201_v12 = vld [vmem:[%s11623_s3 + $0x120] ss:$16 sps:$4 sm:$0xff]   ;;  %v7203_v14 = vld [vmem:[%s11623_s3 + $0x124] ss:$16 sps:$4 sm:$0xff]  }
 0x1e5   : > { %3169 = vmatpush1.bf16.msra.mxu0 %v7168_v15  ;;  %3128 = vmatpush2.bf16.msra.mxu1 %v7165_v18  ;;  %v1115_v15 = vpop.f32.mrf.mxu0 }
 0x1e6   : > { %3170 = vmatprep.subr.bf16.mxu0 %v7176_v16  ;;  %3129 = vmatprep.subr.bf16.mxu1 %v7173_v39  ;;  %v8291_v31 = vadd.f32 %v1115_v15, %v7978_v17 }
 0x1e8   : > { %v1131_v43 = vmax.f32 %v8291_v31, 0.0 }
 0x1e9   : > { %3171 = vmatpush2.bf16.msra.mxu0 %v7174_v22  ;;  %3130 = vmatpush2.bf16.msra.mxu1 %v7171_v26 }
 0x1ea   : > { %3172 = vmatprep.subr.bf16.mxu0 %v7182_v23  ;;  %3131 = vmatprep.subr.bf16.mxu1 %v7179_v27 }
 0x1ed   : > { %3173 = vmatpush2.bf16.msra.mxu0 %v7180_v32  ;;  %3132 = vmatpush2.bf16.msra.mxu1 %v7177_v34  ;;  %v8256_v34 = vadd.f32 %v1113_v58, %v7978_v17  ;;  %v7209_v58 = vld [vmem:[%s11623_s3 + $0x104] ss:$16 sps:$4 sm:$0xff]  }
 0x1ee   : > { %3174 = vmatprep.subr.bf16.mxu0 %v7188_v33  ;;  %3133 = vmatprep.subr.bf16.mxu1 %v7185_v3  ;;  %v1117_v3 = vpop.f32.mrf.mxu0 }
 0x1ef   : > { %v8361_v56 = vadd.f32 %v1117_v3, %v7983_v20 }
 0x1f1   : > { %3175 = vmatpush2.bf16.msra.mxu0 %v7186_v40  ;;  %3134 = vmatpush2.bf16.msra.mxu1 %v7183_v46  ;;  %v7204_v46 = vld [vmem:[%s11623_s3 + $0x340] ss:$16 sps:$4 sm:$0xff]  }
 0x1f2   : > { %3176 = vmatprep.subr.bf16.mxu0 %v7194_v41  ;;  %3135 = vmatprep.subr.bf16.mxu1 %v7191_v47  ;;  %v7206_v47 = vld [vmem:[%s11623_s3 + $0x344] ss:$16 sps:$4 sm:$0xff]  }
 0x1f5   : > { %3177 = vmatpush2.bf16.msra.mxu0 %v7192_v50  ;;  %3136 = vmatpush2.bf16.msra.mxu1 %v7189_v51  ;;  %v7207_v50 = vld [vmem:[%s11623_s3 + $0x100] ss:$16 sps:$4 sm:$0xff]  }
 0x1f6   : > { %3137 = vmatprep.subr.bf16.mxu1 %v7197_v52  ;;  %3178 = vmatprep.subr.bf16.mxu0 %v7200_v11 }
 0x1f9   : > { %3138 = vmatpush2.bf16.msra.mxu1 %v7195_v53  ;;  %3179 = vmatpush2.bf16.msra.mxu0 %v7198_v9 }
 0x1fa   : > { %3139 = vmatprep.subr.bf16.mxu1 %v7203_v14  ;;  %3180 = vmatprep.subr.bf16.mxu0 %v7206_v47 }
 0x1fd   : > { %3140 = vmatpush2.bf16.msra.mxu1 %v7201_v12  ;;  %3181 = vmatpush2.bf16.msra.mxu0 %v7204_v46 }
 0x1fe   : > { %3141 = vmatprep.subr.bf16.mxu1 %v7209_v58 }
 0x201   : > { %3142 = vmatpush2.bf16.msra.mxu1 %v7207_v50 }
 0x242   : > { %v6941_v59 = vpop.permute.xlu1 %6940 }
 0x243   : > { %v6943_v60 = vunpack.i.h.bf16 %v6941_v59  ;;  %v6942_v8 = vunpack.i.l.bf16 %v6941_v59 }
 0x244   : > { %v6946_v13 = vpop.permute.xlu0 %6945 }
 0x245   : > { %v1203_v18 = vsel %vm349_vm12, %v6942_v8, %v6943_v60  ;;  %v6948_v26 = vunpack.i.h.bf16 %v6946_v13  ;;  %v6947_v27 = vunpack.i.l.bf16 %v6946_v13  ;;  %v1119_v13 = vpop.f32.mrf.mxu0 }
 0x246   : > { %v6956_v16 = vpop.permute.xlu1 %6955  ;;  %v8261_v41 = vmax.f32 %v1123_v28, %v1203_v18  ;;  %v7215_v18 = vld [vmem:[%s11623_s3 + $0x4e4] ss:$16 sps:$4 sm:$0xff]  }
 0x247   : > { %v6958_v39 = vunpack.i.h.bf16 %v6956_v16  ;;  %v6957_v22 = vunpack.i.l.bf16 %v6956_v16  ;;  %3197 = vmatprep.subr.bf16.mxu1 %v7215_v18 }
 0x248   : > { %v6951_v23 = vpop.permute.xlu0 %6950 }
 0x249   : > { %v6953_v32 = vunpack.i.h.bf16 %v6951_v23  ;;  %v6952_v33 = vunpack.i.l.bf16 %v6951_v23  ;;  %v1213_v40 = vsel %vm349_vm12, %v6957_v22, %v6958_v39 }
 0x24a   : > { %v6961_v51 = vpop.permute.xlu1 %6960  ;;  %v8275_v25 = vmax.f32 %v1134_v44, %v1213_v40  ;;  %v1202_v44 = vsel %vm349_vm12, %v6947_v27, %v6942_v8  ;;  %v7218_v40 = vld [vmem:[%s11623_s3 + $0x304] ss:$16 sps:$4 sm:$0xff]  }
 0x24b   : > { %v1212_v52 = vsel %vm349_vm12, %v6953_v32, %v6957_v22  ;;  %v1204_v28 = vsel %vm349_vm12, %v6943_v60, %v6952_v33  ;;  %v1211_v53 = vsel %vm349_vm12, %v6948_v26, %v6953_v32  ;;  %v6963_v59 = vunpack.i.h.bf16 %v6961_v51 }
 0x24c   : > { %v6962_v9 = vunpack.i.l.bf16 %v6961_v51  ;;  %v8284_v11 = vmax.f32 %v1133_v42, %v1212_v52  ;;  %v8288_v12 = vmax.f32 %v1124_v24, %v1204_v28  ;;  %v8296_v60 = vmax.f32 %v1132_v36, %v1211_v53  ;;  %v7212_v36 = vld [vmem:[%s11623_s3 + $0x324] ss:$16 sps:$4 sm:$0xff]  }
 0x24d   : > { %v1130_v22 = vmax.f32 %v8256_v34, 0.0  ;;  %v8328_v35 = vmax.f32 %v1122_v30, %v1202_v44  ;;  %3182 = vmatprep.subr.bf16.mxu0 %v7212_v36  ;;  %v7266_v44 = vld [vmem:[%s11623_s3 + $0x6e4] ss:$16 sps:$4 sm:$0xff]  }
 0x24e   : > { %v6966_v37 = vpop.permute.xlu0 %6965  ;;  %v6984_v42 = vpack.i.bf16 %v8275_v25, %v8284_v11  ;;  %v6979_v19 = vpack.i.bf16 %v8288_v12, %v8261_v41  ;;  %v1205_v24 = vsel %vm349_vm12, %v6952_v33, %v6962_v9  ;;  %v1206_v17 = vsel %vm349_vm12, %v6962_v9, %v6963_v59  ;;  %v8322_v23 = vpop.permute.xlu1 %6975  ;;  %3183 = vmatpush2.bf16.msra.mxu0 %v7210_v29 }
 0x24f   : > { %v6968_v8 = vunpack.i.h.bf16 %v6966_v37  ;;  %v6967_v14 = vunpack.i.l.bf16 %v6966_v37  ;;  %v8312_v15 = vmax.f32 %v1125_v48, %v1205_v24  ;;  %v8316_v16 = vmax.f32 %v1126_v54, %v1206_v17  ;;  %3184 = vmatprep.subr.bf16.mxu0 %v7218_v40 }
 0x250   : > { %6985 = vrot.lane.b32.xlu0 %v6984_v42, %s7642_s27  ;;  %6980 = vrot.lane.b32.xlu1 %v6979_v19, %s7642_s27  ;;  %v8332_v48 = vadd.f32 %v1119_v13, %v7983_v20  ;;  %v6989_v21 = vpack.i.bf16 %v8296_v60, %v8328_v35  ;;  %v6978_v46 = vunpack.i.h.bf16 %v8322_v23  ;;  %v6977_v47 = vunpack.i.l.bf16 %v8322_v23 }
 0x251   : > { %v1214_v54 = vsel %vm349_vm12, %v6958_v39, %v6967_v14  ;;  %v1215_v26 = vsel %vm349_vm12, %v6967_v14, %v6968_v8  ;;  %v6994_v32 = vpack.i.bf16 %v8316_v16, %v8312_v15  ;;  %v7216_v39 = vld [vmem:[%s11623_s3 + $0x300] ss:$16 sps:$4 sm:$0xff]  }
 0x252   : > { %v8336_v27 = vpop.permute.xlu0 %6970  ;;  %v8344_v30 = vmax.f32 %v1135_v45, %v1214_v54  ;;  %v8348_v33 = vmax.f32 %v1136_v1, %v1215_v26  ;;  %v6999_v1 = vpack.i.bf16 %v1131_v43, %v1130_v22  ;;  %v1141_v52 = vmax.f32 %v8332_v48, 0.0  ;;  %3185 = vmatpush2.bf16.msra.mxu0 %v7216_v39 }
 0x253   : > { %v6973_v38 = vunpack.i.h.bf16 %v8336_v27  ;;  %v6972_v45 = vunpack.i.l.bf16 %v8336_v27  ;;  %v1216_v53 = vsel %vm349_vm12, %v6968_v8, %v6977_v47  ;;  %v1217_v58 = vsel %vm349_vm12, %v6977_v47, %v6978_v46  ;;  %3240 = vmatprep.subr.bf16.mxu0 %v7266_v44 }
 0x254   : > { %6995 = vrot.lane.b32.xlu0 %v6994_v32, %s7642_s27  ;;  %6990 = vrot.lane.b32.xlu1 %v6989_v21, %s7642_s27  ;;  %v7004_v20 = vpack.i.bf16 %v8348_v33, %v8344_v30  ;;  %v8399_v0 = vmax.f32 %v1137_v2, %v1216_v53 }
 0x255   : > { %v1207_v50 = vsel %vm349_vm12, %v6963_v59, %v6972_v45  ;;  %v1208_v51 = vsel %vm349_vm12, %v6972_v45, %v6973_v38  ;;  %v1140_v59 = vmax.f32 %v8361_v56, 0.0 }
 0x256   : > { %v8378_v3 = vmax.f32 %v1127_v55, %v1207_v50  ;;  %v8382_v28 = vmax.f32 %v1128_v10, %v1208_v51  ;;  %v8403_v10 = vmax.f32 %v1138_v5, %v1217_v58 }
 0x257   : > { %v7009_v49 = vpack.i.bf16 %v1141_v52, %v1140_v59 }
 0x258   : > { %7000 = vrot.lane.b32.xlu0 %v6999_v1, %s11566_s23  ;;  %7005 = vrot.lane.b32.xlu1 %v7004_v20, %s7642_s27  ;;  %v7014_v55 = vpack.i.bf16 %v8382_v28, %v8378_v3  ;;  %v7019_v9 = vpack.i.bf16 %v8403_v10, %v8399_v0  ;;  %v7213_v20 = vld [vmem:[%s11623_s3 + $0x4e0] ss:$16 sps:$4 sm:$0xff]  }
 0x25c   : > { %7015 = vrot.lane.b32.xlu0 %v7014_v55, %s7642_s27  ;;  %7010 = vrot.lane.b32.xlu1 %v7009_v49, %s11566_s23 }
 0x260   : > { %7020 = vrot.lane.b32.xlu1 %v7019_v9, %s7642_s27 }
 0x2c2   : > { %v6986_v62 = vpop.permute.xlu0 %6985  ;;  %v6981_v2 = vpop.permute.xlu1 %6980 }
 0x2c3   : > { %v6988_v13 = vunpack.i.h.bf16 %v6986_v62  ;;  %v6987_v57 = vunpack.i.l.bf16 %v6986_v62  ;;  %v6983_v5 = vunpack.i.h.bf16 %v6981_v2  ;;  %v6982_v37 = vunpack.i.l.bf16 %v6981_v2 }
 0x2c5   : > { %v1321_v42 = vsel %vm421_vm4, %v6982_v37, %v6983_v5  ;;  %v1330_v19 = vsel %vm421_vm4, %v6987_v57, %v6988_v13 }
 0x2c6   : > { %v8415_v24 = vpop.permute.xlu0 %6995  ;;  %v6991_v17 = vpop.permute.xlu1 %6990  ;;  %v1357_v29 = vmax.f32 %v8261_v41, %v1321_v42  ;;  %v1366_v36 = vmax.f32 %v8284_v11, %v1330_v19  ;;  %v7224_v42 = vld [vmem:[%s11623_s3 + $0x4a4] ss:$16 sps:$4 sm:$0xff]  }
 0x2c7   : > { %v6997_v8 = vunpack.i.l.bf16 %v8415_v24  ;;  %v6993_v14 = vunpack.i.h.bf16 %v6991_v17  ;;  %v6992_v18 = vunpack.i.l.bf16 %v6991_v17  ;;  %v6998_v54 = vunpack.i.h.bf16 %v8415_v24  ;;  %v7329_v24 = vld [vmem:[%s11623_s3 + $0x724] ss:$16 sps:$4 sm:$0xff]  }
 0x2c8   : > { %v8421_v26 = vpack.c.bf16 %v1366_v36, %v1357_v29 }
 0x2c9   : > { %v1329_v32 = vsel %vm421_vm4, %v6993_v14, %v6987_v57  ;;  %v1320_v21 = vsel %vm421_vm4, %v6992_v18, %v6982_v37  ;;  %v1322_v39 = vsel %vm421_vm4, %v6983_v5, %v6997_v8 }
 0x2ca   : > { %v1365_v40 = vmax.f32 %v8296_v60, %v1329_v32  ;;  %v1356_v41 = vmax.f32 %v8328_v35, %v1320_v21  ;;  %v7001_v47 = vpop.permute.xlu0 %7000  ;;  %3143 = vmatprep.mubr.bf16.mxu1 %v8421_v26  ;;  %v8429_v11 = vpop.permute.xlu1 %7005  ;;  %v7221_v60 = vld [vmem:[%s11623_s3 + $0x4c4] ss:$16 sps:$4 sm:$0xff]   ;;  %v1323_v35 = vsel %vm421_vm4, %v6997_v8, %v6998_v54  ;;  %v1358_v58 = vmax.f32 %v8288_v12, %v1322_v39  ;;  %v7225_v21 = vld [vmem:[%s11623_s3 + $0x480] ss:$16 sps:$4 sm:$0xff]  }
 0x2cb   : > { %v7003_v45 = vunpack.i.h.bf16 %v7001_v47  ;;  %v7002_v1 = vunpack.i.l.bf16 %v7001_v47  ;;  %v7008_v50 = vunpack.i.h.bf16 %v8429_v11  ;;  %v7007_v51 = vunpack.i.l.bf16 %v8429_v11  ;;  %v7269_v8 = vld [vmem:[%s11623_s3 + $0x6c4] ss:$16 sps:$4 sm:$0xff]   ;;  %v7267_v39 = vld [vmem:[%s11623_s3 + $0x6c0] ss:$16 sps:$4 sm:$0xff]  }
 0x2cc   : > { %v8436_v53 = vpack.c.bf16 %v1365_v40, %v1356_v41  ;;  %v7230_v41 = vld [vmem:[%s11623_s3 + $0x464] ss:$16 sps:$4 sm:$0xff]   ;;  %v7270_v47 = vld [vmem:[%s11623_s3 + $0x6a0] ss:$16 sps:$4 sm:$0xff]  }
 0x2cd   : > { %v1331_v49 = vsel %vm421_vm4, %v6988_v13, %v7007_v51  ;;  %v1209_v55 = vsel %vm349_vm12, %v6973_v38, %v7002_v1  ;;  %v1210_v9 = vsel %vm349_vm12, %v7002_v1, %v7003_v45  ;;  %v1332_v27 = vsel %vm421_vm4, %v7007_v51, %v7008_v50  ;;  %v7275_v1 = vld [vmem:[%s11623_s3 + $0x684] ss:$16 sps:$4 sm:$0xff]   ;;  %v7231_v51 = vld [vmem:[%s11623_s3 + $0x440] ss:$16 sps:$4 sm:$0xff]  }
 0x2ce   : > { %v1367_v44 = vmax.f32 %v8275_v25, %v1331_v49  ;;  %v8451_v62 = vpop.permute.xlu0 %7015  ;;  %v7011_v2 = vpop.permute.xlu1 %7010  ;;  %3144 = vmatmul.mubr.bf16.vlgmr.msra.gmra.mxu1 %v8436_v53  ;;  %v8456_v57 = vmax.f32 %v1129_v7, %v1209_v55  ;;  %v8460_v12 = vmax.f32 %v1130_v22, %v1210_v9  ;;  %v1258_v7 = vmax.f32 %v1131_v43, %v7003_v45  ;;  %v7233_v45 = vld [vmem:[%s11623_s3 + $0x444] ss:$16 sps:$4 sm:$0xff]   ;;  %v7276_v49 = vld [vmem:[%s11623_s3 + $0x660] ss:$16 sps:$4 sm:$0xff]  }
 0x2cf   : > { %v7018_v38 = vunpack.i.h.bf16 %v8451_v62  ;;  %v7017_v25 = vunpack.i.l.bf16 %v8451_v62  ;;  %v7013_v13 = vunpack.i.h.bf16 %v7011_v2  ;;  %v7012_v5 = vunpack.i.l.bf16 %v7011_v2  ;;  %3198 = vmatpush1.bf16.msra.mxu1 %v7213_v20  ;;  %v7273_v20 = vld [vmem:[%s11623_s3 + $0x680] ss:$16 sps:$4 sm:$0xff]   ;;  %v7239_v55 = vld [vmem:[%s11623_s3 + $0x404] ss:$16 sps:$4 sm:$0xff]  }
 0x2d0   : > { %3199 = vmatprep.subr.bf16.mxu1 %v7221_v60  ;;  %v7024_v34 = vpack.i.bf16 %v8460_v12, %v8456_v57  ;;  %v1359_v22 = vmax.f32 %v8312_v15, %v1323_v35  ;;  %v1368_v37 = vmax.f32 %v8344_v30, %v1332_v27  ;;  %v8481_v17 = vpack.c.bf16 %v1367_v44, %v1358_v58  ;;  %v7236_v60 = vld [vmem:[%s11623_s3 + $0x424] ss:$16 sps:$4 sm:$0xff]   ;;  %v7234_v58 = vld [vmem:[%s11623_s3 + $0x420] ss:$16 sps:$4 sm:$0xff]  }
 0x2d1   : > { %v1259_v19 = vmax.f32 %v1141_v52, %v7013_v13  ;;  %v1218_v31 = vsel %vm349_vm12, %v6978_v46, %v7012_v5  ;;  %v1219_v43 = vsel %vm349_vm12, %v7012_v5, %v7013_v13  ;;  %v7222_v52 = vld [vmem:[%s11623_s3 + $0x4a0] ss:$16 sps:$4 sm:$0xff]   ;;  %v1325_v63 = vsel %vm421_vm4, %v7017_v25, %v7018_v38  ;;  %v7278_v35 = vld [vmem:[%s11623_s3 + $0x664] ss:$16 sps:$4 sm:$0xff]  }
 0x2d2   : > { %7025 = vrot.lane.b32.xlu0 %v7024_v34, %s7642_s27  ;;  %v8488_v15 = vpop.permute.xlu1 %7020  ;;  %v8490_v30 = vpack.c.bf16 %v1368_v37, %v1359_v22  ;;  %v8494_v29 = vmax.f32 %v1139_v6, %v1218_v31  ;;  %v8498_v48 = vmax.f32 %v1140_v59, %v1219_v43  ;;  %v7264_v6 = vld [vmem:[%s11623_s3 + $0x6e0] ss:$16 sps:$4 sm:$0xff]   ;;  %v7227_v59 = vld [vmem:[%s11623_s3 + $0x484] ss:$16 sps:$4 sm:$0xff]   ;;  %v1361_v18 = vmax.f32 %v8378_v3, %v1325_v63 }
 0x2d3   : > { %v7023_v23 = vunpack.i.h.bf16 %v8488_v15  ;;  %v7022_v46 = vunpack.i.l.bf16 %v8488_v15  ;;  %3200 = vmatpush1.bf16.msra.mxu1 %v7219_v61  ;;  %v7034_v36 = vpack.i.bf16 %v1259_v19, %v1258_v7  ;;  %v7272_v3 = vld [vmem:[%s11623_s3 + $0x6a4] ss:$16 sps:$4 sm:$0xff]   ;;  %v7237_v44 = vld [vmem:[%s11623_s3 + $0x400] ss:$16 sps:$4 sm:$0xff]   ;;  %v7339_v15 = vld [vmem:[%s11623_s3 + $0xe8] ss:$16 sps:$4 sm:$0xff]  }
 0x2d4   : > { %3186 = vmatprep.mubr.bf16.mxu0 %v8490_v30  ;;  %3201 = vmatprep.subr.bf16.mxu1 %v7224_v42  ;;  %v7029_v56 = vpack.i.bf16 %v8498_v48, %v8494_v29  ;;  %v7281_v9 = vld [vmem:[%s11623_s3 + $0x644] ss:$16 sps:$4 sm:$0xff]   ;;  %v7279_v2 = vld [vmem:[%s11623_s3 + $0x640] ss:$16 sps:$4 sm:$0xff]  }
 0x2d5   : > { %3187 = vmatmul.mubr.bf16.vlgmr.msra.gmra.mxu0 %v8481_v17  ;;  %v1334_v14 = vsel %vm421_vm4, %v7022_v46, %v7023_v23  ;;  %v7242_v27 = vld [vmem:[%s11623_s3 + $0x5e4] ss:$16 sps:$4 sm:$0xff]   ;;  %v7240_v5 = vld [vmem:[%s11623_s3 + $0x5e0] ss:$16 sps:$4 sm:$0xff]  }
 0x2d6   : > { %7035 = vrot.lane.b32.xlu0 %v7034_v36, %s7642_s27  ;;  %7030 = vrot.lane.b32.xlu1 %v7029_v56, %s7642_s27  ;;  %v1370_v32 = vmax.f32 %v8399_v0, %v1334_v14  ;;  %v7228_v0 = vld [vmem:[%s11623_s3 + $0x460] ss:$16 sps:$4 sm:$0xff]   ;;  %v7284_v13 = vld [vmem:[%s11623_s3 + $0x624] ss:$16 sps:$4 sm:$0xff]   ;;  %s11538_s27 = smov 46  }
 0x2d7   : > { %3202 = vmatpush1.bf16.msra.mxu1 %v7222_v52  ;;  %3241 = vmatpush1.bf16.msra.mxu0 %v7264_v6  ;;  %v7282_v61 = vld [vmem:[%s11623_s3 + $0x620] ss:$16 sps:$4 sm:$0xff]   ;;  %v7245_v7 = vld [vmem:[%s11623_s3 + $0x5c4] ss:$16 sps:$4 sm:$0xff]  }
 0x2d8   : > { %3203 = vmatprep.subr.bf16.mxu1 %v7227_v59  ;;  %v8538_v40 = vpack.c.bf16 %v1370_v32, %v1361_v18  ;;  %3242 = vmatprep.subr.bf16.mxu0 %v7269_v8  ;;  %v7287_v34 = vld [vmem:[%s11623_s3 + $0x604] ss:$16 sps:$4 sm:$0xff]   ;;  %v7243_v22 = vld [vmem:[%s11623_s3 + $0x5c0] ss:$16 sps:$4 sm:$0xff]  }
 0x2d9   : > { %v7285_v37 = vld [vmem:[%s11623_s3 + $0x600] ss:$16 sps:$4 sm:$0xff]   ;;  %v7248_v42 = vld [vmem:[%s11623_s3 + $0x5a4] ss:$16 sps:$4 sm:$0xff]  }
 0x2da   : > { %3229 = vmatprep.mubr.bf16.mxu1 %v8538_v40  ;;  %v7293_v19 = vld [vmem:[%s11623_s3 + $0x7e4] ss:$16 sps:$4 sm:$0xff]   ;;  %v7246_v31 = vld [vmem:[%s11623_s3 + $0x5a0] ss:$16 sps:$4 sm:$0xff]  }
 0x2db   : > { %3204 = vmatpush1.bf16.msra.mxu1 %v7225_v21  ;;  %3243 = vmatpush1.bf16.msra.mxu0 %v7267_v39  ;;  %v7291_v43 = vld [vmem:[%s11623_s3 + $0x7e0] ss:$16 sps:$4 sm:$0xff]   ;;  %v7251_v52 = vld [vmem:[%s11623_s3 + $0x584] ss:$16 sps:$4 sm:$0xff]  }
 0x2dc   : > { %3205 = vmatprep.subr.bf16.mxu1 %v7230_v41  ;;  %3244 = vmatprep.subr.bf16.mxu0 %v7272_v3  ;;  %v7299_v36 = vld [vmem:[%s11623_s3 + $0x7c4] ss:$16 sps:$4 sm:$0xff]   ;;  %v7249_v63 = vld [vmem:[%s11623_s3 + $0x580] ss:$16 sps:$4 sm:$0xff]  }
 0x2dd   : > { %v7297_v6 = vld [vmem:[%s11623_s3 + $0x7c0] ss:$16 sps:$4 sm:$0xff]   ;;  %v7254_v56 = vld [vmem:[%s11623_s3 + $0x564] ss:$16 sps:$4 sm:$0xff]  }
 0x2de   : > { %v7305_v59 = vld [vmem:[%s11623_s3 + $0x7a4] ss:$16 sps:$4 sm:$0xff]   ;;  %v7252_v8 = vld [vmem:[%s11623_s3 + $0x560] ss:$16 sps:$4 sm:$0xff]  }
 0x2df   : > { %3206 = vmatpush1.bf16.msra.mxu1 %v7228_v0  ;;  %3245 = vmatpush1.bf16.msra.mxu0 %v7270_v47  ;;  %v7303_v14 = vld [vmem:[%s11623_s3 + $0x7a0] ss:$16 sps:$4 sm:$0xff]   ;;  %v7257_v18 = vld [vmem:[%s11623_s3 + $0x544] ss:$16 sps:$4 sm:$0xff]  }
 0x2e0   : > { %3207 = vmatprep.subr.bf16.mxu1 %v7233_v45  ;;  %3246 = vmatprep.subr.bf16.mxu0 %v7275_v1  ;;  %v7311_v32 = vld [vmem:[%s11623_s3 + $0x784] ss:$16 sps:$4 sm:$0xff]   ;;  %v7255_v21 = vld [vmem:[%s11623_s3 + $0x540] ss:$16 sps:$4 sm:$0xff]  }
 0x2e1   : > { %v7309_v39 = vld [vmem:[%s11623_s3 + $0x780] ss:$16 sps:$4 sm:$0xff]   ;;  %v7260_v41 = vld [vmem:[%s11623_s3 + $0x524] ss:$16 sps:$4 sm:$0xff]  }
 0x2e2   : > { %v7317_v3 = vld [vmem:[%s11623_s3 + $0x764] ss:$16 sps:$4 sm:$0xff]   ;;  %v7258_v0 = vld [vmem:[%s11623_s3 + $0x520] ss:$16 sps:$4 sm:$0xff]  }
 0x2e3   : > { %3208 = vmatpush1.bf16.msra.mxu1 %v7231_v51  ;;  %3247 = vmatpush1.bf16.msra.mxu0 %v7273_v20  ;;  %v7315_v47 = vld [vmem:[%s11623_s3 + $0x760] ss:$16 sps:$4 sm:$0xff]   ;;  %v7263_v45 = vld [vmem:[%s11623_s3 + $0x504] ss:$16 sps:$4 sm:$0xff]   ;;  %v1333_v51 = vsel %vm421_vm4, %v7008_v50, %v7022_v46  ;;  %v1324_v20 = vsel %vm421_vm4, %v6998_v54, %v7017_v25 }
 0x2e4   : > { %3209 = vmatprep.subr.bf16.mxu1 %v7236_v60  ;;  %3248 = vmatprep.subr.bf16.mxu0 %v7278_v35  ;;  %v7323_v1 = vld [vmem:[%s11623_s3 + $0x744] ss:$16 sps:$4 sm:$0xff]   ;;  %v7261_v60 = vld [vmem:[%s11623_s3 + $0x500] ss:$16 sps:$4 sm:$0xff]   ;;  %v1369_v11 = vmax.f32 %v8348_v33, %v1333_v51  ;;  %v1360_v54 = vmax.f32 %v8316_v16, %v1324_v20  ;;  %v7350_v20 = vld [vmem:[%s11623_s3 + $0x2ac] ss:$16 sps:$4 sm:$0xff]  }
 0x2e5   : > { %v7321_v35 = vld [vmem:[%s11623_s3 + $0x740] ss:$16 sps:$4 sm:$0xff]   ;;  %v7290_v50 = vld [vmem:[%s11623_s3 + $0x8e4] ss:$16 sps:$4 sm:$0xff]  }
 0x2e6   : > { %v7288_v25 = vld [vmem:[%s11623_s3 + $0x8e0] ss:$16 sps:$4 sm:$0xff]   ;;  %v8709_v46 = vpack.c.bf16 %v1369_v11, %v1360_v54  ;;  %v7335_v16 = vld [vmem:[%s11623_s3 + $0x704] ss:$16 sps:$4 sm:$0xff]   ;;  %v7359_v11 = vld [vmem:[%s11623_s3 + $0x8c] ss:$16 sps:$4 sm:$0xff]  }
 0x2e7   : > { %3210 = vmatpush1.bf16.msra.mxu1 %v7234_v58  ;;  %3249 = vmatpush1.bf16.msra.mxu0 %v7276_v49  ;;  %v7327_v33 = vld [vmem:[%s11623_s3 + $0x720] ss:$16 sps:$4 sm:$0xff]   ;;  %v7296_v58 = vld [vmem:[%s11623_s3 + $0x8c4] ss:$16 sps:$4 sm:$0xff]   ;;  %v7362_v54 = vld [vmem:[%s11623_s3 + $0x26c] ss:$16 sps:$4 sm:$0xff]  }
 0x2e8   : > { %3211 = vmatprep.subr.bf16.mxu1 %v7239_v55  ;;  %3250 = vmatprep.subr.bf16.mxu0 %v7281_v9  ;;  %v7294_v49 = vld [vmem:[%s11623_s3 + $0x8c0] ss:$16 sps:$4 sm:$0xff]   ;;  %v7302_v9 = vld [vmem:[%s11623_s3 + $0x8a4] ss:$16 sps:$4 sm:$0xff]  }
 0x2e9   : > { %v7333_v55 = vld [vmem:[%s11623_s3 + $0x700] ss:$16 sps:$4 sm:$0xff]  }
 0x2eb   : > { %3212 = vmatpush1.bf16.msra.mxu1 %v7237_v44  ;;  %3251 = vmatpush1.bf16.msra.mxu0 %v7279_v2  ;;  %v7341_v44 = vld [vmem:[%s11623_s3 + $0xec] ss:$16 sps:$4 sm:$0xff]   ;;  %v7300_v2 = vld [vmem:[%s11623_s3 + $0x8a0] ss:$16 sps:$4 sm:$0xff]  }
 0x2ec   : > { %3213 = vmatprep.subr.bf16.mxu1 %v7242_v27  ;;  %3252 = vmatprep.subr.bf16.mxu0 %v7284_v13  ;;  %v7308_v27 = vld [vmem:[%s11623_s3 + $0x884] ss:$16 sps:$4 sm:$0xff]   ;;  %v7306_v13 = vld [vmem:[%s11623_s3 + $0x880] ss:$16 sps:$4 sm:$0xff]  }
 0x2ef   : > { %3214 = vmatpush2.bf16.msra.mxu1 %v7240_v5  ;;  %3253 = vmatpush1.bf16.msra.mxu0 %v7282_v61  ;;  %v7314_v5 = vld [vmem:[%s11623_s3 + $0x864] ss:$16 sps:$4 sm:$0xff]   ;;  %v7312_v61 = vld [vmem:[%s11623_s3 + $0x860] ss:$16 sps:$4 sm:$0xff]  }
 0x2f0   : > { %3215 = vmatprep.subr.bf16.mxu1 %v7245_v7  ;;  %3254 = vmatprep.subr.bf16.mxu0 %v7287_v34  ;;  %v7320_v7 = vld [vmem:[%s11623_s3 + $0x844] ss:$16 sps:$4 sm:$0xff]   ;;  %v7318_v34 = vld [vmem:[%s11623_s3 + $0x840] ss:$16 sps:$4 sm:$0xff]  }
 0x2f3   : > { %3216 = vmatpush2.bf16.msra.mxu1 %v7243_v22  ;;  %3255 = vmatpush1.bf16.msra.mxu0 %v7285_v37  ;;  %v7326_v22 = vld [vmem:[%s11623_s3 + $0x824] ss:$16 sps:$4 sm:$0xff]   ;;  %v7324_v37 = vld [vmem:[%s11623_s3 + $0x820] ss:$16 sps:$4 sm:$0xff]  }
 0x2f4   : > { %3217 = vmatprep.subr.bf16.mxu1 %v7248_v42  ;;  %3256 = vmatprep.subr.bf16.mxu0 %v7293_v19  ;;  %v7332_v42 = vld [vmem:[%s11623_s3 + $0x804] ss:$16 sps:$4 sm:$0xff]   ;;  %v7330_v19 = vld [vmem:[%s11623_s3 + $0x800] ss:$16 sps:$4 sm:$0xff]  }
 0x2f7   : > { %3218 = vmatpush2.bf16.msra.mxu1 %v7246_v31  ;;  %3257 = vmatpush2.bf16.msra.mxu0 %v7291_v43  ;;  %v7338_v31 = vld [vmem:[%s11623_s3 + $0x2ec] ss:$16 sps:$4 sm:$0xff]  }
 0x2f8   : > { %3219 = vmatprep.subr.bf16.mxu1 %v7251_v52  ;;  %3258 = vmatprep.subr.bf16.mxu0 %v7299_v36 }
 0x2fb   : > { %3220 = vmatpush2.bf16.msra.mxu1 %v7249_v63  ;;  %3259 = vmatpush2.bf16.msra.mxu0 %v7297_v6 }
 0x2fc   : > { %3221 = vmatprep.subr.bf16.mxu1 %v7254_v56  ;;  %3260 = vmatprep.subr.bf16.mxu0 %v7305_v59 }
 0x2ff   : > { %3222 = vmatpush2.bf16.msra.mxu1 %v7252_v8  ;;  %3261 = vmatpush2.bf16.msra.mxu0 %v7303_v14 }
 0x300   : > { %3223 = vmatprep.subr.bf16.mxu1 %v7257_v18  ;;  %3262 = vmatprep.subr.bf16.mxu0 %v7311_v32 }
 0x303   : > { %3224 = vmatpush2.bf16.msra.mxu1 %v7255_v21  ;;  %3263 = vmatpush2.bf16.msra.mxu0 %v7309_v39 }
 0x304   : > { %3225 = vmatprep.subr.bf16.mxu1 %v7260_v41  ;;  %3264 = vmatprep.subr.bf16.mxu0 %v7317_v3 }
 0x307   : > { %3226 = vmatpush2.bf16.msra.mxu1 %v7258_v0  ;;  %3265 = vmatpush2.bf16.msra.mxu0 %v7315_v47 }
 0x308   : > { %3227 = vmatprep.subr.bf16.mxu1 %v7263_v45  ;;  %3266 = vmatprep.subr.bf16.mxu0 %v7323_v1 }
 0x30b   : > { %3228 = vmatpush2.bf16.msra.mxu1 %v7261_v60  ;;  %3267 = vmatpush2.bf16.msra.mxu0 %v7321_v35  ;;  %v7353_v60 = vld [vmem:[%s11623_s3 + $0xac] ss:$16 sps:$4 sm:$0xff]   ;;  %v7351_v35 = vld [vmem:[%s11623_s3 + $0xa8] ss:$16 sps:$4 sm:$0xff]  }
 0x30c   : > { %3283 = vmatprep.subr.bf16.mxu1 %v7290_v50  ;;  %3268 = vmatprep.subr.bf16.mxu0 %v7329_v24  ;;  %v7354_v50 = vld [vmem:[%s11623_s3 + $0x288] ss:$16 sps:$4 sm:$0xff]  }
 0x30d   : > { %v7357_v24 = vld [vmem:[%s11623_s3 + $0x88] ss:$16 sps:$4 sm:$0xff]  }
 0x30e   : > { %3230 = vmatmul.mubr.bf16.vlgmr.msra.gmra.mxu1 %v8709_v46 }
 0x30f   : > { %3284 = vmatpush1.bf16.msra.mxu1 %v7288_v25  ;;  %3269 = vmatpush2.bf16.msra.mxu0 %v7327_v33  ;;  %v7365_v25 = vld [vmem:[%s11623_s3 + $0x6c] ss:$16 sps:$4 sm:$0xff]   ;;  %v7360_v33 = vld [vmem:[%s11623_s3 + $0x268] ss:$16 sps:$4 sm:$0xff]  }
 0x310   : > { %3285 = vmatprep.subr.bf16.mxu1 %v7296_v58  ;;  %3270 = vmatprep.subr.bf16.mxu0 %v7335_v16  ;;  %v7363_v58 = vld [vmem:[%s11623_s3 + $0x68] ss:$16 sps:$4 sm:$0xff]   ;;  %v7368_v16 = vld [vmem:[%s11623_s3 + $0x24c] ss:$16 sps:$4 sm:$0xff]  }
 0x311   : > { %3315 = vmatprep.mubr.bf16.mxu1 %v11583_v4 }
 0x313   : > { %3286 = vmatpush1.bf16.msra.mxu1 %v7294_v49  ;;  %3271 = vmatpush2.bf16.msra.mxu0 %v7333_v55  ;;  %v7371_v49 = vld [vmem:[%s11623_s3 + $0x4c] ss:$16 sps:$4 sm:$0xff]   ;;  %v7366_v55 = vld [vmem:[%s11623_s3 + $0x248] ss:$16 sps:$4 sm:$0xff]  }
 0x314   : > { %3287 = vmatprep.subr.bf16.mxu1 %v7302_v9  ;;  %3326 = vmatprep.subr.bf16.mxu0 %v7341_v44  ;;  %v7369_v9 = vld [vmem:[%s11623_s3 + $0x48] ss:$16 sps:$4 sm:$0xff]   ;;  %v7374_v44 = vld [vmem:[%s11623_s3 + $0x22c] ss:$16 sps:$4 sm:$0xff]  }
 0x317   : > { %3288 = vmatpush1.bf16.msra.mxu1 %v7300_v2  ;;  %v7377_v2 = vld [vmem:[%s11623_s3 + $0x2c] ss:$16 sps:$4 sm:$0xff]  }
 0x318   : > { %3289 = vmatprep.subr.bf16.mxu1 %v7308_v27  ;;  %v7372_v27 = vld [vmem:[%s11623_s3 + $0x228] ss:$16 sps:$4 sm:$0xff]  }
 0x31b   : > { %3290 = vmatpush1.bf16.msra.mxu1 %v7306_v13  ;;  %v7375_v13 = vld [vmem:[%s11623_s3 + $0x28] ss:$16 sps:$4 sm:$0xff]  }
 0x31c   : > { %3291 = vmatprep.subr.bf16.mxu1 %v7314_v5  ;;  %v7380_v5 = vld [vmem:[%s11623_s3 + $0x20c] ss:$16 sps:$4 sm:$0xff]  }
 0x31f   : > { %3292 = vmatpush1.bf16.msra.mxu1 %v7312_v61  ;;  %v7383_v61 = vld [vmem:[%s11623_s3 + $0xc] ss:$16 sps:$4 sm:$0xff]  }
 0x320   : > { %3293 = vmatprep.subr.bf16.mxu1 %v7320_v7  ;;  %v7378_v7 = vld [vmem:[%s11623_s3 + $0x208] ss:$16 sps:$4 sm:$0xff]  }
 0x323   : > { %3294 = vmatpush1.bf16.msra.mxu1 %v7318_v34  ;;  %v7381_v34 = vld [vmem:[%s11623_s3 + $0x8] ss:$16 sps:$4 sm:$0xff]  }
 0x324   : > { %3295 = vmatprep.subr.bf16.mxu1 %v7326_v22  ;;  %v7386_v22 = vld [vmem:[%s11623_s3 + $0x3ec] ss:$16 sps:$4 sm:$0xff]  }
 0x327   : > { %3296 = vmatpush1.bf16.msra.mxu1 %v7324_v37  ;;  %v7389_v37 = vld [vmem:[%s11623_s3 + $0x1ec] ss:$16 sps:$4 sm:$0xff]  }
 0x328   : > { %3297 = vmatprep.subr.bf16.mxu1 %v7332_v42  ;;  %v7384_v42 = vld [vmem:[%s11623_s3 + $0x3e8] ss:$16 sps:$4 sm:$0xff]  }
 0x32b   : > { %3298 = vmatpush1.bf16.msra.mxu1 %v7330_v19  ;;  %v7387_v19 = vld [vmem:[%s11623_s3 + $0x1e8] ss:$16 sps:$4 sm:$0xff]  }
 0x32c   : > { %3369 = vmatprep.subr.bf16.mxu1 %v7338_v31  ;;  %v7392_v31 = vld [vmem:[%s11623_s3 + $0x3cc] ss:$16 sps:$4 sm:$0xff]  }
 0x344   : > { %v7026_v43 = vpop.permute.xlu0 %7025 }
 0x345   : > { %v7028_v52 = vunpack.i.h.bf16 %v7026_v43  ;;  %v7027_v36 = vunpack.i.l.bf16 %v7026_v43  ;;  %v7395_v43 = vld [vmem:[%s11623_s3 + $0x1cc] ss:$16 sps:$4 sm:$0xff]  }
 0x347   : > { %v1326_v63 = vsel %vm421_vm4, %v7018_v38, %v7027_v36  ;;  %v1327_v6 = vsel %vm421_vm4, %v7027_v36, %v7028_v52  ;;  %v7393_v36 = vld [vmem:[%s11623_s3 + $0x1c8] ss:$16 sps:$4 sm:$0xff]  }
 0x348   : > { %v7036_v56 = vpop.permute.xlu0 %7035  ;;  %v7031_v59 = vpop.permute.xlu1 %7030  ;;  %v1362_v21 = vmax.f32 %v8382_v28, %v1326_v63  ;;  %v1363_v39 = vmax.f32 %v8456_v57, %v1327_v6  ;;  %v7336_v57 = vld [vmem:[%s11623_s3 + $0x2e8] ss:$16 sps:$4 sm:$0xff]   ;;  %v7398_v63 = vld [vmem:[%s11623_s3 + $0x3ac] ss:$16 sps:$4 sm:$0xff]  }
 0x349   : > { %v7038_v8 = vunpack.i.h.bf16 %v7036_v56  ;;  %v7037_v14 = vunpack.i.l.bf16 %v7036_v56  ;;  %v7033_v18 = vunpack.i.h.bf16 %v7031_v59  ;;  %v7032_v32 = vunpack.i.l.bf16 %v7031_v59  ;;  %v7401_v6 = vld [vmem:[%s11623_s3 + $0x1ac] ss:$16 sps:$4 sm:$0xff]   ;;  %v7396_v56 = vld [vmem:[%s11623_s3 + $0x3a8] ss:$16 sps:$4 sm:$0xff]  }
 0x34a   : > { %v7399_v59 = vld [vmem:[%s11623_s3 + $0x1a8] ss:$16 sps:$4 sm:$0xff]  }
 0x34b   : > { %v1328_v41 = vsel %vm421_vm4, %v7028_v52, %v7037_v14  ;;  %v1337_v3 = vsel %vm421_vm4, %v7033_v18, %v7038_v8  ;;  %v1335_v62 = vsel %vm421_vm4, %v7023_v23, %v7032_v32  ;;  %v1336_v38 = vsel %vm421_vm4, %v7032_v32, %v7033_v18  ;;  %v7390_v52 = vld [vmem:[%s11623_s3 + $0x3c8] ss:$16 sps:$4 sm:$0xff]   ;;  %v7404_v8 = vld [vmem:[%s11623_s3 + $0x38c] ss:$16 sps:$4 sm:$0xff]  }
 0x34c   : > { %v1364_v0 = vmax.f32 %v8460_v12, %v1328_v41  ;;  %v1373_v47 = vmax.f32 %v8498_v48, %v1337_v3  ;;  %v1371_v45 = vmax.f32 %v8403_v10, %v1335_v62  ;;  %v1372_v28 = vmax.f32 %v8494_v29, %v1336_v38  ;;  %v7344_v10 = vld [vmem:[%s11623_s3 + $0x2cc] ss:$16 sps:$4 sm:$0xff]   ;;  %v7342_v29 = vld [vmem:[%s11623_s3 + $0x2c8] ss:$16 sps:$4 sm:$0xff]  }
 0x34d   : > { %v7347_v12 = vld [vmem:[%s11623_s3 + $0xcc] ss:$16 sps:$4 sm:$0xff]   ;;  %v7345_v48 = vld [vmem:[%s11623_s3 + $0xc8] ss:$16 sps:$4 sm:$0xff]   ;;  %vm3543_vm4 = vcmask 490496  }
 0x34e   : > { %v8786_v1 = vpack.c.bf16 %v1372_v28, %v1363_v39  ;;  %v8788_v51 = vpack.c.bf16 %v1373_v47, %v1364_v0  ;;  %v8793_v23 = vpack.c.bf16 %v1371_v45, %v1362_v21  ;;  %v7407_v14 = vld [vmem:[%s11623_s3 + $0x18c] ss:$16 sps:$4 sm:$0xff]   ;;  %v7402_v18 = vld [vmem:[%s11623_s3 + $0x388] ss:$16 sps:$4 sm:$0xff]  }
 0x34f   : > { %v7405_v32 = vld [vmem:[%s11623_s3 + $0x188] ss:$16 sps:$4 sm:$0xff]   ;;  %v7410_v21 = vld [vmem:[%s11623_s3 + $0x36c] ss:$16 sps:$4 sm:$0xff]  }
 0x350   : > { %3272 = vmatprep.mubr.bf16.mxu0 %v8786_v1  ;;  %3316 = vmatmul.mubr.bf16.vlgmr.msra.gmra.mxu1 %v8788_v51  ;;  %v7413_v39 = vld [vmem:[%s11623_s3 + $0x16c] ss:$16 sps:$4 sm:$0xff]   ;;  %v7408_v41 = vld [vmem:[%s11623_s3 + $0x368] ss:$16 sps:$4 sm:$0xff]  }
 0x351   : > { %3370 = vmatpush1.bf16.msra.mxu1 %v7336_v57  ;;  %3273 = vmatmul.mubr.bf16.vlgmr.msra.gmra.mxu0 %v8793_v23  ;;  %v7411_v3 = vld [vmem:[%s11623_s3 + $0x168] ss:$16 sps:$4 sm:$0xff]   ;;  %v7416_v62 = vld [vmem:[%s11623_s3 + $0x34c] ss:$16 sps:$4 sm:$0xff]  }
 0x352   : > { %3327 = vmatpush1.bf16.msra.mxu0 %v7339_v15  ;;  %3401 = vmatprep.mubr.bf16.mxu1 %v8490_v30  ;;  %v7348_v30 = vld [vmem:[%s11623_s3 + $0x2a8] ss:$16 sps:$4 sm:$0xff]   ;;  %v7419_v38 = vld [vmem:[%s11623_s3 + $0x14c] ss:$16 sps:$4 sm:$0xff]  }
 0x353   : > { %3358 = vmatprep.mubr.bf16.mxu0 %v8421_v26  ;;  %3371 = vmatprep.subr.bf16.mxu1 %v7344_v10  ;;  %v7356_v26 = vld [vmem:[%s11623_s3 + $0x28c] ss:$16 sps:$4 sm:$0xff]   ;;  %v7414_v0 = vld [vmem:[%s11623_s3 + $0x348] ss:$16 sps:$4 sm:$0xff]  }
 0x354   : > { %3328 = vmatprep.subr.bf16.mxu0 %v7347_v12  ;;  %v7417_v47 = vld [vmem:[%s11623_s3 + $0x148] ss:$16 sps:$4 sm:$0xff]   ;;  %v7422_v45 = vld [vmem:[%s11623_s3 + $0x32c] ss:$16 sps:$4 sm:$0xff]  }
 0x355   : > { %3372 = vmatpush1.bf16.msra.mxu1 %v7342_v29  ;;  %v7425_v28 = vld [vmem:[%s11623_s3 + $0x12c] ss:$16 sps:$4 sm:$0xff]   ;;  %v7420_v57 = vld [vmem:[%s11623_s3 + $0x328] ss:$16 sps:$4 sm:$0xff]  }
 0x356   : > { %3329 = vmatpush1.bf16.msra.mxu0 %v7345_v48  ;;  %3373 = vmatprep.subr.bf16.mxu1 %v7350_v20  ;;  %v7423_v15 = vld [vmem:[%s11623_s3 + $0x128] ss:$16 sps:$4 sm:$0xff]   ;;  %v7428_v10 = vld [vmem:[%s11623_s3 + $0x30c] ss:$16 sps:$4 sm:$0xff]  }
 0x357   : > { %3330 = vmatprep.subr.bf16.mxu0 %v7353_v60  ;;  %v7431_v12 = vld [vmem:[%s11623_s3 + $0x10c] ss:$16 sps:$4 sm:$0xff]   ;;  %v7426_v29 = vld [vmem:[%s11623_s3 + $0x308] ss:$16 sps:$4 sm:$0xff]  }
 0x358   : > { %v7429_v48 = vld [vmem:[%s11623_s3 + $0x108] ss:$16 sps:$4 sm:$0xff]   ;;  %v7434_v20 = vld [vmem:[%s11623_s3 + $0x6ec] ss:$16 sps:$4 sm:$0xff]  }
 0x359   : > { %3374 = vmatpush1.bf16.msra.mxu1 %v7348_v30  ;;  %v7437_v60 = vld [vmem:[%s11623_s3 + $0x4ec] ss:$16 sps:$4 sm:$0xff]   ;;  %v7432_v30 = vld [vmem:[%s11623_s3 + $0x6e8] ss:$16 sps:$4 sm:$0xff]  }
 0x35a   : > { %3331 = vmatpush1.bf16.msra.mxu0 %v7351_v35  ;;  %3375 = vmatprep.subr.bf16.mxu1 %v7356_v26  ;;  %v7435_v35 = vld [vmem:[%s11623_s3 + $0x4e8] ss:$16 sps:$4 sm:$0xff]   ;;  %v7440_v26 = vld [vmem:[%s11623_s3 + $0x6cc] ss:$16 sps:$4 sm:$0xff]  }
 0x35b   : > { %3332 = vmatprep.subr.bf16.mxu0 %v7359_v11  ;;  %v7443_v11 = vld [vmem:[%s11623_s3 + $0x4cc] ss:$16 sps:$4 sm:$0xff]  }
 0x35d   : > { %3376 = vmatpush1.bf16.msra.mxu1 %v7354_v50  ;;  %v7438_v50 = vld [vmem:[%s11623_s3 + $0x6c8] ss:$16 sps:$4 sm:$0xff]  }
 0x35e   : > { %3333 = vmatpush1.bf16.msra.mxu0 %v7357_v24  ;;  %3377 = vmatprep.subr.bf16.mxu1 %v7362_v54  ;;  %v7441_v24 = vld [vmem:[%s11623_s3 + $0x4c8] ss:$16 sps:$4 sm:$0xff]  }
 0x35f   : > { %3334 = vmatprep.subr.bf16.mxu0 %v7365_v25  ;;  %v7447_v54 = vld [vmem:[%s11623_s3 + $0x4a8] ss:$16 sps:$4 sm:$0xff]   ;;  %v7455_v25 = vld [vmem:[%s11623_s3 + $0x48c] ss:$16 sps:$4 sm:$0xff]  }
 0x361   : > { %3378 = vmatpush1.bf16.msra.mxu1 %v7360_v33  ;;  %v7450_v33 = vld [vmem:[%s11623_s3 + $0x688] ss:$16 sps:$4 sm:$0xff]  }
 0x362   : > { %3335 = vmatpush1.bf16.msra.mxu0 %v7363_v58  ;;  %3379 = vmatprep.subr.bf16.mxu1 %v7368_v16  ;;  %v7453_v58 = vld [vmem:[%s11623_s3 + $0x488] ss:$16 sps:$4 sm:$0xff]   ;;  %v7458_v16 = vld [vmem:[%s11623_s3 + $0x66c] ss:$16 sps:$4 sm:$0xff]  }
 0x363   : > { %3336 = vmatprep.subr.bf16.mxu0 %v7371_v49  ;;  %v7461_v49 = vld [vmem:[%s11623_s3 + $0x46c] ss:$16 sps:$4 sm:$0xff]  }
 0x365   : > { %3380 = vmatpush1.bf16.msra.mxu1 %v7366_v55  ;;  %v7456_v55 = vld [vmem:[%s11623_s3 + $0x668] ss:$16 sps:$4 sm:$0xff]  }
 0x366   : > { %3337 = vmatpush1.bf16.msra.mxu0 %v7369_v9  ;;  %3381 = vmatprep.subr.bf16.mxu1 %v7374_v44  ;;  %v7459_v9 = vld [vmem:[%s11623_s3 + $0x468] ss:$16 sps:$4 sm:$0xff]   ;;  %v7464_v44 = vld [vmem:[%s11623_s3 + $0x64c] ss:$16 sps:$4 sm:$0xff]  }
 0x367   : > { %3338 = vmatprep.subr.bf16.mxu0 %v7377_v2  ;;  %v7467_v2 = vld [vmem:[%s11623_s3 + $0x44c] ss:$16 sps:$4 sm:$0xff]  }
 0x369   : > { %3382 = vmatpush1.bf16.msra.mxu1 %v7372_v27  ;;  %v7462_v27 = vld [vmem:[%s11623_s3 + $0x648] ss:$16 sps:$4 sm:$0xff]  }
 0x36a   : > { %3339 = vmatpush1.bf16.msra.mxu0 %v7375_v13  ;;  %3383 = vmatprep.subr.bf16.mxu1 %v7380_v5  ;;  %v7465_v13 = vld [vmem:[%s11623_s3 + $0x448] ss:$16 sps:$4 sm:$0xff]   ;;  %v7470_v5 = vld [vmem:[%s11623_s3 + $0x62c] ss:$16 sps:$4 sm:$0xff]  }
 0x36b   : > { %3340 = vmatprep.subr.bf16.mxu0 %v7383_v61  ;;  %v7473_v61 = vld [vmem:[%s11623_s3 + $0x42c] ss:$16 sps:$4 sm:$0xff]  }
 0x36d   : > { %3384 = vmatpush1.bf16.msra.mxu1 %v7378_v7  ;;  %v7468_v7 = vld [vmem:[%s11623_s3 + $0x628] ss:$16 sps:$4 sm:$0xff]  }
 0x36e   : > { %3341 = vmatpush1.bf16.msra.mxu0 %v7381_v34  ;;  %3385 = vmatprep.subr.bf16.mxu1 %v7386_v22  ;;  %v7471_v34 = vld [vmem:[%s11623_s3 + $0x428] ss:$16 sps:$4 sm:$0xff]   ;;  %v7476_v22 = vld [vmem:[%s11623_s3 + $0x60c] ss:$16 sps:$4 sm:$0xff]  }
 0x36f   : > { %3342 = vmatprep.subr.bf16.mxu0 %v7389_v37  ;;  %v7479_v37 = vld [vmem:[%s11623_s3 + $0x40c] ss:$16 sps:$4 sm:$0xff]  }
 0x371   : > { %3386 = vmatpush2.bf16.msra.mxu1 %v7384_v42  ;;  %v7474_v42 = vld [vmem:[%s11623_s3 + $0x608] ss:$16 sps:$4 sm:$0xff]  }
 0x372   : > { %3343 = vmatpush2.bf16.msra.mxu0 %v7387_v19  ;;  %3387 = vmatprep.subr.bf16.mxu1 %v7392_v31  ;;  %v7477_v19 = vld [vmem:[%s11623_s3 + $0x408] ss:$16 sps:$4 sm:$0xff]   ;;  %v7482_v31 = vld [vmem:[%s11623_s3 + $0x7ec] ss:$16 sps:$4 sm:$0xff]  }
 0x373   : > { %3344 = vmatprep.subr.bf16.mxu0 %v7395_v43  ;;  %v7485_v43 = vld [vmem:[%s11623_s3 + $0x5ec] ss:$16 sps:$4 sm:$0xff]  }
 0x375   : > { %3388 = vmatpush2.bf16.msra.mxu1 %v7390_v52  ;;  %v7480_v52 = vld [vmem:[%s11623_s3 + $0x7e8] ss:$16 sps:$4 sm:$0xff]  }
 0x376   : > { %3345 = vmatpush2.bf16.msra.mxu0 %v7393_v36  ;;  %3389 = vmatprep.subr.bf16.mxu1 %v7398_v63  ;;  %v7483_v36 = vld [vmem:[%s11623_s3 + $0x5e8] ss:$16 sps:$4 sm:$0xff]   ;;  %v7488_v63 = vld [vmem:[%s11623_s3 + $0x7cc] ss:$16 sps:$4 sm:$0xff]  }
 0x377   : > { %3346 = vmatprep.subr.bf16.mxu0 %v7401_v6  ;;  %v7491_v6 = vld [vmem:[%s11623_s3 + $0x5cc] ss:$16 sps:$4 sm:$0xff]  }
 0x379   : > { %3390 = vmatpush2.bf16.msra.mxu1 %v7396_v56  ;;  %v7486_v56 = vld [vmem:[%s11623_s3 + $0x7c8] ss:$16 sps:$4 sm:$0xff]  }
 0x37a   : > { %3347 = vmatpush2.bf16.msra.mxu0 %v7399_v59  ;;  %3391 = vmatprep.subr.bf16.mxu1 %v7404_v8  ;;  %v7489_v59 = vld [vmem:[%s11623_s3 + $0x5c8] ss:$16 sps:$4 sm:$0xff]   ;;  %v7494_v8 = vld [vmem:[%s11623_s3 + $0x7ac] ss:$16 sps:$4 sm:$0xff]  }
 0x37b   : > { %3348 = vmatprep.subr.bf16.mxu0 %v7407_v14  ;;  %v7497_v14 = vld [vmem:[%s11623_s3 + $0x5ac] ss:$16 sps:$4 sm:$0xff]  }
 0x37d   : > { %3392 = vmatpush2.bf16.msra.mxu1 %v7402_v18  ;;  %v7492_v18 = vld [vmem:[%s11623_s3 + $0x7a8] ss:$16 sps:$4 sm:$0xff]  }
 0x37e   : > { %3349 = vmatpush2.bf16.msra.mxu0 %v7405_v32  ;;  %3393 = vmatprep.subr.bf16.mxu1 %v7410_v21  ;;  %v7495_v32 = vld [vmem:[%s11623_s3 + $0x5a8] ss:$16 sps:$4 sm:$0xff]   ;;  %v7500_v21 = vld [vmem:[%s11623_s3 + $0x78c] ss:$16 sps:$4 sm:$0xff]  }
 0x37f   : > { %3350 = vmatprep.subr.bf16.mxu0 %v7413_v39  ;;  %v7503_v39 = vld [vmem:[%s11623_s3 + $0x58c] ss:$16 sps:$4 sm:$0xff]  }
 0x381   : > { %3394 = vmatpush2.bf16.msra.mxu1 %v7408_v41  ;;  %v7498_v41 = vld [vmem:[%s11623_s3 + $0x788] ss:$16 sps:$4 sm:$0xff]  }
 0x382   : > { %3351 = vmatpush2.bf16.msra.mxu0 %v7411_v3  ;;  %3395 = vmatprep.subr.bf16.mxu1 %v7416_v62  ;;  %v7501_v3 = vld [vmem:[%s11623_s3 + $0x588] ss:$16 sps:$4 sm:$0xff]   ;;  %v7506_v62 = vld [vmem:[%s11623_s3 + $0x76c] ss:$16 sps:$4 sm:$0xff]  }
 0x383   : > { %3352 = vmatprep.subr.bf16.mxu0 %v7419_v38  ;;  %v7509_v38 = vld [vmem:[%s11623_s3 + $0x56c] ss:$16 sps:$4 sm:$0xff]  }
 0x385   : > { %3396 = vmatpush2.bf16.msra.mxu1 %v7414_v0  ;;  %v7504_v0 = vld [vmem:[%s11623_s3 + $0x768] ss:$16 sps:$4 sm:$0xff]  }
 0x386   : > { %3353 = vmatpush2.bf16.msra.mxu0 %v7417_v47  ;;  %3397 = vmatprep.subr.bf16.mxu1 %v7422_v45  ;;  %v7507_v47 = vld [vmem:[%s11623_s3 + $0x568] ss:$16 sps:$4 sm:$0xff]   ;;  %v7512_v45 = vld [vmem:[%s11623_s3 + $0x74c] ss:$16 sps:$4 sm:$0xff]  }
 0x387   : > { %3354 = vmatprep.subr.bf16.mxu0 %v7425_v28  ;;  %v7515_v28 = vld [vmem:[%s11623_s3 + $0x54c] ss:$16 sps:$4 sm:$0xff]  }
 0x389   : > { %3398 = vmatpush2.bf16.msra.mxu1 %v7420_v57  ;;  %v7510_v57 = vld [vmem:[%s11623_s3 + $0x748] ss:$16 sps:$4 sm:$0xff]  }
 0x38a   : > { %3355 = vmatpush2.bf16.msra.mxu0 %v7423_v15  ;;  %3399 = vmatprep.subr.bf16.mxu1 %v7428_v10  ;;  %v7513_v15 = vld [vmem:[%s11623_s3 + $0x548] ss:$16 sps:$4 sm:$0xff]   ;;  %v7518_v10 = vld [vmem:[%s11623_s3 + $0x72c] ss:$16 sps:$4 sm:$0xff]  }
 0x38b   : > { %3356 = vmatprep.subr.bf16.mxu0 %v7431_v12  ;;  %v7521_v12 = vld [vmem:[%s11623_s3 + $0x52c] ss:$16 sps:$4 sm:$0xff]  }
 0x38d   : > { %3400 = vmatpush2.bf16.msra.mxu1 %v7426_v29  ;;  %v7516_v29 = vld [vmem:[%s11623_s3 + $0x728] ss:$16 sps:$4 sm:$0xff]  }
 0x38e   : > { %3357 = vmatpush2.bf16.msra.mxu0 %v7429_v48  ;;  %3455 = vmatprep.subr.bf16.mxu1 %v7434_v20  ;;  %v7519_v48 = vld [vmem:[%s11623_s3 + $0x528] ss:$16 sps:$4 sm:$0xff]   ;;  %v7524_v20 = vld [vmem:[%s11623_s3 + $0x70c] ss:$16 sps:$4 sm:$0xff]  }
 0x38f   : > { %3412 = vmatprep.subr.bf16.mxu0 %v7437_v60  ;;  %v7527_v60 = vld [vmem:[%s11623_s3 + $0x50c] ss:$16 sps:$4 sm:$0xff]  }
 0x390   : > { %3402 = vmatmul.mubr.bf16.vlgmr.msra.gmra.mxu1 %v8481_v17  ;;  %v7446_v17 = vld [vmem:[%s11623_s3 + $0x6ac] ss:$16 sps:$4 sm:$0xff]  }
 0x391   : > { %3359 = vmatmul.mubr.bf16.vlgmr.msra.gmra.mxu0 %v8436_v53  ;;  %3456 = vmatpush1.bf16.msra.mxu1 %v7432_v30  ;;  %v7449_v53 = vld [vmem:[%s11623_s3 + $0x4ac] ss:$16 sps:$4 sm:$0xff]   ;;  %v7522_v30 = vld [vmem:[%s11623_s3 + $0x708] ss:$16 sps:$4 sm:$0xff]  }
 0x392   : > { %3487 = vmatprep.mubr.bf16.mxu1 %v8786_v1  ;;  %3413 = vmatpush1.bf16.msra.mxu0 %v7435_v35  ;;  %v7444_v1 = vld [vmem:[%s11623_s3 + $0x6a8] ss:$16 sps:$4 sm:$0xff]  }
 0x393   : > { %3444 = vmatprep.mubr.bf16.mxu0 %v8538_v40  ;;  %3457 = vmatprep.subr.bf16.mxu1 %v7440_v26  ;;  %v7452_v40 = vld [vmem:[%s11623_s3 + $0x68c] ss:$16 sps:$4 sm:$0xff]   ;;  %v7525_v35 = vld [vmem:[%s11623_s3 + $0x508] ss:$16 sps:$4 sm:$0xff]  }
 0x394   : > { %3414 = vmatprep.subr.bf16.mxu0 %v7443_v11  ;;  %v7530_v26 = vld [vmem:[%s11623_s3 + $0x8ec] ss:$16 sps:$4 sm:$0xff]   ;;  %v7528_v11 = vld [vmem:[%s11623_s3 + $0x8e8] ss:$16 sps:$4 sm:$0xff]  }
 0x395   : > { %3458 = vmatpush1.bf16.msra.mxu1 %v7438_v50  ;;  %v7533_v50 = vld [vmem:[%s11623_s3 + $0x8cc] ss:$16 sps:$4 sm:$0xff]  }
 0x396   : > { %3415 = vmatpush1.bf16.msra.mxu0 %v7441_v24  ;;  %3459 = vmatprep.subr.bf16.mxu1 %v7446_v17  ;;  %v7531_v24 = vld [vmem:[%s11623_s3 + $0x8c8] ss:$16 sps:$4 sm:$0xff]   ;;  %v7536_v17 = vld [vmem:[%s11623_s3 + $0x8ac] ss:$16 sps:$4 sm:$0xff]  }
 0x397   : > { %3416 = vmatprep.subr.bf16.mxu0 %v7449_v53  ;;  %v7534_v53 = vld [vmem:[%s11623_s3 + $0x8a8] ss:$16 sps:$4 sm:$0xff]  }
 0x399   : > { %3460 = vmatpush1.bf16.msra.mxu1 %v7444_v1  ;;  %v7542_v1 = vld [vmem:[%s11623_s3 + $0x86c] ss:$16 sps:$4 sm:$0xff]  }
 0x39a   : > { %3417 = vmatpush1.bf16.msra.mxu0 %v7447_v54  ;;  %3461 = vmatprep.subr.bf16.mxu1 %v7452_v40  ;;  %v7540_v54 = vld [vmem:[%s11623_s3 + $0x868] ss:$16 sps:$4 sm:$0xff]   ;;  %v7545_v40 = vld [vmem:[%s11623_s3 + $0x84c] ss:$16 sps:$4 sm:$0xff]  }
 0x39b   : > { %3418 = vmatprep.subr.bf16.mxu0 %v7455_v25  ;;  %v7543_v25 = vld [vmem:[%s11623_s3 + $0x848] ss:$16 sps:$4 sm:$0xff]  }
 0x39d   : > { %3462 = vmatpush1.bf16.msra.mxu1 %v7450_v33  ;;  %v7548_v33 = vld [vmem:[%s11623_s3 + $0x82c] ss:$16 sps:$4 sm:$0xff]  }
 0x39e   : > { %3419 = vmatpush1.bf16.msra.mxu0 %v7453_v58  ;;  %3463 = vmatprep.subr.bf16.mxu1 %v7458_v16  ;;  %v7546_v58 = vld [vmem:[%s11623_s3 + $0x828] ss:$16 sps:$4 sm:$0xff]   ;;  %v7551_v16 = vld [vmem:[%s11623_s3 + $0x80c] ss:$16 sps:$4 sm:$0xff]  }
 0x39f   : > { %3420 = vmatprep.subr.bf16.mxu0 %v7461_v49  ;;  %v7549_v49 = vld [vmem:[%s11623_s3 + $0x808] ss:$16 sps:$4 sm:$0xff]  }
 0x3a1   : > { %3464 = vmatpush1.bf16.msra.mxu1 %v7456_v55  ;;  %v3145_v55 = vpop.f32.mrf.mxu1 }
 0x3a2   : > { %3421 = vmatpush1.bf16.msra.mxu0 %v7459_v9  ;;  %3465 = vmatprep.subr.bf16.mxu1 %v7464_v44 }
 0x3a3   : > { %3422 = vmatprep.subr.bf16.mxu0 %v7467_v2  ;;  %v3147_v9 = vpop.f32.mrf.mxu1 }
 0x3a5   : > { %3466 = vmatpush1.bf16.msra.mxu1 %v7462_v27  ;;  %v3149_v44 = vpop.f32.mrf.mxu1 }
 0x3a6   : > { %3423 = vmatpush1.bf16.msra.mxu0 %v7465_v13  ;;  %3467 = vmatprep.subr.bf16.mxu1 %v7470_v5  ;;  %v3188_v13 = vpop.f32.mrf.mxu0 }
 0x3a7   : > { %3424 = vmatprep.subr.bf16.mxu0 %v7473_v61  ;;  %v3151_v2 = vpop.f32.mrf.mxu1 }
 0x3a8   : > { %v3190_v61 = vpop.f32.mrf.mxu0 }
 0x3a9   : > { %3468 = vmatpush1.bf16.msra.mxu1 %v7468_v7 }
 0x3aa   : > { %3425 = vmatpush1.bf16.msra.mxu0 %v7471_v34  ;;  %3469 = vmatprep.subr.bf16.mxu1 %v7476_v22  ;;  %v3192_v34 = vpop.f32.mrf.mxu0  ;;  %v3189_v22 = vadd.f32 %v3188_v13, %v3145_v55 }
 0x3ab   : > { %3426 = vmatprep.subr.bf16.mxu0 %v7479_v37 }
 0x3ad   : > { %3470 = vmatpush1.bf16.msra.mxu1 %v7474_v42  ;;  %v3194_v42 = vpop.f32.mrf.mxu0 }
 0x3ae   : > { %3427 = vmatpush1.bf16.msra.mxu0 %v7477_v19  ;;  %3471 = vmatprep.subr.bf16.mxu1 %v7482_v31  ;;  %v3191_v19 = vadd.f32 %v3190_v61, %v3147_v9 }
 0x3af   : > { %3428 = vmatprep.subr.bf16.mxu0 %v7485_v43 }
 0x3b1   : > { %3472 = vmatpush2.bf16.msra.mxu1 %v7480_v52 }
 0x3b2   : > { %3429 = vmatpush2.bf16.msra.mxu0 %v7483_v36  ;;  %3473 = vmatprep.subr.bf16.mxu1 %v7488_v63  ;;  %v3193_v36 = vadd.f32 %v3192_v34, %v3149_v44 }
 0x3b3   : > { %3430 = vmatprep.subr.bf16.mxu0 %v7491_v6 }
 0x3b5   : > { %3474 = vmatpush2.bf16.msra.mxu1 %v7486_v56 }
 0x3b6   : > { %3431 = vmatpush2.bf16.msra.mxu0 %v7489_v59  ;;  %3475 = vmatprep.subr.bf16.mxu1 %v7494_v8  ;;  %v3195_v59 = vadd.f32 %v3194_v42, %v3151_v2 }
 0x3b7   : > { %3432 = vmatprep.subr.bf16.mxu0 %v7497_v14 }
 0x3b9   : > { %3476 = vmatpush2.bf16.msra.mxu1 %v7492_v18 }
 0x3ba   : > { %3433 = vmatpush2.bf16.msra.mxu0 %v7495_v32  ;;  %3477 = vmatprep.subr.bf16.mxu1 %v7500_v21 }
 0x3bb   : > { %3434 = vmatprep.subr.bf16.mxu0 %v7503_v39 }
 0x3bd   : > { %3478 = vmatpush2.bf16.msra.mxu1 %v7498_v41 }
 0x3be   : > { %3435 = vmatpush2.bf16.msra.mxu0 %v7501_v3  ;;  %3479 = vmatprep.subr.bf16.mxu1 %v7506_v62 }
 0x3bf   : > { %3436 = vmatprep.subr.bf16.mxu0 %v7509_v38 }
 0x3c1   : > { %3480 = vmatpush2.bf16.msra.mxu1 %v7504_v0 }
 0x3c2   : > { %3437 = vmatpush2.bf16.msra.mxu0 %v7507_v47  ;;  %3481 = vmatprep.subr.bf16.mxu1 %v7512_v45 }
 0x3c3   : > { %3438 = vmatprep.subr.bf16.mxu0 %v7515_v28 }
 0x3c5   : > { %3482 = vmatpush2.bf16.msra.mxu1 %v7510_v57 }
 0x3c6   : > { %3439 = vmatpush2.bf16.msra.mxu0 %v7513_v15  ;;  %3483 = vmatprep.subr.bf16.mxu1 %v7518_v10 }
 0x3c7   : > { %3440 = vmatprep.subr.bf16.mxu0 %v7521_v12 }
 0x3c9   : > { %3484 = vmatpush2.bf16.msra.mxu1 %v7516_v29 }
 0x3ca   : > { %3441 = vmatpush2.bf16.msra.mxu0 %v7519_v48  ;;  %3485 = vmatprep.subr.bf16.mxu1 %v7524_v20 }
 0x3cb   : > { %3442 = vmatprep.subr.bf16.mxu0 %v7527_v60 }
 0x3cd   : > { %3486 = vmatpush2.bf16.msra.mxu1 %v7522_v30 }
 0x3ce   : > { %3443 = vmatpush2.bf16.msra.mxu0 %v7525_v35  ;;  %v3231_v27 = vpop.f32.mrf.mxu1 }
 0x3cf   : > { %3498 = vmatprep.subr.bf16.mxu0 %v7530_v26  ;;  %v3232_v31 = vadd.f32 %v3231_v27, %v3189_v22 }
 0x3d0   : > { %3488 = vmatmul.mubr.bf16.vlgmr.msra.gmra.mxu1 %v8793_v23  ;;  %v7537_v23 = vld [vmem:[%s11623_s3 + $0x888] ss:$16 sps:$4 sm:$0xff]   ;;  %v3233_v5 = vpop.f32.mrf.mxu1 }
 0x3d1   : > { %3445 = vmatmul.mubr.bf16.vlgmr.msra.gmra.mxu0 %v8709_v46  ;;  %v7539_v46 = vld [vmem:[%s11623_s3 + $0x88c] ss:$16 sps:$4 sm:$0xff]   ;;  %v3234_v63 = vadd.f32 %v3233_v5, %v3191_v19  ;;  %s11639_s3 = smov 87  }
 0x3d2   : > { %3499 = vmatpush1.bf16.msra.mxu0 %v7528_v11  ;;  %3530 = vmatprep.mubr.bf16.mxu0 %v11583_v4  ;;  %v3235_v7 = vpop.f32.mrf.mxu1 }
 0x3d3   : > { %3500 = vmatprep.subr.bf16.mxu0 %v7533_v50  ;;  %v3236_v8 = vadd.f32 %v3235_v7, %v3193_v36 }
 0x3d4   : > { %v3237_v37 = vpop.f32.mrf.mxu1 }
 0x3d5   : > { %v3238_v39 = vadd.f32 %v3237_v37, %v3195_v59 }
 0x3d6   : > { %3501 = vmatpush1.bf16.msra.mxu0 %v7531_v24 }
 0x3d7   : > { %3502 = vmatprep.subr.bf16.mxu0 %v7536_v17 }
 0x3da   : > { %3503 = vmatpush1.bf16.msra.mxu0 %v7534_v53 }
 0x3db   : > { %3504 = vmatprep.subr.bf16.mxu0 %v7539_v46 }
 0x3de   : > { %3505 = vmatpush1.bf16.msra.mxu0 %v7537_v23 }
 0x3df   : > { %3506 = vmatprep.subr.bf16.mxu0 %v7542_v1 }
 0x3e2   : > { %3507 = vmatpush1.bf16.msra.mxu0 %v7540_v54 }
 0x3e3   : > { %3508 = vmatprep.subr.bf16.mxu0 %v7545_v40 }
 0x3e6   : > { %3509 = vmatpush1.bf16.msra.mxu0 %v7543_v25 }
 0x3e7   : > { %3510 = vmatprep.subr.bf16.mxu0 %v7548_v33 }
 0x3ea   : > { %3511 = vmatpush1.bf16.msra.mxu0 %v7546_v58 }
 0x3eb   : > { %3512 = vmatprep.subr.bf16.mxu0 %v7551_v16 }
 0x3ee   : > { %3513 = vmatpush1.bf16.msra.mxu0 %v7549_v49 }
 0x3f1   : > { %3531 = vmatmul.mubr.bf16.vlgmr.msra.gmra.mxu0 %v8788_v51 }
 0x410   : > { %v3317_v43 = vpop.f32.mrf.mxu1 }
 0x411   : > { %v3274_v52 = vpop.f32.mrf.mxu0 }
 0x412   : > { %v3275_v51 = vadd.f32 %v3274_v52, %v3232_v31  ;;  %v3319_v6 = vpop.f32.mrf.mxu1 }
 0x413   : > { %v3276_v56 = vpop.f32.mrf.mxu0 }
 0x414   : > { %v9228_v14 = vadd.f32 %v3317_v43, %v3275_v51  ;;  %v3277_v18 = vadd.f32 %v3276_v56, %v3234_v63  ;;  %v3321_v32 = vpop.f32.mrf.mxu1 }
 0x415   : > { %v3278_v21 = vpop.f32.mrf.mxu0 }
 0x416   : > { %3541 = vst [vmem:[#allocation3] sm:$0xff] %v9228_v14  ;;  %v9231_v41 = vadd.f32 %v3319_v6, %v3277_v18  ;;  %v3279_v3 = vadd.f32 %v3278_v21, %v3236_v8  ;;  %3723 = vrot.lane.b32.xlu1 %v9228_v14, %s11572_s25  ;;  %v3323_v47 = vpop.f32.mrf.mxu1 }
 0x417   : > { %v3280_v62 = vpop.f32.mrf.mxu0 }
 0x418   : > { %3542 = vst [vmem:[#allocation3 + $0x8] sm:$0xff] %v9231_v41  ;;  %v9236_v38 = vadd.f32 %v3321_v32, %v3279_v3  ;;  %v3281_v0 = vadd.f32 %v3280_v62, %v3238_v39 }
 0x41a   : > { %3545 = vst [vmem:[#allocation3 + $0x18] sm:$0xff] %v9236_v38  ;;  %v9239_v45 = vadd.f32 %v3323_v47, %v3281_v0  ;;  %3729 = vrot.lane.b32.xlu0 %v9236_v38, %s11572_s25  ;;  %3694 = vrot.lane.b32.xlu1 %v9228_v14, %s11570_s22 }
 0x41c   : > { %3546 = vst [vmem:[#allocation3 + $0x20] sm:$0xff] %v9239_v45 }
 0x41e   : > { %3700 = vrot.lane.b32.xlu0 %v9236_v38, %s11570_s22  ;;  %3666 = vrot.lane.b32.xlu1 %v9228_v14, %s11624_s26 }
 0x422   : > { %3672 = vrot.lane.b32.xlu0 %v9236_v38, %s11624_s26  ;;  %3638 = vrot.lane.b32.xlu1 %v9228_v14, %s11625_s28 }
 0x426   : > { %3644 = vrot.lane.b32.xlu0 %v9236_v38, %s11625_s28  ;;  %3610 = vrot.lane.b32.xlu1 %v9228_v14, %s11626_s29 }
 0x42a   : > { %3616 = vrot.lane.b32.xlu0 %v9236_v38, %s11626_s29  ;;  %3582 = vrot.lane.b32.xlu1 %v9228_v14, %s11627_s14 }
 0x42e   : > { %3588 = vrot.lane.b32.xlu0 %v9236_v38, %s11627_s14  ;;  %3554 = vrot.lane.b32.xlu1 %v9228_v14, %s11566_s23 }
 0x432   : > { %3560 = vrot.lane.b32.xlu0 %v9236_v38, %s11566_s23  ;;  %4206 = vrot.lane.b32.xlu1 %v9228_v14, %s11564_s17 }
 0x436   : > { %4214 = vrot.lane.b32.xlu0 %v9236_v38, %s11564_s17  ;;  %4171 = vrot.lane.b32.xlu1 %v9228_v14, %s11538_s27 }
 0x43a   : > { %4179 = vrot.lane.b32.xlu0 %v9236_v38, %s11538_s27  ;;  %3954 = vrot.lane.b32.xlu1 %v9228_v14, %s11540_s16  ;;  %s11544_s27 = smov 48  }
 0x43e   : > { %3960 = vrot.lane.b32.xlu0 %v9236_v38, %s11540_s16  ;;  %4136 = vrot.lane.b32.xlu1 %v9228_v14, %s11542_s21  ;;  %s11546_s16 = smov 85  }
 0x442   : > { %4144 = vrot.lane.b32.xlu0 %v9236_v38, %s11542_s21  ;;  %3925 = vrot.lane.b32.xlu1 %v9228_v14, %s11550_s24  ;;  %s11548_s21 = smov 64  }
 0x446   : > { %3931 = vrot.lane.b32.xlu0 %v9236_v38, %s11550_s24  ;;  %4101 = vrot.lane.b32.xlu1 %v9228_v14, %s11544_s27  ;;  %s11558_s24 = smov 66  }
 0x44a   : > { %4109 = vrot.lane.b32.xlu0 %v9236_v38, %s11544_s27  ;;  %3896 = vrot.lane.b32.xlu1 %v9228_v14, %s11546_s16  ;;  %s11552_s27 = smov 86  }
 0x44e   : > { %3902 = vrot.lane.b32.xlu0 %v9236_v38, %s11546_s16  ;;  %4070 = vrot.lane.b32.xlu1 %v9228_v14, %s11548_s21  ;;  %s11554_s16 = smov 65  }
 0x450   : > { %v9298_v28 = vpop.f32.mrf.mxu1 }
 0x451   : > { %v9300_v57 = vpop.f32.mrf.mxu0 }
 0x452   : > { %v3405_v15 = vpop.f32.mrf.mxu1  ;;  %4076 = vrot.lane.b32.xlu0 %v9236_v38, %s11548_s21  ;;  %3867 = vrot.lane.b32.xlu1 %v9228_v14, %s11552_s27  ;;  %s11556_s21 = smov 87   ;;  %v3404_v2 = vadd.f32 %v9298_v28, %v9300_v57 }
 0x453   : > { %v3362_v10 = vpop.f32.mrf.mxu0 }
 0x454   : > { %v3406_v12 = vadd.f32 %v3405_v15, %v3362_v10  ;;  %v9306_v29 = vpop.f32.mrf.mxu1 }
 0x455   : > { %v9308_v48 = vpop.f32.mrf.mxu0 }
 0x456   : > { %v3409_v20 = vpop.f32.mrf.mxu1  ;;  %3873 = vrot.lane.b32.xlu0 %v9236_v38, %s11552_s27  ;;  %4041 = vrot.lane.b32.xlu1 %v9228_v14, %s11554_s16  ;;  %s11628_s27 = smov 88   ;;  %v3408_v61 = vadd.f32 %v9306_v29, %v9308_v48 }
 0x457   : > { %v3366_v60 = vpop.f32.mrf.mxu0 }
 0x458   : > { %v3410_v30 = vadd.f32 %v3409_v20, %v3366_v60 }
 0x45a   : > { %4047 = vrot.lane.b32.xlu0 %v9236_v38, %s11554_s16  ;;  %3838 = vrot.lane.b32.xlu1 %v9228_v14, %s11556_s21  ;;  %s11568_s16 = smov 67  }
 0x45e   : > { %3844 = vrot.lane.b32.xlu0 %v9236_v38, %s11556_s21  ;;  %4012 = vrot.lane.b32.xlu1 %v9228_v14, %s11558_s24  ;;  %s11562_s21 = smov 104  }
 0x462   : > { %4018 = vrot.lane.b32.xlu0 %v9236_v38, %s11558_s24  ;;  %3810 = vrot.lane.b32.xlu1 %v9228_v14, %s11628_s27  ;;  %s11560_s24 = smov 44  }
 0x466   : > { %3816 = vrot.lane.b32.xlu0 %v9236_v38, %s11628_s27  ;;  %3983 = vrot.lane.b32.xlu1 %v9228_v14, %s11568_s16 }
 0x46a   : > { %3989 = vrot.lane.b32.xlu0 %v9236_v38, %s11568_s16  ;;  %3781 = vrot.lane.b32.xlu1 %v9228_v14, %s11562_s21  ;;  %s11633_s16 = smov 48  }
 0x46e   : > { %3787 = vrot.lane.b32.xlu0 %v9236_v38, %s11562_s21  ;;  %4241 = vrot.lane.b32.xlu1 %v9228_v14, %s11560_s24  ;;  %s11630_s21 = smov 68  }
 0x472   : > { %4249 = vrot.lane.b32.xlu0 %v9236_v38, %s11560_s24  ;;  %3725 = vrot.lane.b32.xlu1 %v9231_v41, %s11572_s25  ;;  %s11629_s24 = smov 46   ;;  %s11635_s25 = smov 64  }
 0x476   : > { %3696 = vrot.lane.b32.xlu1 %v9231_v41, %s11570_s22  ;;  %s11634_s22 = smov 85  }
 0x47a   : > { %3668 = vrot.lane.b32.xlu1 %v9231_v41, %s11624_s26 }
 0x47e   : > { %3640 = vrot.lane.b32.xlu1 %v9231_v41, %s11625_s28 }
 0x482   : > { %3612 = vrot.lane.b32.xlu1 %v9231_v41, %s11626_s29 }
 0x486   : > { %3584 = vrot.lane.b32.xlu1 %v9231_v41, %s11627_s14 }
 0x488   : > { %v9352_v35 = vpop.permute.xlu1 %3723 }
 0x48a   : > { %3556 = vrot.lane.b32.xlu1 %v9231_v41, %s11566_s23  ;;  %s11632_s23 = smov 84  }
 0x48c   : > { %v9356_v26 = vpop.permute.xlu1 %3694  ;;  %v9376_v16 = vpop.permute.xlu0 %3729 }
 0x48e   : > { %4208 = vrot.lane.b32.xlu1 %v9231_v41, %s11564_s17  ;;  %s11631_s17 = smov 47  }
 0x490   : > { %v3489_v11 = vpop.f32.mrf.mxu1  ;;  %v9360_v24 = vpop.permute.xlu1 %3666 }
 0x491   : > { %v3446_v50 = vpop.f32.mrf.mxu0  ;;  %v9384_v55 = vpop.permute.xlu0 %3700 }
 0x492   : > { %4173 = vrot.lane.b32.xlu1 %v9231_v41, %s11629_s24  ;;  %v3491_v53 = vpop.f32.mrf.mxu1  ;;  %v3447_v13 = vadd.f32 %v3446_v50, %v3404_v2 }
 0x493   : > { %v3448_v17 = vpop.f32.mrf.mxu0 }
 0x494   : > { %v3449_v46 = vadd.f32 %v3448_v17, %v3406_v12  ;;  %v9364_v1 = vpop.permute.xlu1 %3638  ;;  %v3490_v22 = vadd.f32 %v3489_v11, %v3447_v13  ;;  %v3493_v31 = vpop.f32.mrf.mxu1 }
 0x495   : > { %v3450_v23 = vpop.f32.mrf.mxu0  ;;  %v9394_v27 = vpop.permute.xlu0 %3672 }
 0x496   : > { %3956 = vrot.lane.b32.xlu1 %v9231_v41, %s11630_s21  ;;  %v3492_v54 = vadd.f32 %v3491_v53, %v3449_v46  ;;  %v3451_v7 = vadd.f32 %v3450_v23, %v3408_v61 }
 0x497   : > { %v3452_v40 = vpop.f32.mrf.mxu0 }
 0x498   : > { %v9368_v25 = vadd.f32 %v3452_v40, %v3410_v30  ;;  %v9370_v33 = vpop.permute.xlu1 %3610  ;;  %v3494_v36 = vadd.f32 %v3493_v31, %v3451_v7 }
 0x499   : > { %v9404_v34 = vpop.permute.xlu0 %3644 }
 0x49a   : > { %4138 = vrot.lane.b32.xlu1 %v9231_v41, %s11631_s17 }
 0x49c   : > { %v9374_v58 = vpop.permute.xlu1 %3582 }
 0x49d   : > { %v9420_v6 = vpop.permute.xlu0 %3616 }
 0x49e   : > { %3927 = vrot.lane.b32.xlu1 %v9231_v41, %s11632_s23 }
 0x4a0   : > { %v9380_v49 = vpop.permute.xlu1 %3554 }
 0x4a1   : > { %v9434_v8 = vpop.permute.xlu0 %3588 }
 0x4a2   : > { %4103 = vrot.lane.b32.xlu1 %v9231_v41, %s11633_s16 }
 0x4a4   : > { %v9386_v9 = vpop.permute.xlu1 %4206 }
 0x4a5   : > { %v9446_v21 = vpop.permute.xlu0 %3560 }
 0x4a6   : > { %3898 = vrot.lane.b32.xlu1 %v9231_v41, %s11634_s22 }
 0x4a8   : > { %v9390_v44 = vpop.permute.xlu1 %4171 }
 0x4a9   : > { %v9456_v3 = vpop.permute.xlu0 %4214 }
 0x4aa   : > { %4072 = vrot.lane.b32.xlu1 %v9231_v41, %s11635_s25 }
 0x4ac   : > { %v9398_v5 = vpop.permute.xlu1 %3954 }
 0x4ad   : > { %v9468_v47 = vpop.permute.xlu0 %4179 }
 0x4ae   : > { %3869 = vrot.lane.b32.xlu1 %v9231_v41, %s11636_s0 }
 0x4b0   : > { %v9406_v42 = vpop.permute.xlu1 %4136 }
 0x4b1   : > { %v3532_v37 = vpop.f32.mrf.mxu0  ;;  %v9478_v57 = vpop.permute.xlu0 %3960 }
 0x4b2   : > { %v9408_v19 = vadd.f32 %v3532_v37, %v3490_v22  ;;  %4043 = vrot.lane.b32.xlu1 %v9231_v41, %s11637_s1 }
 0x4b3   : > { %v3534_v43 = vpop.f32.mrf.mxu0 }
 0x4b4   : > { %v9412_v52 = vadd.f32 %v3534_v43, %v3492_v54  ;;  %3727 = vrot.lane.b32.xlu0 %v9408_v19, %s11638_s2  ;;  %3544 = vst.msk [vmem:[#allocation3 + $0x10] sm:$0xff] %vm3543_vm4, %v9408_v19  ;;  %v9418_v51 = vpop.permute.xlu1 %3925 }
 0x4b5   : > { %v3536_v63 = vpop.f32.mrf.mxu0  ;;  %v9490_v10 = vpop.permute.xlu0 %4144 }
 0x4b6   : > { %v9422_v56 = vadd.f32 %v3536_v63, %v3494_v36  ;;  %3840 = vrot.lane.b32.xlu1 %v9231_v41, %s11639_s3 }
 0x4b8   : > { %3698 = vrot.lane.b32.xlu0 %v9408_v19, %s11640_s18  ;;  %3547 = vst.msk [vmem:[#allocation3 + $0x28] sm:$0xff] %vm3543_vm4, %v9422_v56  ;;  %v9430_v59 = vpop.permute.xlu1 %4101 }
 0x4b9   : > { %v9500_v29 = vpop.permute.xlu0 %3931 }
 0x4ba   : > { %4014 = vrot.lane.b32.xlu1 %v9231_v41, %s11641_s11 }
 0x4bc   : > { %3670 = vrot.lane.b32.xlu0 %v9408_v19, %s11624_s26  ;;  %v9438_v18 = vpop.permute.xlu1 %3896 }
 0x4bd   : > { %v9512_v60 = vpop.permute.xlu0 %4109 }
 0x4be   : > { %3812 = vrot.lane.b32.xlu1 %v9231_v41, %s11628_s27 }
 0x4c0   : > { %3642 = vrot.lane.b32.xlu0 %v9408_v19, %s11625_s28  ;;  %v9444_v32 = vpop.permute.xlu1 %4070 }
 0x4c1   : > { %v9532_v17 = vpop.permute.xlu0 %3902 }
 0x4c2   : > { %3985 = vrot.lane.b32.xlu1 %v9231_v41, %s11642_s15 }
 0x4c4   : > { %3614 = vrot.lane.b32.xlu0 %v9408_v19, %s11626_s29  ;;  %v9452_v39 = vpop.permute.xlu1 %3867 }
 0x4c5   : > { %v9549_v46 = vpop.permute.xlu0 %4076 }
 0x4c6   : > { %3783 = vrot.lane.b32.xlu1 %v9231_v41, %s11643_s20 }
 0x4c8   : > { %3586 = vrot.lane.b32.xlu0 %v9408_v19, %s11627_s14  ;;  %v9460_v62 = vpop.permute.xlu1 %4041 }
 0x4c9   : > { %v9569_v40 = vpop.permute.xlu0 %3873 }
 0x4ca   : > { %4243 = vrot.lane.b32.xlu1 %v9231_v41, %s11644_s30 }
 0x4cc   : > { %3558 = vrot.lane.b32.xlu0 %v9408_v19, %s11645_s12  ;;  %v9466_v0 = vpop.permute.xlu1 %3838 }
 0x4cd   : > { %v9586_v13 = vpop.permute.xlu0 %4047 }
 0x4ce   : > { %3754 = vrot.lane.b32.xlu1 %v9231_v41, %s7672_s9 }
 0x4d0   : > { %4210 = vrot.lane.b32.xlu0 %v9408_v19, %s11646_s19  ;;  %v9474_v28 = vpop.permute.xlu1 %4012 }
 0x4d2   : > { %3731 = vrot.lane.b32.xlu1 %v9239_v45, %s11638_s2 }
 0x4d4   : > { %4175 = vrot.lane.b32.xlu0 %v9408_v19, %s11629_s24  ;;  %v9482_v15 = vpop.permute.xlu1 %3810 }
 0x4d6   : > { %3702 = vrot.lane.b32.xlu1 %v9239_v45, %s11640_s18 }
 0x4d8   : > { %3958 = vrot.lane.b32.xlu0 %v9408_v19, %s11630_s21  ;;  %v9488_v41 = vpop.permute.xlu1 %3983 }
 0x4da   : > { %3674 = vrot.lane.b32.xlu1 %v9239_v45, %s11624_s26 }
 0x4dc   : > { %4140 = vrot.lane.b32.xlu0 %v9408_v19, %s11631_s17  ;;  %v9496_v12 = vpop.permute.xlu1 %3781 }
 0x4de   : > { %3646 = vrot.lane.b32.xlu1 %v9239_v45, %s11625_s28 }
 0x4e0   : > { %3929 = vrot.lane.b32.xlu0 %v9408_v19, %s11632_s23  ;;  %v9504_v48 = vpop.permute.xlu1 %4241 }
 0x4e2   : > { %3618 = vrot.lane.b32.xlu1 %v9239_v45, %s11626_s29 }
 0x4e4   : > { %4105 = vrot.lane.b32.xlu0 %v9408_v19, %s11633_s16  ;;  %v9510_v20 = vpop.permute.xlu1 %3725 }
 0x4e5   : > { %v9517_v30 = vsel %vm3735_vm10, %v9352_v35, %v9510_v20 }
 0x4e6   : > { %3590 = vrot.lane.b32.xlu1 %v9239_v45, %s11627_s14 }
 0x4e8   : > { %3900 = vrot.lane.b32.xlu0 %v9408_v19, %s11634_s22  ;;  %v9523_v11 = vpop.permute.xlu1 %3696 }
 0x4e9   : > { %v9528_v50 = vsel %vm3706_vm13, %v9356_v26, %v9523_v11 }
 0x4ea   : > { %3562 = vrot.lane.b32.xlu1 %v9239_v45, %s11645_s12 }
 0x4ec   : > { %4074 = vrot.lane.b32.xlu0 %v9408_v19, %s11635_s25  ;;  %v9536_v35 = vpop.permute.xlu1 %3668 }
 0x4ed   : > { %v9541_v53 = vsel %vm11597_vm11, %v9360_v24, %v9536_v35 }
 0x4ee   : > { %4216 = vrot.lane.b32.xlu1 %v9239_v45, %s11646_s19 }
 0x4f0   : > { %3871 = vrot.lane.b32.xlu0 %v9408_v19, %s11636_s0  ;;  %v9547_v26 = vpop.permute.xlu1 %3640 }
 0x4f1   : > { %v9554_v23 = vsel %vm403_vm3, %v9364_v1, %v9547_v26 }
 0x4f2   : > { %4181 = vrot.lane.b32.xlu1 %v9239_v45, %s11629_s24 }
 0x4f4   : > { %4045 = vrot.lane.b32.xlu0 %v9408_v19, %s11637_s1  ;;  %v9560_v24 = vpop.permute.xlu1 %3612 }
 0x4f5   : > { %v9565_v54 = vsel %vm385_vm2, %v9370_v33, %v9560_v24 }
 0x4f6   : > { %3962 = vrot.lane.b32.xlu1 %v9239_v45, %s11630_s21 }
 0x4f8   : > { %3842 = vrot.lane.b32.xlu0 %v9408_v19, %s11639_s3  ;;  %v9573_v1 = vpop.permute.xlu1 %3584 }
 0x4f9   : > { %v9578_v2 = vsel %vm11600_vm14, %v9374_v58, %v9573_v1 }
 0x4fa   : > { %4146 = vrot.lane.b32.xlu1 %v9239_v45, %s11631_s17 }
 0x4fc   : > { %4016 = vrot.lane.b32.xlu0 %v9408_v19, %s11641_s11  ;;  %v9584_v33 = vpop.permute.xlu1 %3556 }
 0x4fd   : > { %v9591_v61 = vsel %vm349_vm12, %v9380_v49, %v9584_v33  ;;  %v9606_v49 = vpop.permute.xlu0 %3844 }
 0x4fe   : > { %3933 = vrot.lane.b32.xlu1 %v9239_v45, %s11632_s23 }
 0x500   : > { %3814 = vrot.lane.b32.xlu0 %v9408_v19, %s11628_s27  ;;  %v9597_v58 = vpop.permute.xlu1 %4208 }
 0x501   : > { %v9602_v7 = vsel %vm4222_vm15, %v9386_v9, %v9597_v58  ;;  %v9623_v31 = vpop.permute.xlu0 %4018 }
 0x502   : > { %11647 = vst [vmem:[#allocation14_spill] sm:$0xff] %v9602_v7  ;;  %4111 = vrot.lane.b32.xlu1 %v9239_v45, %s11633_s16 }
 0x504   : > { %3987 = vrot.lane.b32.xlu0 %v9408_v19, %s11642_s15  ;;  %v9610_v22 = vpop.permute.xlu1 %4173 }
 0x505   : > { %v9615_v37 = vsel %vm4187_vm6, %v9390_v44, %v9610_v22 }
 0x506   : > { %11648 = vst [vmem:[#allocation15_spill] sm:$0xff] %v9615_v37  ;;  %3904 = vrot.lane.b32.xlu1 %v9239_v45, %s11634_s22 }
 0x508   : > { %3785 = vrot.lane.b32.xlu0 %v9408_v19, %s11643_s20  ;;  %v9621_v9 = vpop.permute.xlu1 %3956 }
 0x509   : > { %v9628_v43 = vsel %vm3966_vm7, %v9398_v5, %v9621_v9  ;;  %v9643_v5 = vpop.permute.xlu0 %3816 }
 0x50a   : > { %11649 = vst [vmem:[#allocation16_spill] sm:$0xff] %v9628_v43  ;;  %4078 = vrot.lane.b32.xlu1 %v9239_v45, %s11635_s25 }
 0x50c   : > { %4245 = vrot.lane.b32.xlu0 %v9408_v19, %s11644_s30  ;;  %v9634_v44 = vpop.permute.xlu1 %4138 }
 0x50d   : > { %v9639_v36 = vsel %vm4152_vm8, %v9406_v42, %v9634_v44 }
 0x50e   : > { %11650 = vst [vmem:[#allocation17_spill] sm:$0xff] %v9639_v36  ;;  %3875 = vrot.lane.b32.xlu1 %v9239_v45, %s11636_s0  ;;  %v9660_v36 = vpop.permute.xlu0 %3989 }
 0x510   : > { %3756 = vrot.lane.b32.xlu0 %v9408_v19, %s7672_s9  ;;  %v9647_v63 = vpop.permute.xlu1 %3927 }
 0x511   : > { %v9652_v4 = vsel %vm11587_vm0, %v9418_v51, %v9647_v63  ;;  %vm11589_vm0 = vcmask 523264  }
 0x512   : > { %11651 = vst [vmem:[#allocation18_spill] sm:$0xff] %v9652_v4  ;;  %4049 = vrot.lane.b32.xlu1 %v9239_v45, %s11637_s1 }
 0x514   : > { %3733 = vrot.lane.b32.xlu0 %v9422_v56, %s11638_s2  ;;  %v9658_v42 = vpop.permute.xlu1 %4103 }
 0x515   : > { %v9665_v19 = vsel %vm11603_vm1, %v9430_v59, %v9658_v42  ;;  %v9680_v59 = vpop.permute.xlu0 %3787 }
 0x516   : > { %11652 = vst [vmem:[#allocation19_spill] sm:$0xff] %v9665_v19  ;;  %3846 = vrot.lane.b32.xlu1 %v9239_v45, %s11639_s3 }
 0x518   : > { %3704 = vrot.lane.b32.xlu0 %v9422_v56, %s11640_s18  ;;  %v9671_v51 = vpop.permute.xlu1 %3898 }
 0x519   : > { %v9676_v4 = vsel %vm11588_vm5, %v9438_v18, %v9671_v51  ;;  %vm11590_vm5 = vcmask 703488  }
 0x51a   : > { %11653 = vst [vmem:[#allocation20_spill] sm:$0xff] %v9676_v4  ;;  %4020 = vrot.lane.b32.xlu1 %v9239_v45, %s11641_s11  ;;  %v9697_v4 = vpop.permute.xlu0 %4249 }
 0x51c   : > { %3676 = vrot.lane.b32.xlu0 %v9422_v56, %s11624_s26  ;;  %v9684_v19 = vpop.permute.xlu1 %4072 }
 0x51d   : > { %v9689_v43 = vsel %vm11589_vm0, %v9444_v32, %v9684_v19  ;;  %vm11591_vm0 = vcmask 531456  }
 0x51e   : > { %11654 = vst [vmem:[#allocation21_spill] sm:$0xff] %v9689_v43  ;;  %3818 = vrot.lane.b32.xlu1 %v9239_v45, %s11628_s27 }
 0x520   : > { %3648 = vrot.lane.b32.xlu0 %v9422_v56, %s11625_s28  ;;  %v9695_v18 = vpop.permute.xlu1 %3869 }
 0x521   : > { %v9702_v37 = vsel %vm11590_vm5, %v9452_v39, %v9695_v18  ;;  %vm3850_vm5 = vcmask 711680  }
 0x522   : > { %11655 = vst [vmem:[#allocation22_spill] sm:$0xff] %v9702_v37  ;;  %3991 = vrot.lane.b32.xlu1 %v9239_v45, %s11642_s15 }
 0x524   : > { %3620 = vrot.lane.b32.xlu0 %v9422_v56, %s11626_s29  ;;  %v9708_v32 = vpop.permute.xlu1 %4043 }
 0x525   : > { %v9713_v43 = vsel %vm11591_vm0, %v9460_v62, %v9708_v32  ;;  %vm11592_vm0 = vcmask 539648  }
 0x526   : > { %11656 = vst [vmem:[#allocation23_spill] sm:$0xff] %v9713_v43  ;;  %v3728_v7 = vpop.permute.xlu0 %3727  ;;  %3789 = vrot.lane.b32.xlu1 %v9239_v45, %s11643_s20 }
 0x527   : > { %v9719_v39 = vsel %vm3735_vm10, %v9510_v20, %v3728_v7  ;;  %3748 = vst.msk [vmem:[#allocation3 + $0x160] sm:$0xff] %vm3543_vm4, %v3728_v7 }
 0x528   : > { %3592 = vrot.lane.b32.xlu0 %v9422_v56, %s11627_s14  ;;  %v9724_v37 = vpop.permute.xlu1 %3840 }
 0x529   : > { %v9729_v62 = vsel %vm3850_vm5, %v9466_v0, %v9724_v37 }
 0x52a   : > { %11657 = vst [vmem:[#allocation24_spill] sm:$0xff] %v9729_v62  ;;  %v3699_v43 = vpop.permute.xlu0 %3698  ;;  %4251 = vrot.lane.b32.xlu1 %v9239_v45, %s11644_s30 }
 0x52b   : > { %v9735_v20 = vsel %vm3706_vm13, %v9523_v11, %v3699_v43  ;;  %3719 = vst.msk [vmem:[#allocation3 + $0x130] sm:$0xff] %vm3543_vm4, %v3699_v43 }
 0x52c   : > { %3564 = vrot.lane.b32.xlu0 %v9422_v56, %s11645_s12  ;;  %v9740_v7 = vpop.permute.xlu1 %4014 }
 0x52d   : > { %v9745_v0 = vsel %vm11592_vm0, %v9474_v28, %v9740_v7  ;;  %vm11594_vm0 = vcmask 547840  }
 0x52e   : > { %11658 = vst [vmem:[#allocation25_spill] sm:$0xff] %v9745_v0  ;;  %v3671_v62 = vpop.permute.xlu0 %3670  ;;  %3760 = vrot.lane.b32.xlu1 %v9239_v45, %s7672_s9 }
 0x52f   : > { %v9751_v11 = vsel %vm11597_vm11, %v9536_v35, %v3671_v62  ;;  %3690 = vst.msk [vmem:[#allocation3 + $0x100] sm:$0xff] %vm3543_vm4, %v3671_v62 }
 0x530   : > { %4218 = vrot.lane.b32.xlu0 %v9422_v56, %s11646_s19  ;;  %v9756_v43 = vpop.permute.xlu1 %3812 }
 0x531   : > { %v9761_v28 = vsel %vm11593_vm9, %v9482_v15, %v9756_v43  ;;  %vm3793_vm9 = vcmask 850944  }
 0x532   : > { %11659 = vst [vmem:[#allocation26_spill] sm:$0xff] %v9761_v28  ;;  %v3643_v0 = vpop.permute.xlu0 %3642  ;;  %3752 = vrot.lane.b32.xlu1 %v9228_v14, %s7672_s9  ;;  %v4509_v28 = vld [vmem:[%s11523_s5] sm:$0xff] }
 0x533   : > { %v9767_v45 = vsel %vm403_vm3, %v9547_v26, %v3643_v0  ;;  %3662 = vst.msk [vmem:[#allocation3 + $0xd0] sm:$0xff] %vm3543_vm4, %v3643_v0 }
 0x534   : > { %4183 = vrot.lane.b32.xlu0 %v9422_v56, %s11629_s24  ;;  %v9772_v35 = vpop.permute.xlu1 %3985 }
 0x535   : > { %v9777_v15 = vsel %vm11594_vm0, %v9488_v41, %v9772_v35  ;;  %vm4257_vm0 = vcmask 359424  }
 0x536   : > { %11660 = vst [vmem:[#allocation27_spill] sm:$0xff] %v9777_v15  ;;  %v3615_v62 = vpop.permute.xlu0 %3614  ;;  %4212 = vrot.lane.b32.xlu1 %v9412_v52, %s11646_s19 }
 0x537   : > { %v9783_v14 = vsel %vm385_vm2, %v9560_v24, %v3615_v62  ;;  %3634 = vst.msk [vmem:[#allocation3 + $0xa0] sm:$0xff] %vm3543_vm4, %v3615_v62 }
 0x538   : > { %3964 = vrot.lane.b32.xlu0 %v9422_v56, %s11630_s21  ;;  %v9788_v26 = vpop.permute.xlu1 %3783 }
 0x539   : > { %v9793_v41 = vsel %vm3793_vm9, %v9496_v12, %v9788_v26 }
 0x53a   : > { %11661 = vst [vmem:[#allocation28_spill] sm:$0xff] %v9793_v41  ;;  %v3587_v0 = vpop.permute.xlu0 %3586  ;;  %4177 = vrot.lane.b32.xlu1 %v9412_v52, %s11629_s24 }
 0x53b   : > { %v9799_v24 = vsel %vm11600_vm14, %v9573_v1, %v3587_v0  ;;  %3606 = vst.msk [vmem:[#allocation3 + $0x70] sm:$0xff] %vm3543_vm4, %v3587_v0 }
 0x53c   : > { %4148 = vrot.lane.b32.xlu0 %v9422_v56, %s11631_s17  ;;  %v9804_v62 = vpop.permute.xlu1 %4243 }
 0x53d   : > { %v9809_v12 = vsel %vm4257_vm0, %v9504_v48, %v9804_v62 }
 0x53e   : > { %11662 = vst [vmem:[#allocation29_spill] sm:$0xff] %v9809_v12  ;;  %v3559_v41 = vpop.permute.xlu0 %3558  ;;  %4142 = vrot.lane.b32.xlu1 %v9412_v52, %s11631_s17 }
 0x53f   : > { %v9815_v1 = vsel %vm349_vm12, %v9584_v33, %v3559_v41  ;;  %3578 = vst.msk [vmem:[#allocation3 + $0x40] sm:$0xff] %vm3543_vm4, %v3559_v41 }
 0x540   : > { %3935 = vrot.lane.b32.xlu0 %v9422_v56, %s11632_s23  ;;  %v9820_v0 = vpop.permute.xlu1 %3754 }
 0x542   : > { %v9822_v15 = vpop.permute.xlu0 %4210  ;;  %4107 = vrot.lane.b32.xlu1 %v9412_v52, %s11633_s16 }
 0x543   : > { %11663 = vst [vmem:[#allocation30_spill] sm:$0xff] %v9822_v15  ;;  %v9829_v48 = vsel %vm4222_vm15, %v9597_v58, %v9822_v15 }
 0x544   : > { %11664 = vst [vmem:[#allocation31_spill] sm:$0xff] %v9829_v48  ;;  %4113 = vrot.lane.b32.xlu0 %v9422_v56, %s11633_s16  ;;  %v9833_v33 = vpop.permute.xlu1 %3731 }
 0x545   : > { %v9838_v41 = vsel %vm3735_vm10, %v9376_v16, %v9833_v33 }
 0x546   : > { %v9840_v12 = vpop.permute.xlu0 %4175  ;;  %4247 = vrot.lane.b32.xlu1 %v9412_v52, %s11644_s30 }
 0x547   : > { %11665 = vst [vmem:[#allocation32_spill] sm:$0xff] %v9840_v12  ;;  %v9847_v58 = vsel %vm4187_vm6, %v9610_v22, %v9840_v12  ;;  %v4511_v12 = vld [vmem:[%s11523_s5 + $0x10] sm:$0xff] }
 0x548   : > { %11666 = vst [vmem:[#allocation33_spill] sm:$0xff] %v9847_v58  ;;  %3906 = vrot.lane.b32.xlu0 %v9422_v56, %s11634_s22  ;;  %v9854_v15 = vpop.permute.xlu1 %3702 }
 0x549   : > { %v9859_v16 = vsel %vm3706_vm13, %v9384_v55, %v9854_v15 }
 0x54a   : > { %v3959_v52 = vpop.permute.xlu0 %3958  ;;  %4515 = vperm.xlu1 %6938, %v4509_v28  }
 0x54b   : > { %v9863_v22 = vsel %vm3966_vm7, %v9621_v9, %v3959_v52  ;;  %3979 = vst.msk [vmem:[#allocation3 + $0x2e0] sm:$0xff] %vm3543_vm4, %v3959_v52 }
 0x54c   : > { %11667 = vst [vmem:[#allocation34_spill] sm:$0xff] %v9863_v22  ;;  %4080 = vrot.lane.b32.xlu0 %v9422_v56, %s11635_s25  ;;  %v9871_v58 = vpop.permute.xlu1 %3674 }
 0x54d   : > { %v9876_v55 = vsel %vm11597_vm11, %v9394_v27, %v9871_v58  ;;  %vm11670_vm11 = vcmask 687104  }
 0x54e   : > { %v9878_v28 = vpop.permute.xlu0 %4140  ;;  %4525 = vperm.xlu1 %6938, %v4511_v12  }
 0x54f   : > { %11668 = vst [vmem:[#allocation35_spill] sm:$0xff] %v9878_v28  ;;  %v9883_v9 = vsel %vm4152_vm8, %v9634_v44, %v9878_v28 }
 0x550   : > { %11669 = vst [vmem:[#allocation36_spill] sm:$0xff] %v9883_v9  ;;  %3877 = vrot.lane.b32.xlu0 %v9422_v56, %s11636_s0  ;;  %v9887_v52 = vpop.permute.xlu1 %3646  ;;  %v3538_v9 = vpop.f32.mrf.mxu0 }
 0x551   : > { %v9892_v22 = vsel %vm403_vm3, %v9404_v34, %v9887_v52 }
 0x552   : > { %v3930_v27 = vpop.permute.xlu0 %3929 }
 0x553   : > { %v9896_v48 = vsel %vm11670_vm11, %v9647_v63, %v3930_v27  ;;  %3950 = vst.msk [vmem:[#allocation3 + $0x2b0] sm:$0xff] %vm3543_vm4, %v3930_v27  ;;  %vm11674_vm11 = vcmask 695296  }
 0x554   : > { %11671 = vst [vmem:[#allocation37_spill] sm:$0xff] %v9896_v48  ;;  %4051 = vrot.lane.b32.xlu0 %v9422_v56, %s11637_s1  ;;  %v9901_v44 = vpop.permute.xlu1 %3618 }
 0x555   : > { %v9906_v12 = vsel %vm385_vm2, %v9420_v6, %v9901_v44 }
 0x556   : > { %v9908_v28 = vpop.permute.xlu0 %4105 }
 0x557   : > { %11672 = vst [vmem:[#allocation38_spill] sm:$0xff] %v9908_v28  ;;  %v9913_v34 = vsel %vm11603_vm1, %v9658_v42, %v9908_v28 }
 0x558   : > { %11673 = vst [vmem:[#allocation39_spill] sm:$0xff] %v9913_v34  ;;  %3848 = vrot.lane.b32.xlu0 %v9422_v56, %s11639_s3  ;;  %v9917_v63 = vpop.permute.xlu1 %3590 }
 0x559   : > { %v9922_v27 = vsel %vm11600_vm14, %v9434_v8, %v9917_v63  ;;  %vm11676_vm14 = vcmask 523264  }
 0x55a   : > { %v3901_v48 = vpop.permute.xlu0 %3900 }
 0x55b   : > { %v9926_v6 = vsel %vm11674_vm11, %v9671_v51, %v3901_v48  ;;  %3921 = vst.msk [vmem:[#allocation3 + $0x280] sm:$0xff] %vm3543_vm4, %v3901_v48  ;;  %vm11678_vm11 = vcmask 703488  }
 0x55c   : > { %11675 = vst [vmem:[#allocation40_spill] sm:$0xff] %v9926_v6  ;;  %4022 = vrot.lane.b32.xlu0 %v9422_v56, %s11641_s11  ;;  %v9931_v42 = vpop.permute.xlu1 %3562 }
 0x55d   : > { %v9936_v34 = vsel %vm349_vm12, %v9446_v21, %v9931_v42 }
 0x55e   : > { %v4075_v28 = vpop.permute.xlu0 %4074 }
 0x55f   : > { %v9940_v8 = vsel %vm11676_vm14, %v9684_v19, %v4075_v28  ;;  %4095 = vst.msk [vmem:[#allocation3 + $0x3a0] sm:$0xff] %vm3543_vm4, %v4075_v28  ;;  %vm11680_vm14 = vcmask 531456  }
 0x560   : > { %11677 = vst [vmem:[#allocation41_spill] sm:$0xff] %v9940_v8  ;;  %3820 = vrot.lane.b32.xlu0 %v9422_v56, %s11628_s27  ;;  %v9945_v51 = vpop.permute.xlu1 %4216 }
 0x561   : > { %v9950_v48 = vsel %vm4222_vm15, %v9456_v3, %v9945_v51 }
 0x562   : > { %v3872_v6 = vpop.permute.xlu0 %3871 }
 0x563   : > { %v9954_v21 = vsel %vm11678_vm11, %v9695_v18, %v3872_v6  ;;  %3892 = vst.msk [vmem:[#allocation3 + $0x250] sm:$0xff] %vm3543_vm4, %v3872_v6  ;;  %v9976_v18 = vld [vmem:[%s11522_s4 + $0xc] ss:$16 sps:$4 sm:$0xff]   ;;  %vm11683_vm11 = vcmask 130048  }
 0x564   : > { %11679 = vst [vmem:[#allocation42_spill] sm:$0xff] %v9954_v21  ;;  %3993 = vrot.lane.b32.xlu0 %v9422_v56, %s11642_s15  ;;  %v9959_v19 = vpop.permute.xlu1 %4181  ;;  %11682 = vst [vmem:[#allocation44_spill] sm:$0xff] %v9976_v18  ;;  %6464 = vmatprep.mubr.msk.bf16.mxu0 %vm11683_vm11, %v9976_v18  ;;  %v10004_v18 = vld [vmem:[%s11522_s4 + $0x4] ss:$16 sps:$4 sm:$0xff]   ;;  %vm11689_vm11 = vcmask 687104  }
 0x565   : > { %v9964_v28 = vsel %vm4187_vm6, %v9468_v47, %v9959_v19  ;;  %11686 = vst [vmem:[#allocation47_spill] sm:$0xff] %v10004_v18  ;;  %4609 = vmatprep.mubr.bf16.mxu1 %v10004_v18 }
 0x566   : > { %v4046_v8 = vpop.permute.xlu0 %4045 }
 0x567   : > { %v9968_v3 = vsel %vm11680_vm14, %v9708_v32, %v4046_v8  ;;  %4066 = vst.msk [vmem:[#allocation3 + $0x370] sm:$0xff] %vm3543_vm4, %v4046_v8  ;;  %vm11687_vm14 = vcmask 539648  }
 0x568   : > { %11681 = vst [vmem:[#allocation43_spill] sm:$0xff] %v9968_v3  ;;  %3791 = vrot.lane.b32.xlu0 %v9422_v56, %s11643_s20  ;;  %v9978_v6 = vpop.permute.xlu1 %3962  ;;  %s6473_s20 = sshll.u32 %s7745_s13, 4 }
 0x569   : > { %v9983_v47 = vsel %vm3966_vm7, %v9478_v57, %v9978_v6 }
 0x56a   : > { %v3843_v21 = vpop.permute.xlu0 %3842 }
 0x56b   : > { %v9989_v32 = vsel %vm3850_vm5, %v9724_v37, %v3843_v21  ;;  %3863 = vst.msk [vmem:[#allocation3 + $0x220] sm:$0xff] %vm3543_vm4, %v3843_v21 }
 0x56c   : > { %11684 = vst [vmem:[#allocation45_spill] sm:$0xff] %v9989_v32  ;;  %4253 = vrot.lane.b32.xlu0 %v9422_v56, %s11644_s30  ;;  %v9994_v8 = vpop.permute.xlu1 %4146 }
 0x56d   : > { %v9999_v57 = vsel %vm4152_vm8, %v9490_v10, %v9994_v8 }
 0x56e   : > { %11685 = vst [vmem:[#allocation46_spill] sm:$0xff] %v9999_v57  ;;  %v4017_v3 = vpop.permute.xlu0 %4016  ;;  %v3495_v57 = vpop.f32.mrf.mxu1 }
 0x56f   : > { %v10008_v37 = vsel %vm11687_vm14, %v9740_v7, %v4017_v3  ;;  %4037 = vst.msk [vmem:[#allocation3 + $0x340] sm:$0xff] %vm3543_vm4, %v4017_v3  ;;  %vm11690_vm14 = vcmask 719872  }
 0x570   : > { %11688 = vst [vmem:[#allocation48_spill] sm:$0xff] %v10008_v37  ;;  %3762 = vrot.lane.b32.xlu0 %v9422_v56, %s7672_s9  ;;  %v10014_v21 = vpop.permute.xlu1 %3933  ;;  %v3496_v56 = vadd.f32 %v3495_v57, %v9368_v25 }
 0x571   : > { %v10019_v10 = vsel %vm11689_vm11, %v9500_v29, %v10014_v21  ;;  %vm11691_vm11 = vcmask 547840  }
 0x572   : > { %v3815_v32 = vpop.permute.xlu0 %3814  ;;  %v3539_v18 = vadd.f32 %v3538_v9, %v3496_v56 }
 0x573   : > { %v10023_v7 = vsel %vm11690_vm14, %v9756_v43, %v3815_v32  ;;  %3834 = vst.msk [vmem:[#allocation3 + $0x1f0] sm:$0xff] %vm3543_vm4, %v3815_v32  ;;  %vm11693_vm14 = vcmask 695296  }
 0x574   : > { %3758 = vrot.lane.b32.xlu0 %v9236_v38, %s7672_s9  ;;  %v10029_v3 = vpop.permute.xlu1 %4111 }
 0x575   : > { %v10034_v29 = vsel %vm11603_vm1, %v9512_v60, %v10029_v3  ;;  %vm11697_vm1 = vcmask 703488  }
 0x576   : > { %v3988_v37 = vpop.permute.xlu0 %3987 }
 0x577   : > { %v10038_v43 = vsel %vm11691_vm11, %v9772_v35, %v3988_v37  ;;  %4008 = vst.msk [vmem:[#allocation3 + $0x310] sm:$0xff] %vm3543_vm4, %v3988_v37  ;;  %vm11695_vm11 = vcmask 523264  }
 0x578   : > { %11692 = vst [vmem:[#allocation49_spill] sm:$0xff] %v10038_v43  ;;  %4220 = vrot.lane.b32.xlu0 %v3539_v18, %s11646_s19  ;;  %v10042_v25 = vpop.permute.xlu1 %3904  ;;  %s321_s19 = sand.u32 1, %s7619_s10  }
 0x579   : > { %v10047_v38 = vsel %vm11693_vm14, %v9532_v17, %v10042_v25  ;;  %vm3764_vm14 = vcmask 859136   ;;  %s322_s22 = scalar_lea.vmem [#allocation4], %s321_s19 }
 0x57a   : > { %v3786_v9 = vpop.permute.xlu0 %3785  ;;  %s6103_s29 = sshll.u32 %s322_s22, 4  ;;  %s6104_s29 = int_to_ptr.vmem [resolvable:$true] %s6103_s29 }
 0x57b   : > { %v10051_v60 = vsel %vm3793_vm9, %v9788_v26, %v3786_v9  ;;  %3806 = vst.msk [vmem:[#allocation3 + $0x1c0] sm:$0xff] %vm3543_vm4, %v3786_v9  ;;  %s7567_s21 = scalar_lea.vmem %s6104_s29, 16 }
 0x57c   : > { %11694 = vst [vmem:[#allocation50_spill] sm:$0xff] %v10051_v60  ;;  %4185 = vrot.lane.b32.xlu0 %v3539_v18, %s11629_s24  ;;  %v10055_v35 = vpop.permute.xlu1 %4078  ;;  %v4510_v60 = vld [vmem:[%s11523_s5 + $0x8] sm:$0xff]  ;;  %p7568_p11 = scmp.ne.s32.totalorder %s6104_s29, %s7567_s21  ;;  %s7673_s24 = smov [#allocation4]  }
 0x57d   : > { %v10060_v32 = vsel %vm11695_vm11, %v9549_v46, %v10055_v35  ;;  %vm11699_vm11 = vcmask 531456   ;;  %s7571_s2 = sshll.u32 %s7673_s24, 4  ;;  %s7572_s2 = int_to_ptr.vmem [resolvable:$false] %s7571_s2 }
 0x57e   : > { %v10062_v57 = vpop.permute.xlu0 %4245  ;;  %p7569_p12 = pnand %p7568_p11, %p7762_p5  ;;  %s7573_s13 = scalar_lea.vmem %s7572_s2, 32 }
 0x57f   : > { %v10067_v17 = vsel %vm4257_vm0, %v9804_v62, %v10062_v57  ;;  %p7574_p0 = scmp.lt.s32.totalorder %s6104_s29, %s7572_s2  ;;  %p7575_p1 = scmp.lt.s32.totalorder %s7573_s13, %s7567_s21 }
 0x580   : > { %11696 = vst [vmem:[#allocation51_spill] sm:$0xff] %v10067_v17  ;;  %4150 = vrot.lane.b32.xlu0 %v3539_v18, %s11631_s17  ;;  %v10070_v26 = vpop.permute.xlu1 %3875  ;;  %s11786_s17 = sld [smem:[#allocation57_spill]]  ;;  %p7570_p13 = pneg %p7569_p12 }
 0x581   : > { %v10075_v37 = vsel %vm11697_vm1, %v9569_v40, %v10070_v26  ;;  %vm11700_vm1 = vcmask 539648   ;;  %p7576_p2 = por %p7575_p1, %p7574_p0 }
 0x582   : > { %v3757_v56 = vpop.permute.xlu0 %3756 }
 0x583   : > { %v10079_v46 = vsel %vm3764_vm14, %v9820_v0, %v3757_v56  ;;  %3777 = vst.msk [vmem:[#allocation3 + $0x190] sm:$0xff] %vm3543_vm4, %v3757_v56  ;;  %p7577_p3 = pnand %p7576_p2, %p7570_p13 }
 0x584   : > { %11698 = vst [vmem:[#allocation52_spill] sm:$0xff] %v10079_v46  ;;  %4115 = vrot.lane.b32.xlu0 %v3539_v18, %s11633_s16  ;;  %v10083_v62 = vpop.permute.xlu1 %4049  ;;  %s6091_s16 = scalar_lea.sflag [#allocation5], %s321_s19 }
 0x585   : > { %v10088_v9 = vsel %vm11699_vm11, %v9586_v13, %v10083_v62  ;;  %v4455_v13 = vpack.c.bf16 %v9838_v41, %v9517_v30  ;;  %v4512_v30 = vld [vmem:[%s11523_s5 + $0x18] sm:$0xff]  ;;  %vm11703_vm11 = vcmask 547840  }
 0x586   : > { %v3734_v17 = vpop.permute.xlu0 %3733  ;;  %s6101_s27 = scalar_lea.hbm %s11786_s17, %s6473_s20 }
 0x587   : > { %v3739_v40 = vsel %vm3735_vm10, %v9833_v33, %v3734_v17  ;;  %3751 = vst.msk [vmem:[#allocation3 + $0x178] sm:$0xff] %vm3543_vm4, %v3734_v17  ;;  %vm11701_vm10 = vcmask 883712  }
 0x588   : > { %4255 = vrot.lane.b32.xlu0 %v3539_v18, %s11644_s30  ;;  %v4456_v46 = vpack.c.bf16 %v3739_v40, %v9719_v39  ;;  %v10095_v56 = vpop.permute.xlu1 %3846 }
 0x589   : > { %v10105_v43 = vsel %vm3850_vm5, %v9606_v49, %v10095_v56  ;;  %v4452_v49 = vpack.c.bf16 %v9859_v16, %v9528_v50  ;;  %v4449_v50 = vpack.c.bf16 %v9876_v55, %v9541_v53  ;;  %v4446_v53 = vpack.c.bf16 %v9892_v22, %v9554_v23 }
 0x58a   : > { %v3705_v33 = vpop.permute.xlu0 %3704  ;;  %4577 = vmatprep.subr.bf16.mxu1 %v4456_v46  ;;  %v4443_v23 = vpack.c.bf16 %v9906_v12, %v9565_v54  ;;  %v4440_v54 = vpack.c.bf16 %v9922_v27, %v9578_v2  ;;  %v4437_v2 = vpack.c.bf16 %v9936_v34, %v9591_v61  ;;  %v4285_v27 = vld [vmem:[#allocation3 + $0x8] sm:$0xff] }
 0x58b   : > { %v3710_v18 = vsel %vm3706_vm13, %v9854_v15, %v3705_v33  ;;  %3722 = vst.msk [vmem:[#allocation3 + $0x148] sm:$0xff] %vm3543_vm4, %v3705_v33  ;;  %4578 = vmatpush1.bf16.msra.mxu1 %v4455_v13  ;;  %vm11702_vm13 = vcmask 719872  }
 0x58c   : > { %4520 = vperm.xlu0 %6937, %v4510_v60   ;;  %v4453_v39 = vpack.c.bf16 %v3710_v18, %v9735_v20  ;;  %v10111_v17 = vpop.permute.xlu1 %4020  ;;  %v4288_v18 = vld [vmem:[#allocation3 + $0x20] sm:$0xff] }
 0x58d   : > { %v10121_v41 = vsel %vm11700_vm1, %v9623_v31, %v10111_v17 }
 0x58e   : > { %v3677_v15 = vpop.permute.xlu0 %3676  ;;  %4579 = vmatprep.subr.bf16.mxu1 %v4453_v39 }
 0x58f   : > { %v3681_v60 = vsel %vm11701_vm10, %v9871_v58, %v3677_v15  ;;  %3693 = vst.msk [vmem:[#allocation3 + $0x118] sm:$0xff] %vm3543_vm4, %v3677_v15  ;;  %4580 = vmatpush1.bf16.msra.mxu1 %v4452_v49  ;;  %v4287_v49 = vld [vmem:[#allocation3 + $0x18] sm:$0xff]  ;;  %vm11725_vm10 = vcmask 695296  }
 0x590   : > { %4530 = vperm.xlu0 %6937, %v4512_v30   ;;  %v4450_v20 = vpack.c.bf16 %v3681_v60, %v9751_v11  ;;  %v10127_v46 = vpop.permute.xlu1 %3818  ;;  %v11705_v15 = vld [vmem:[#allocation31_spill] sm:$0xff] }
 0x591   : > { %v10134_v31 = vsel %vm11702_vm13, %v9643_v5, %v10127_v46  ;;  %vm11728_vm13 = vcmask 523264  }
 0x592   : > { %v3649_v16 = vpop.permute.xlu0 %3648  ;;  %4581 = vmatprep.subr.bf16.mxu1 %v4450_v20 }
 0x593   : > { %v3653_v58 = vsel %vm403_vm3, %v9887_v52, %v3649_v16  ;;  %3665 = vst.msk [vmem:[#allocation3 + $0xe8] sm:$0xff] %vm3543_vm4, %v3649_v16  ;;  %4582 = vmatpush1.bf16.msra.mxu1 %v4449_v50  ;;  %vm11704_vm3 = vcmask 1031168   ;;  %v11706_v16 = vld [vmem:[#allocation14_spill] sm:$0xff] }
 0x594   : > { %v4447_v11 = vpack.c.bf16 %v3653_v58, %v9767_v45  ;;  %v10140_v40 = vpop.permute.xlu1 %3991  ;;  %v4503_v61 = vpack.c.bf16 %v9950_v48, %v11706_v16  ;;  %v11709_v48 = vld [vmem:[#allocation30_spill] sm:$0xff] }
 0x595   : > { %v10147_v5 = vsel %vm11703_vm11, %v9660_v36, %v10140_v40  ;;  %v11719_v16 = vld [vmem:[#allocation18_spill] sm:$0xff]  ;;  %vm11731_vm11 = vcmask 703488  }
 0x596   : > { %v3621_v55 = vpop.permute.xlu0 %3620  ;;  %4583 = vmatprep.subr.bf16.mxu1 %v4447_v11  ;;  %v11707_v11 = vld [vmem:[#allocation33_spill] sm:$0xff] }
 0x597   : > { %v3625_v52 = vsel %vm385_vm2, %v9901_v44, %v3621_v55  ;;  %3637 = vst.msk [vmem:[#allocation3 + $0xb8] sm:$0xff] %vm3543_vm4, %v3621_v55  ;;  %4584 = vmatpush1.bf16.msra.mxu1 %v4446_v53  ;;  %vm11717_vm2 = vcmask 687104  }
 0x598   : > { %v4444_v45 = vpack.c.bf16 %v3625_v52, %v9783_v14  ;;  %v10153_v13 = vpop.permute.xlu1 %3789  ;;  %v11708_v52 = vld [vmem:[#allocation15_spill] sm:$0xff] }
 0x599   : > { %v10160_v36 = vsel %vm3793_vm9, %v9680_v59, %v10153_v13 }
 0x59a   : > { %v3593_v22 = vpop.permute.xlu0 %3592  ;;  %4585 = vmatprep.subr.bf16.mxu1 %v4444_v45  ;;  %v4500_v45 = vpack.c.bf16 %v9964_v28, %v11708_v52  ;;  %v11712_v28 = vld [vmem:[#allocation32_spill] sm:$0xff] }
 0x59b   : > { %v3597_v44 = vsel %vm11704_vm3, %v9917_v63, %v3593_v22  ;;  %3609 = vst.msk [vmem:[#allocation3 + $0x88] sm:$0xff] %vm3543_vm4, %v3593_v22  ;;  %4586 = vmatpush1.bf16.msra.mxu1 %v4443_v23  ;;  %vm11734_vm3 = vcmask 531456  }
 0x59c   : > { %v4441_v14 = vpack.c.bf16 %v3597_v44, %v9799_v24  ;;  %v10166_v33 = vpop.permute.xlu1 %4251 }
 0x59d   : > { %v10173_v59 = vsel %vm4257_vm0, %v9697_v4, %v10166_v33  ;;  %v4435_v4 = vpack.c.bf16 %v4288_v18, %v4285_v27 }
 0x59e   : > { %v3565_v12 = vpop.permute.xlu0 %3564  ;;  %4587 = vmatprep.subr.bf16.mxu1 %v4441_v14 }
 0x59f   : > { %v3569_v63 = vsel %vm349_vm12, %v9931_v42, %v3565_v12  ;;  %3581 = vst.msk [vmem:[#allocation3 + $0x58] sm:$0xff] %vm3543_vm4, %v3565_v12  ;;  %4588 = vmatpush1.bf16.msra.mxu1 %v4440_v54  ;;  %v11711_v54 = vld [vmem:[#allocation16_spill] sm:$0xff] }
 0x5a0   : > { %v4438_v24 = vpack.c.bf16 %v3569_v63, %v9815_v1  ;;  %v10179_v39 = vpop.permute.xlu1 %3760  ;;  %v4284_v1 = vld [vmem:[#allocation3] sm:$0xff]  ;;  %v4479_v12 = vpack.c.bf16 %v9983_v47, %v11711_v54 }
 0x5a1   : > { %v4434_v50 = vpack.c.bf16 %v4287_v49, %v4284_v1  ;;  %v11715_v49 = vld [vmem:[#allocation46_spill] sm:$0xff]  ;;  %v11716_v47 = vld [vmem:[#allocation35_spill] sm:$0xff] }
 0x5a2   : > { %v10183_v30 = vpop.permute.xlu0 %4218  ;;  %4589 = vmatprep.subr.bf16.mxu1 %v4438_v24  ;;  %v11713_v24 = vld [vmem:[#allocation36_spill] sm:$0xff] }
 0x5a3   : > { %v4227_v42 = vsel %vm4222_vm15, %v9945_v51, %v10183_v30  ;;  %4590 = vmatpush1.bf16.msra.mxu1 %v4437_v2 }
 0x5a4   : > { %4591 = vmatprep.subr.bf16.mxu1 %v4435_v4  ;;  %v4504_v60 = vpack.c.bf16 %v4227_v42, %v11705_v15  ;;  %v3753_v20 = vpop.permute.xlu1 %3752  ;;  %v11714_v4 = vld [vmem:[#allocation17_spill] sm:$0xff] }
 0x5a5   : > { %v10193_v34 = vsel %vm3764_vm14, %v3753_v20, %v9820_v0  ;;  %v4497_v42 = vpack.c.bf16 %v11715_v49, %v11714_v4 }
 0x5a6   : > { %v10195_v58 = vpop.permute.xlu0 %4183  ;;  %4630 = vmatprep.subr.bf16.mxu0 %v4504_v60 }
 0x5a7   : > { %v4192_v51 = vsel %vm4187_vm6, %v9959_v19, %v10195_v58  ;;  %4592 = vmatpush1.bf16.msra.mxu1 %v4434_v50  ;;  %4631 = vmatpush1.bf16.msra.mxu0 %v4503_v61  ;;  %v11710_v19 = vld [vmem:[#allocation34_spill] sm:$0xff]  ;;  %v4476_v61 = vpack.c.bf16 %v10019_v10, %v11719_v16  ;;  %v11741_v16 = vld [vmem:[#allocation25_spill] sm:$0xff] }
 0x5a8   : > { %v4501_v53 = vpack.c.bf16 %v4192_v51, %v11707_v11  ;;  %v4213_v55 = vpop.permute.xlu1 %4212  ;;  %v11720_v51 = vld [vmem:[#allocation38_spill] sm:$0xff] }
 0x5a9   : > { %v4225_v23 = vsel %vm4222_vm15, %v11709_v48, %v4213_v55  ;;  %v11723_v55 = vld [vmem:[#allocation39_spill] sm:$0xff] }
 0x5aa   : > { %v3965_v0 = vpop.permute.xlu0 %3964  ;;  %4632 = vmatprep.subr.bf16.mxu0 %v4501_v53  ;;  %4237 = vst.msk [vmem:[#allocation3 + $0x460] sm:$0xff] %vm3543_vm4, %v4225_v23  ;;  %v11724_v48 = vld [vmem:[#allocation19_spill] sm:$0xff] }
 0x5ab   : > { %v3970_v22 = vsel %vm3966_vm7, %v9978_v6, %v3965_v0  ;;  %3982 = vst.msk [vmem:[#allocation3 + $0x2f8] sm:$0xff] %vm3543_vm4, %v3965_v0  ;;  %4633 = vmatpush1.bf16.msra.mxu0 %v4500_v45  ;;  %vm11721_vm7 = vcmask 392192   ;;  %v4494_v23 = vpack.c.bf16 %v10034_v29, %v11724_v48 }
 0x5ac   : > { %v4480_v44 = vpack.c.bf16 %v3970_v22, %v11710_v19  ;;  %v4178_v14 = vpop.permute.xlu1 %4177  ;;  %vm11722_vm1 = vmmov %vm11721_vm7 }
 0x5ad   : > { %v4190_v63 = vsel %vm4187_vm6, %v11712_v28, %v4178_v14  ;;  %v11730_v28 = vld [vmem:[#allocation21_spill] sm:$0xff] }
 0x5ae   : > { %v10214_v18 = vpop.permute.xlu0 %4148  ;;  %4593 = vmatprep.subr.bf16.mxu1 %v4480_v44  ;;  %4202 = vst.msk [vmem:[#allocation3 + $0x430] sm:$0xff] %vm3543_vm4, %v4190_v63  ;;  %v11727_v44 = vld [vmem:[#allocation20_spill] sm:$0xff] }
 0x5af   : > { %v4157_v6 = vsel %vm4152_vm8, %v9994_v8, %v10214_v18  ;;  %4594 = vmatpush2.bf16.msra.mxu1 %v4479_v12  ;;  %v11718_v8 = vld [vmem:[#allocation37_spill] sm:$0xff]  ;;  %v4473_v14 = vpack.c.bf16 %v10047_v38, %v11727_v44  ;;  %v11732_v38 = vld [vmem:[#allocation42_spill] sm:$0xff] }
 0x5b0   : > { %v4498_v2 = vpack.c.bf16 %v4157_v6, %v11713_v24  ;;  %v4143_v27 = vpop.permute.xlu1 %4142 }
 0x5b1   : > { %v4155_v15 = vsel %vm4152_vm8, %v11716_v47, %v4143_v27 }
 0x5b2   : > { %v3936_v60 = vpop.permute.xlu0 %3935  ;;  %4634 = vmatprep.subr.bf16.mxu0 %v4498_v2  ;;  %4167 = vst.msk [vmem:[#allocation3 + $0x400] sm:$0xff] %vm3543_vm4, %v4155_v15  ;;  %v11733_v2 = vld [vmem:[#allocation22_spill] sm:$0xff] }
 0x5b3   : > { %v3941_v1 = vsel %vm11717_vm2, %v10014_v21, %v3936_v60  ;;  %3953 = vst.msk [vmem:[#allocation3 + $0x2c8] sm:$0xff] %vm3543_vm4, %v3936_v60  ;;  %4635 = vmatpush1.bf16.msra.mxu0 %v4497_v42  ;;  %v11736_v42 = vld [vmem:[#allocation23_spill] sm:$0xff]  ;;  %vm11739_vm2 = vcmask 539648  }
 0x5b4   : > { %v4477_v20 = vpack.c.bf16 %v3941_v1, %v11718_v8  ;;  %v4108_v50 = vpop.permute.xlu1 %4107  ;;  %v11738_v1 = vld [vmem:[#allocation24_spill] sm:$0xff] }
 0x5b5   : > { %v4120_v11 = vsel %vm11721_vm7, %v11720_v51, %v4108_v50  ;;  %vm11744_vm7 = vcmask 547840  }
 0x5b6   : > { %v10234_v53 = vpop.permute.xlu0 %4113  ;;  %4595 = vmatprep.subr.bf16.mxu1 %v4477_v20  ;;  %4132 = vst.msk [vmem:[#allocation3 + $0x3d0] sm:$0xff] %vm3543_vm4, %v4120_v11  ;;  %v11743_v11 = vld [vmem:[#allocation26_spill] sm:$0xff] }
 0x5b7   : > { %v4122_v21 = vsel %vm11722_vm1, %v10029_v3, %v10234_v53  ;;  %4596 = vmatpush2.bf16.msra.mxu1 %v4476_v61  ;;  %v11726_v3 = vld [vmem:[#allocation40_spill] sm:$0xff] }
 0x5b8   : > { %v4495_v52 = vpack.c.bf16 %v4122_v21, %v11723_v55  ;;  %v4248_v45 = vpop.permute.xlu1 %4247 }
 0x5b9   : > { %v4260_v10 = vsel %vm4257_vm0, %v10062_v57, %v4248_v45  ;;  %v11729_v57 = vld [vmem:[#allocation41_spill] sm:$0xff]  ;;  %v11746_v45 = vld [vmem:[#allocation27_spill] sm:$0xff] }
 0x5ba   : > { %v3907_v0 = vpop.permute.xlu0 %3906  ;;  %4636 = vmatprep.subr.bf16.mxu0 %v4495_v52  ;;  %4272 = vst.msk [vmem:[#allocation3 + $0x490] sm:$0xff] %vm3543_vm4, %v4260_v10  ;;  %v11748_v10 = vld [vmem:[#allocation28_spill] sm:$0xff] }
 0x5bb   : > { %v3912_v22 = vsel %vm11725_vm10, %v10042_v25, %v3907_v0  ;;  %3924 = vst.msk [vmem:[#allocation3 + $0x298] sm:$0xff] %vm3543_vm4, %v3907_v0  ;;  %4637 = vmatpush1.bf16.msra.mxu0 %v4494_v23  ;;  %v4491_v25 = vpack.c.bf16 %v10060_v32, %v11730_v28  ;;  %v11735_v32 = vld [vmem:[#allocation43_spill] sm:$0xff] }
 0x5bc   : > { %v4474_v19 = vpack.c.bf16 %v3912_v22, %v11726_v3  ;;  %v4379_v22 = vld [vmem:[#allocation3 + $0x2f8] sm:$0xff] }
 0x5bd   : > { %v4279_v3 = vld [vmem:[%s11522_s4 + $0x18] sm:$0xff] }
 0x5be   : > { %v4081_v54 = vpop.permute.xlu0 %4080  ;;  %4597 = vmatprep.subr.bf16.mxu1 %v4474_v19  ;;  %v11749_v19 = vld [vmem:[#allocation51_spill] sm:$0xff] }
 0x5bf   : > { %v4086_v29 = vsel %vm11728_vm13, %v10055_v35, %v4081_v54  ;;  %4098 = vst.msk [vmem:[#allocation3 + $0x3b8] sm:$0xff] %vm3543_vm4, %v4081_v54  ;;  %4598 = vmatpush2.bf16.msra.mxu1 %v4473_v14  ;;  %v4470_v35 = vpack.c.bf16 %v10075_v37, %v11733_v2  ;;  %v11737_v37 = vld [vmem:[#allocation45_spill] sm:$0xff]  ;;  %v4376_v54 = vld [vmem:[#allocation3 + $0x2e0] sm:$0xff] }
 0x5c0   : > { %v4492_v12 = vpack.c.bf16 %v4086_v29, %v11729_v57  ;;  %v4481_v57 = vpack.c.bf16 %v4379_v22, %v4376_v54  ;;  %v4370_v2 = vld [vmem:[#allocation3 + $0x2b0] sm:$0xff] }
 0x5c1   : > { %v4346_v22 = vld [vmem:[#allocation3 + $0x1f0] sm:$0xff] }
 0x5c2   : > { %v3878_v63 = vpop.permute.xlu0 %3877  ;;  %4638 = vmatprep.subr.bf16.mxu0 %v4492_v12  ;;  %v4331_v12 = vld [vmem:[#allocation3 + $0x178] sm:$0xff] }
 0x5c3   : > { %v3883_v6 = vsel %vm11731_vm11, %v10070_v26, %v3878_v63  ;;  %3895 = vst.msk [vmem:[#allocation3 + $0x268] sm:$0xff] %vm3543_vm4, %v3878_v63  ;;  %4639 = vmatpush1.bf16.msra.mxu0 %v4491_v25  ;;  %v4488_v26 = vpack.c.bf16 %v10088_v9, %v11736_v42  ;;  %v11740_v9 = vld [vmem:[#allocation48_spill] sm:$0xff]  ;;  %v10322_v63 = vld [vmem:[%s11522_s4 + $0x2c] ss:$16 sps:$4 sm:$0xff]  }
 0x5c4   : > { %v4471_v24 = vpack.c.bf16 %v3883_v6, %v11732_v38  ;;  %v4373_v25 = vld [vmem:[#allocation3 + $0x2c8] sm:$0xff]  ;;  %v4328_v38 = vld [vmem:[#allocation3 + $0x160] sm:$0xff] }
 0x5c6   : > { %v4052_v27 = vpop.permute.xlu0 %4051  ;;  %4599 = vmatprep.subr.bf16.mxu1 %v4471_v24  ;;  %v4457_v24 = vpack.c.bf16 %v4331_v12, %v4328_v38  ;;  %v4412_v38 = vld [vmem:[#allocation3 + $0x400] sm:$0xff] }
 0x5c7   : > { %v4057_v4 = vsel %vm11734_vm3, %v10083_v62, %v4052_v27  ;;  %4069 = vst.msk [vmem:[#allocation3 + $0x388] sm:$0xff] %vm3543_vm4, %v4052_v27  ;;  %4600 = vmatpush2.bf16.msra.mxu1 %v4470_v35  ;;  %v4467_v62 = vpack.c.bf16 %v10105_v43, %v11738_v1  ;;  %v4478_v27 = vpack.c.bf16 %v4373_v25, %v4370_v2 }
 0x5c8   : > { %v4489_v49 = vpack.c.bf16 %v4057_v4, %v11735_v32  ;;  %v4325_v4 = vld [vmem:[#allocation3 + $0x148] sm:$0xff] }
 0x5ca   : > { %v3849_v47 = vpop.permute.xlu0 %3848  ;;  %4640 = vmatprep.subr.bf16.mxu0 %v4489_v49  ;;  %v4367_v49 = vld [vmem:[#allocation3 + $0x298] sm:$0xff] }
 0x5cb   : > { %v3854_v15 = vsel %vm3850_vm5, %v10095_v56, %v3849_v47  ;;  %3866 = vst.msk [vmem:[#allocation3 + $0x238] sm:$0xff] %vm3543_vm4, %v3849_v47  ;;  %4641 = vmatpush1.bf16.msra.mxu0 %v4488_v26  ;;  %v4485_v56 = vpack.c.bf16 %v10121_v41, %v11741_v16  ;;  %vm11742_vm5 = vcmask 719872   ;;  %v11745_v41 = vld [vmem:[#allocation49_spill] sm:$0xff] }
 0x5cc   : > { %v4468_v60 = vpack.c.bf16 %v3854_v15, %v11737_v37  ;;  %v4322_v26 = vld [vmem:[#allocation3 + $0x130] sm:$0xff]  ;;  %v4364_v37 = vld [vmem:[#allocation3 + $0x280] sm:$0xff] }
 0x5cd   : > { %v4454_v47 = vpack.c.bf16 %v4325_v4, %v4322_v26  ;;  %v10334_v15 = vld [vmem:[%s11522_s4] ss:$16 sps:$4 sm:$0xff]   ;;  %v4475_v1 = vpack.c.bf16 %v4367_v49, %v4364_v37 }
 0x5ce   : > { %v4023_v8 = vpop.permute.xlu0 %4022  ;;  %4601 = vmatprep.subr.bf16.mxu1 %v4468_v60  ;;  %v4406_v26 = vld [vmem:[#allocation3 + $0x3d0] sm:$0xff] }
 0x5cf   : > { %v4028_v20 = vsel %vm11739_vm2, %v10111_v17, %v4023_v8  ;;  %4040 = vst.msk [vmem:[#allocation3 + $0x358] sm:$0xff] %vm3543_vm4, %v4023_v8  ;;  %4602 = vmatpush2.bf16.msra.mxu1 %v4467_v62  ;;  %v4464_v17 = vpack.c.bf16 %v10134_v31, %v11743_v11  ;;  %v11747_v31 = vld [vmem:[#allocation50_spill] sm:$0xff] }
 0x5d0   : > { %v4486_v50 = vpack.c.bf16 %v4028_v20, %v11740_v9  ;;  %v10339_v62 = vld [vmem:[%s11522_s4 + $0x24] ss:$16 sps:$4 sm:$0xff]   ;;  %v11753_v20 = vmov 0   ;;  %v4361_v9 = vld [vmem:[#allocation3 + $0x268] sm:$0xff] }
 0x5d1   : > { %v4286_v37 = vld [vmem:[#allocation3 + $0x10] sm:$0xff] }
 0x5d2   : > { %v3821_v61 = vpop.permute.xlu0 %3820  ;;  %4642 = vmatprep.subr.bf16.mxu0 %v4486_v50  ;;  %v4316_v50 = vld [vmem:[#allocation3 + $0x100] sm:$0xff]  ;;  %v4355_v11 = vld [vmem:[#allocation3 + $0x238] sm:$0xff] }
 0x5d3   : > { %v3825_v51 = vsel %vm11742_vm5, %v10127_v46, %v3821_v61  ;;  %3837 = vst.msk [vmem:[#allocation3 + $0x208] sm:$0xff] %vm3543_vm4, %v3821_v61  ;;  %4643 = vmatpush1.bf16.msra.mxu0 %v4485_v56  ;;  %v4482_v46 = vpack.c.bf16 %v10147_v5, %v11746_v45  ;;  %v4358_v56 = vld [vmem:[#allocation3 + $0x250] sm:$0xff] }
 0x5d4   : > { %v4465_v43 = vpack.c.bf16 %v3825_v51, %v10023_v7  ;;  %v4472_v51 = vpack.c.bf16 %v4361_v9, %v4358_v56  ;;  %v4397_v9 = vld [vmem:[#allocation3 + $0x388] sm:$0xff] }
 0x5d6   : > { %v3994_v21 = vpop.permute.xlu0 %3993  ;;  %4603 = vmatprep.subr.bf16.mxu1 %v4465_v43  ;;  %v4313_v43 = vld [vmem:[#allocation3 + $0xe8] sm:$0xff]  ;;  %v4391_v56 = vld [vmem:[#allocation3 + $0x358] sm:$0xff] }
 0x5d7   : > { %v3999_v55 = vsel %vm11744_vm7, %v10140_v40, %v3994_v21  ;;  %4011 = vst.msk [vmem:[#allocation3 + $0x328] sm:$0xff] %vm3543_vm4, %v3994_v21  ;;  %4604 = vmatpush2.bf16.msra.mxu1 %v4464_v17  ;;  %v4461_v40 = vpack.c.bf16 %v10160_v36, %v11748_v10  ;;  %v11750_v36 = vld [vmem:[#allocation29_spill] sm:$0xff]  ;;  %v11754_v17 = vld [vmem:[#allocation47_spill] sm:$0xff]  ;;  %vm11769_vm7 = vcmask 523264  }
 0x5d8   : > { %v4483_v52 = vpack.c.bf16 %v3999_v55, %v11745_v41  ;;  %v4506_v14 = vpack.c.bf16 %v10173_v59, %v11750_v36  ;;  %v11751_v59 = vld [vmem:[#allocation52_spill] sm:$0xff]  ;;  %v4310_v21 = vld [vmem:[#allocation3 + $0xd0] sm:$0xff] }
 0x5d9   : > { %v4448_v55 = vpack.c.bf16 %v4313_v43, %v4310_v21  ;;  %v4352_v41 = vld [vmem:[#allocation3 + $0x220] sm:$0xff]  ;;  %v4418_v36 = vld [vmem:[#allocation3 + $0x430] sm:$0xff] }
 0x5da   : > { %v3792_v48 = vpop.permute.xlu0 %3791  ;;  %4644 = vmatprep.subr.bf16.mxu0 %v4483_v52  ;;  %v10360_v52 = vld [vmem:[%s11522_s4 + $0x20] ss:$16 sps:$4 sm:$0xff]  }
 0x5db   : > { %v3797_v7 = vsel %vm3793_vm9, %v10153_v13, %v3792_v48  ;;  %3809 = vst.msk [vmem:[#allocation3 + $0x1d8] sm:$0xff] %vm3543_vm4, %v3792_v48  ;;  %4645 = vmatpush1.bf16.msra.mxu0 %v4482_v46  ;;  %v4277_v13 = vld [vmem:[%s11522_s4 + $0x8] sm:$0xff]  ;;  %vm11752_vm9 = vcmask 130048   ;;  %v4469_v46 = vpack.c.bf16 %v4355_v11, %v4352_v41  ;;  %v4307_v48 = vld [vmem:[#allocation3 + $0xb8] sm:$0xff] }
 0x5dc   : > { %v4462_v23 = vpack.c.bf16 %v3797_v7, %v11747_v31  ;;  %v4424_v7 = vld [vmem:[#allocation3 + $0x460] sm:$0xff] }
 0x5de   : > { %v10300_v0 = vpop.permute.xlu0 %4253  ;;  %4605 = vmatprep.subr.bf16.mxu1 %v4462_v23  ;;  %v4349_v23 = vld [vmem:[#allocation3 + $0x208] sm:$0xff] }
 0x5df   : > { %v4262_v5 = vsel %vm4257_vm0, %v10166_v33, %v10300_v0  ;;  %4606 = vmatpush2.bf16.msra.mxu1 %v4461_v40  ;;  %v10314_v33 = vcombine.low %v4277_v13, %v4279_v3  ;;  %v4304_v40 = vld [vmem:[#allocation3 + $0xa0] sm:$0xff]  ;;  %v4466_v3 = vpack.c.bf16 %v4349_v23, %v4346_v22  ;;  %v4385_v43 = vld [vmem:[#allocation3 + $0x328] sm:$0xff] }
 0x5e0   : > { %v4507_v44 = vpack.c.bf16 %v4262_v5, %v11749_v19  ;;  %v4445_v5 = vpack.c.bf16 %v4307_v48, %v4304_v40  ;;  %v4301_v19 = vld [vmem:[#allocation3 + $0x88] sm:$0xff] }
 0x5e2   : > { %v3763_v29 = vpop.permute.xlu0 %3762  ;;  %4660 = vmatprep.subr.bf16.mxu0 %v4507_v44  ;;  %v11755_v44 = vld [vmem:[#allocation44_spill] sm:$0xff]  ;;  %v4343_v54 = vld [vmem:[#allocation3 + $0x1d8] sm:$0xff] }
 0x5e3   : > { %v3768_v28 = vsel %vm3764_vm14, %v10179_v39, %v3763_v29  ;;  %3780 = vst.msk [vmem:[#allocation3 + $0x1a8] sm:$0xff] %vm3543_vm4, %v3763_v29  ;;  %4661 = vmatpush2.bf16.msra.mxu0 %v4506_v14 }
 0x5e4   : > { %6476 = vmatprep.subr.bf16.mxu0 %v4481_v57  ;;  %v4459_v6 = vpack.c.bf16 %v3768_v28, %v11751_v59  ;;  %v4298_v57 = vld [vmem:[#allocation3 + $0x70] sm:$0xff]  ;;  %v4340_v28 = vld [vmem:[#allocation3 + $0x1c0] sm:$0xff] }
 0x5e5   : > { %v4442_v12 = vpack.c.bf16 %v4301_v19, %v4298_v57  ;;  %v4463_v59 = vpack.c.bf16 %v4343_v54, %v4340_v28 }
 0x5e6   : > { %v3759_v35 = vpop.permute.xlu0 %3758  ;;  %4607 = vmatprep.subr.bf16.mxu1 %v4459_v6  ;;  %4663 = vmatmul.mubr.bf16.vlgmr.msra.gmra.mxu0 %v10314_v33  ;;  %v4295_v6 = vld [vmem:[#allocation3 + $0x58] sm:$0xff] }
 0x5e7   : > { %v3767_v32 = vsel %vm3764_vm14, %v3759_v35, %v10179_v39  ;;  %6477 = vmatpush3.bf16.msra.mxu0 %v4457_v24  ;;  %6465 = vmatprep.mubr.msk.bf16.mxu0 %vm11752_vm9, %v10322_v63  ;;  %v4319_v39 = vld [vmem:[#allocation3 + $0x118] sm:$0xff]  ;;  %vm4966_vm14 = vcmask 318464  }
 0x5e8   : > { %6478 = vmatprep.subr.bf16.mxu0 %v4478_v27  ;;  %v4458_v42 = vpack.c.bf16 %v3767_v32, %v10193_v34  ;;  %v10344_v34 = vld [vmem:[%s11522_s4 + $0x28] ss:$16 sps:$4 sm:$0xff]   ;;  %v4451_v16 = vpack.c.bf16 %v4319_v39, %v4316_v50  ;;  %v4292_v27 = vld [vmem:[#allocation3 + $0x40] sm:$0xff]  ;;  %v4334_v32 = vld [vmem:[#allocation3 + $0x190] sm:$0xff] }
 0x5e9   : > { %v4439_v4 = vpack.c.bf16 %v4295_v6, %v4292_v27  ;;  %v4400_v39 = vld [vmem:[#allocation3 + $0x3a0] sm:$0xff]  ;;  %v4394_v50 = vld [vmem:[#allocation3 + $0x370] sm:$0xff] }
 0x5ea   : > { %v4221_v60 = vpop.permute.xlu0 %4220  ;;  %4608 = vmatpush2.bf16.msra.mxu1 %v4458_v42  ;;  %v4337_v2 = vld [vmem:[#allocation3 + $0x1a8] sm:$0xff] }
 0x5eb   : > { %v4228_v8 = vsel %vm4222_vm15, %v10183_v30, %v4221_v60  ;;  %6479 = vmatpush3.bf16.msra.mxu0 %v4454_v47  ;;  %4732 = vmatprep.subr.bf16.mxu1 %v11753_v20  ;;  %vm11756_vm15 = vmmov %vm11752_vm9  ;;  %v4460_v49 = vpack.c.bf16 %v4337_v2, %v4334_v32  ;;  %v4289_v42 = vld [vmem:[#allocation3 + $0x28] sm:$0xff]  ;;  %v4403_v60 = vld [vmem:[#allocation3 + $0x3b8] sm:$0xff] }
 0x5ec   : > { %4240 = vst.msk [vmem:[#allocation3 + $0x478] sm:$0xff] %vm3543_vm4, %v4228_v8  ;;  %6480 = vmatprep.subr.bf16.mxu0 %v4475_v1  ;;  %v4436_v1 = vpack.c.bf16 %v4289_v42, %v4286_v37  ;;  %v4493_v8 = vpack.c.bf16 %v4403_v60, %v4400_v39 }
 0x5ed   : > { %4610 = vmatmul.mubr.bf16.vlgmr.msra.gmra.mxu1 %v10334_v15 }
 0x5ee   : > { %v4186_v61 = vpop.permute.xlu0 %4185  ;;  %4619 = vmatprep.mubr.bf16.mxu1 %v10339_v62  ;;  %4673 = vmatmul.mubr.bf16.gmra.mxu0 %v10344_v34 }
 0x5ef   : > { %v4193_v30 = vsel %vm4187_vm6, %v10195_v58, %v4186_v61  ;;  %6481 = vmatpush3.bf16.msra.mxu0 %v4451_v16  ;;  %4715 = vmatprep.mubr.bf16.mxu0 %v11754_v17  ;;  %vm11757_vm6 = vmmov %vm11722_vm1  ;;  %v4490_v16 = vpack.c.bf16 %v4397_v9, %v4394_v50  ;;  %v4388_v61 = vld [vmem:[#allocation3 + $0x340] sm:$0xff]  ;;  %vm11761_vm1 = vcmask 883712  }
 0x5f0   : > { %4205 = vst.msk [vmem:[#allocation3 + $0x448] sm:$0xff] %vm3543_vm4, %v4193_v30  ;;  %6482 = vmatprep.subr.bf16.mxu0 %v4472_v51  ;;  %v4487_v51 = vpack.c.bf16 %v4391_v56, %v4388_v61  ;;  %v4382_v30 = vld [vmem:[#allocation3 + $0x310] sm:$0xff]  ;;  %v4960_v61 = vld [vmem:[%s11524_s6 + $0xf8] sm:$0xff]  ;;  %vm11762_vm10 = vmmov %vm11761_vm1 }
 0x5f1   : > { %vm11763_vm13 = vmmov %vm11761_vm1 }
 0x5f2   : > { %v4151_v45 = vpop.permute.xlu0 %4150  ;;  %vm11764_vm11 = vmmov %vm11761_vm1 }
 0x5f3   : > { %v4158_v58 = vsel %vm4152_vm8, %v10214_v18, %v4151_v45  ;;  %v4427_v31 = vld [vmem:[#allocation3 + $0x478] sm:$0xff]  ;;  %6483 = vmatpush3.bf16.msra.mxu0 %v4448_v55  ;;  %v4516_v45 = vpop.permute.xlu1 %4515  ;;  %vm11759_vm8 = vcmask 1046528   ;;  %vm11766_vm3 = vmmov %vm11761_vm1 }
 0x5f4   : > { %4170 = vst.msk [vmem:[#allocation3 + $0x418] sm:$0xff] %vm3543_vm4, %v4158_v58  ;;  %v4505_v10 = vpack.c.bf16 %v4427_v31, %v4424_v7  ;;  %6484 = vmatprep.subr.bf16.mxu0 %v4469_v46  ;;  %vm11767_vm2 = vmmov %vm11761_vm1 }
 0x5f5   : > { %4620 = vmatmul.mubr.bf16.gmra.mxu1 %v10360_v52  ;;  %vm11768_vm5 = vmmov %vm11761_vm1 }
 0x5f6   : > { %v4116_v13 = vpop.permute.xlu0 %4115  ;;  %4733 = vmatpush1.bf16.msra.mxu1 %v4505_v10  ;;  %6466 = vmatprep.mubr.msk.bf16.mxu1 %vm11756_vm15, %v11755_v44  ;;  %vm11771_vm15 = vmmov %vm11769_vm7 }
 0x5f7   : > { %v4123_v18 = vsel %vm11757_vm6, %v10234_v53, %v4116_v13  ;;  %4734 = vmatprep.subr.bf16.mxu1 %v11753_v20  ;;  %v4421_v14 = vld [vmem:[#allocation3 + $0x448] sm:$0xff]  ;;  %6485 = vmatpush3.bf16.msra.mxu0 %v4445_v5  ;;  %v10408_v2 = vpop.permute.xlu1 %4525  ;;  %vm11772_vm6 = vmmov %vm11769_vm7 }
 0x5f8   : > { %4135 = vst.msk [vmem:[#allocation3 + $0x3e8] sm:$0xff] %vm3543_vm4, %v4123_v18  ;;  %v4502_v29 = vpack.c.bf16 %v4421_v14, %v4418_v36  ;;  %6486 = vmatprep.subr.bf16.mxu0 %v4466_v3 }
 0x5fa   : > { %v4256_v25 = vpop.permute.xlu0 %4255  ;;  %4735 = vmatpush1.bf16.msra.mxu1 %v4502_v29 }
 0x5fb   : > { %v4263_v53 = vsel %vm4257_vm0, %v10300_v0, %v4256_v25  ;;  %4736 = vmatprep.subr.bf16.mxu1 %v11753_v20  ;;  %v4415_v24 = vld [vmem:[#allocation3 + $0x418] sm:$0xff]  ;;  %6487 = vmatpush3.bf16.msra.mxu0 %v4442_v12  ;;  %vm11760_vm0 = vmmov %vm11759_vm8 }
 0x5fc   : > { %4275 = vst.msk [vmem:[#allocation3 + $0x4a8] sm:$0xff] %vm3543_vm4, %v4263_v53  ;;  %v4499_v35 = vpack.c.bf16 %v4415_v24, %v4412_v38  ;;  %6488 = vmatprep.subr.bf16.mxu0 %v4463_v59  ;;  %vm11758_vm4 = vmmov %vm11752_vm9 }
 0x5fd   : > { %vm11770_vm9 = vmmov %vm11769_vm7 }
 0x5fe   : > { %4737 = vmatpush1.bf16.msra.mxu1 %v4499_v35 }
 0x5ff   : > { %4738 = vmatprep.subr.bf16.mxu1 %v11753_v20  ;;  %v4409_v0 = vld [vmem:[#allocation3 + $0x3e8] sm:$0xff]  ;;  %6489 = vmatpush3.bf16.msra.mxu0 %v4439_v4 }
 0x600   : > { %v4496_v47 = vpack.c.bf16 %v4409_v0, %v4406_v26  ;;  %6490 = vmatprep.subr.bf16.mxu0 %v4460_v49 }
 0x602   : > { %4739 = vmatpush1.bf16.msra.mxu1 %v4496_v47 }
 0x603   : > { %4740 = vmatprep.subr.bf16.mxu1 %v11753_v20  ;;  %6491 = vmatpush3.bf16.msra.mxu0 %v4436_v1  ;;  %v4433_v11 = vld [vmem:[#allocation3 + $0x4a8] sm:$0xff] }
 0x604   : > { %6504 = vmatprep.subr.mxu0 %v4960_v61  ;;  %v4931_v61 = vld [vmem:[%s11524_s6 + $0x10] sm:$0xff] }
 0x606   : > { %4741 = vmatpush1.bf16.msra.mxu1 %v4493_v8  ;;  %4716 = vmatmul.mubr.bf16.vlgmr.msra.gmra.mxu0 %v10334_v15  ;;  %v4484_v15 = vpack.c.bf16 %v4385_v43, %v4382_v30 }
 0x607   : > { %4742 = vmatprep.subr.bf16.mxu1 %v11753_v20  ;;  %4723 = vmatprep.mubr.bf16.mxu0 %v10339_v62  ;;  %v4430_v62 = vld [vmem:[#allocation3 + $0x490] sm:$0xff]  ;;  %v4521_v10 = vpop.permute.xlu0 %4520 }
 0x608   : > { %v4508_v17 = vpack.c.bf16 %v4433_v11, %v4430_v62  ;;  %v4959_v11 = vld [vmem:[%s11524_s6 + $0xf0] sm:$0xff] }
 0x60a   : > { %4743 = vmatpush1.bf16.msra.mxu1 %v4490_v16 }
 0x60b   : > { %4744 = vmatprep.subr.bf16.mxu1 %v11753_v20  ;;  %v10400_v44 = vpop.permute.xlu0 %4530 }
 0x60e   : > { %4745 = vmatpush1.bf16.msra.mxu1 %v4487_v51  ;;  %4724 = vmatmul.mubr.bf16.gmra.mxu0 %v10360_v52  ;;  %v4944_v51 = vld [vmem:[%s11524_s6 + $0x78] sm:$0xff] }
 0x60f   : > { %4746 = vmatprep.subr.bf16.mxu1 %v11753_v20  ;;  %6505 = vmatpush3.msra.mxu0 %v4944_v51  ;;  %v4946_v51 = vld [vmem:[%s11524_s6 + $0x88] sm:$0xff] }
 0x610   : > { %6506 = vmatprep.subr.mxu0 %v4959_v11  ;;  %v4930_v11 = vld [vmem:[%s11524_s6 + $0x8] sm:$0xff] }
 0x612   : > { %4747 = vmatpush1.bf16.msra.mxu1 %v4484_v15 }
 0x613   : > { %4762 = vmatprep.subr.bf16.mxu1 %v11753_v20 }
 0x616   : > { %4763 = vmatpush2.bf16.msra.mxu1 %v4508_v17  ;;  %v4943_v17 = vld [vmem:[%s11524_s6 + $0x70] sm:$0xff] }
 0x617   : > { %6507 = vmatpush3.msra.mxu0 %v4943_v17  ;;  %v4945_v17 = vld [vmem:[%s11524_s6 + $0x80] sm:$0xff] }
 0x619   : > { %4765 = vmatmul.mubr.bf16.vlgmr.msra.gmra.mxu1 %v10314_v33 }
 0x61a   : > { %6467 = vmatprep.mubr.msk.bf16.mxu1 %vm11758_vm4, %v10322_v63  ;;  %vm11773_vm4 = vmmov %vm11772_vm6 }
 0x621   : > { %4773 = vmatmul.mubr.bf16.gmra.mxu1 %v10344_v34 }
 0x6a6   : > { %v4664_v21 = vpop.f32.mrf.mxu0 }
 0x6a8   : > { %v4666_v55 = vpop.f32.mrf.mxu0 }
 0x6aa   : > { %v4668_v41 = vpop.f32.mrf.mxu0 }
 0x6ac   : > { %v4670_v52 = vpop.f32.mrf.mxu0 }
 0x6ad   : > { %v4611_v46 = vpop.f32.mrf.mxu1 }
 0x6ae   : > { %v4612_v48 = vadd.f32 %v4611_v46, %v4516_v45  ;;  %v4674_v7 = vpop.f32.mrf.mxu0  ;;  %v4957_v46 = vld [vmem:[%s11524_s6 + $0xe0] sm:$0xff] }
 0x6af   : > { %v4613_v58 = vpop.f32.mrf.mxu1 }
 0x6b0   : > { %v10389_v20 = vadd.f32 %v4664_v21, %v4612_v48  ;;  %v4614_v31 = vadd.f32 %v4613_v58, %v4516_v45  ;;  %v4676_v63 = vpop.f32.mrf.mxu0  ;;  %v4941_v58 = vld [vmem:[%s11524_s6 + $0x60] sm:$0xff] }
 0x6b1   : > { %v4615_v23 = vpop.f32.mrf.mxu1 }
 0x6b2   : > { %v10391_v33 = vadd.f32 %v4666_v55, %v4614_v31  ;;  %v4781_v34 = vmax.f32 %v10389_v20, 0.0  ;;  %v4678_v19 = vpop.f32.mrf.mxu0  ;;  %v4616_v24 = vadd.f32 %v4615_v23, %v4521_v10  ;;  %v4958_v55 = vld [vmem:[%s11524_s6 + $0xe8] sm:$0xff]  ;;  %v4940_v23 = vld [vmem:[%s11524_s6 + $0x58] sm:$0xff] }
 0x6b3   : > { %v4617_v40 = vpop.f32.mrf.mxu1  ;;  %6508 = vmatprep.subr.mxu0 %v4958_v55  ;;  %v4961_v55 = vld [vmem:[%s11524_s6 + $0x100] sm:$0xff] }
 0x6b4   : > { %v4782_v5 = vmax.f32 %v10391_v33, 0.0  ;;  %v4680_v54 = vpop.f32.mrf.mxu0  ;;  %v4618_v6 = vadd.f32 %v4617_v40, %v4521_v10  ;;  %v10413_v42 = vadd.f32 %v4668_v41, %v4616_v24  ;;  %v4955_v40 = vld [vmem:[%s11524_s6 + $0xd0] sm:$0xff]  ;;  %v4964_v24 = vld [vmem:[%s11524_s6 + $0x118] sm:$0xff] }
 0x6b5   : > { %v4621_v22 = vpop.f32.mrf.mxu1 }
 0x6b6   : > { %v7039_v13 = vpack.i.bf16 %v4781_v34, %v4782_v5  ;;  %v10410_v35 = vadd.f32 %v4670_v52, %v4618_v6  ;;  %v4622_v26 = vadd.f32 %v4621_v22, %v10408_v2  ;;  %v4784_v9 = vmax.f32 %v10413_v42, 0.0  ;;  %v4942_v52 = vld [vmem:[%s11524_s6 + $0x68] sm:$0xff] }
 0x6b7   : > { %v4623_v3 = vpop.f32.mrf.mxu1  ;;  %6509 = vmatpush3.msra.mxu0 %v4942_v52  ;;  %v4954_v22 = vld [vmem:[%s11524_s6 + $0xc8] sm:$0xff] }
 0x6b8   : > { %7040 = vrot.lane.b32.xlu1 %v7039_v13, %s11645_s12  ;;  %v4624_v27 = vadd.f32 %v4623_v3, %v10408_v2  ;;  %v4785_v37 = vmax.f32 %v10410_v35, 0.0  ;;  %v10423_v50 = vadd.f32 %v4674_v7, %v4622_v26  ;;  %v4956_v7 = vld [vmem:[%s11524_s6 + $0xd8] sm:$0xff]  ;;  %6510 = vmatprep.subr.mxu0 %v4957_v46  ;;  %v4938_v13 = vld [vmem:[%s11524_s6 + $0x48] sm:$0xff]  ;;  %v4953_v3 = vld [vmem:[%s11524_s6 + $0xc0] sm:$0xff] }
 0x6b9   : > { %v4625_v18 = vpop.f32.mrf.mxu1  ;;  %6511 = vmatpush3.msra.mxu0 %v4941_v58  ;;  %v4929_v46 = vld [vmem:[%s11524_s6] sm:$0xff] }
 0x6ba   : > { %v4626_v36 = vadd.f32 %v4625_v18, %v10400_v44  ;;  %v10419_v60 = vadd.f32 %v4676_v63, %v4624_v27  ;;  %v7044_v43 = vpack.i.bf16 %v4784_v9, %v4785_v37  ;;  %v4787_v21 = vmax.f32 %v10423_v50, 0.0  ;;  %6512 = vmatprep.subr.mxu0 %v4956_v7  ;;  %v4939_v63 = vld [vmem:[%s11524_s6 + $0x50] sm:$0xff]  ;;  %v4952_v18 = vld [vmem:[%s11524_s6 + $0xb8] sm:$0xff] }
 0x6bb   : > { %v4627_v14 = vpop.f32.mrf.mxu1  ;;  %6513 = vmatpush3.msra.mxu0 %v4940_v23  ;;  %v4932_v27 = vld [vmem:[%s11524_s6 + $0x18] sm:$0xff] }
 0x6bc   : > { %v4628_v29 = vadd.f32 %v4627_v14, %v10400_v44  ;;  %v10404_v57 = vadd.f32 %v4678_v19, %v4626_v36  ;;  %v4788_v30 = vmax.f32 %v10419_v60, 0.0  ;;  %6514 = vmatprep.subr.mxu0 %v4955_v40  ;;  %v4937_v19 = vld [vmem:[%s11524_s6 + $0x40] sm:$0xff]  ;;  %v4936_v36 = vld [vmem:[%s11524_s6 + $0x38] sm:$0xff]  ;;  %v4951_v14 = vld [vmem:[%s11524_s6 + $0xb0] sm:$0xff] }
 0x6bd   : > { %6515 = vmatpush3.msra.mxu0 %v4939_v63 }
 0x6be   : > { %v10406_v12 = vadd.f32 %v4680_v54, %v4628_v29  ;;  %6516 = vmatprep.subr.mxu0 %v4954_v22  ;;  %v4935_v54 = vld [vmem:[%s11524_s6 + $0x30] sm:$0xff]  ;;  %v4950_v29 = vld [vmem:[%s11524_s6 + $0xa8] sm:$0xff] }
 0x6bf   : > { %6517 = vmatpush3.msra.mxu0 %v4938_v13 }
 0x6c0   : > { %6518 = vmatprep.subr.mxu0 %v4953_v3 }
 0x6c1   : > { %6519 = vmatpush3.msra.mxu0 %v4937_v19 }
 0x6c2   : > { %6520 = vmatprep.subr.mxu0 %v4952_v18  ;;  %v4790_v18 = vmax.f32 %v10404_v57, 0.0 }
 0x6c3   : > { %6521 = vmatpush3.msra.mxu0 %v4936_v36 }
 0x6c4   : > { %6522 = vmatprep.subr.mxu0 %v4951_v14 }
 0x6c5   : > { %6523 = vmatpush3.msra.mxu0 %v4935_v54 }
 0x6c6   : > { %v6492_v28 = vpop.f32.mrf.mxu0  ;;  %6524 = vmatprep.subr.mxu0 %v4950_v29 }
 0x6c8   : > { %v6493_v25 = vpop.f32.mrf.mxu0 }
 0x6c9   : > { %v6494_v53 = vadd.f32 %v6493_v25, %v6492_v28  ;;  %v4934_v28 = vld [vmem:[%s11524_s6 + $0x28] sm:$0xff]  ;;  %v4949_v25 = vld [vmem:[%s11524_s6 + $0xa0] sm:$0xff] }
 0x6ca   : > { %v6495_v59 = vpop.f32.mrf.mxu0  ;;  %6525 = vmatpush3.msra.mxu0 %v4934_v28 }
 0x6cb   : > { %v4718_v32 = vadd.f32 %v6494_v53, %v4516_v45  ;;  %v7049_v45 = vpack.i.bf16 %v4787_v21, %v4788_v30  ;;  %6526 = vmatprep.subr.mxu0 %v4949_v25  ;;  %v4933_v53 = vld [vmem:[%s11524_s6 + $0x20] sm:$0xff] }
 0x6cc   : > { %v6496_v38 = vpop.f32.mrf.mxu0  ;;  %6527 = vmatpush3.msra.mxu0 %v4933_v53 }
 0x6cd   : > { %v6497_v4 = vadd.f32 %v6496_v38, %v6495_v59  ;;  %v4948_v38 = vld [vmem:[%s11524_s6 + $0x98] sm:$0xff] }
 0x6ce   : > { %v6498_v59 = vpop.f32.mrf.mxu0  ;;  %6528 = vmatprep.subr.mxu0 %v4948_v38 }
 0x6cf   : > { %v4721_v39 = vadd.f32 %v6497_v4, %v4521_v10  ;;  %v4965_v10 = vld [vmem:[%s11524_s6 + $0x120] sm:$0x7f]  ;;  %6529 = vmatpush3.msra.mxu0 %v4932_v27 }
 0x6d0   : > { %6837 = vmatprep.subr.msk.mxu1 %vm11759_vm8, %v4965_v10  ;;  %v6499_v6 = vpop.f32.mrf.mxu0  ;;  %vm11774_vm8 = vmmov %vm11773_vm4 }
 0x6d1   : > { %6838 = vmatpush3.msk.msra.mxu1 %vm11760_vm0, %v4965_v10  ;;  %vm11775_vm0 = vmmov %vm11773_vm4 }
 0x6d2   : > { %6839 = vmatprep.subr.mxu1 %v4964_v24  ;;  %v6501_v4 = vpop.f32.mrf.mxu0 }
 0x6d3   : > { %6840 = vmatpush3.msra.mxu1 %v4964_v24 }
 0x6d9   : > { %v4766_v49 = vpop.f32.mrf.mxu1 }
 0x6da   : > { %v10416_v0 = vadd.f32 %v4766_v49, %v4718_v32  ;;  %v6500_v49 = vadd.f32 %v6499_v6, %v6498_v59 }
 0x6db   : > { %v4768_v47 = vpop.f32.mrf.mxu1 }
 0x6dc   : > { %v4783_v1 = vmax.f32 %v10416_v0, 0.0  ;;  %v4726_v52 = vadd.f32 %v6500_v49, %v10408_v2 }
 0x6dd   : > { %v4769_v8 = vpop.f32.mrf.mxu1 }
 0x6de   : > { %v10425_v16 = vadd.f32 %v4769_v8, %v4721_v39  ;;  %4809 = vrot.lane.b32.xlu0 %v4783_v1, %s11645_s12  ;;  %v6502_v39 = vpop.f32.mrf.mxu0  ;;  %v4947_v8 = vld [vmem:[%s11524_s6 + $0x90] sm:$0xff] }
 0x6df   : > { %v4771_v56 = vpop.f32.mrf.mxu1  ;;  %6530 = vmatprep.subr.mxu0 %v4947_v8 }
 0x6e0   : > { %v4786_v15 = vmax.f32 %v10425_v16, 0.0  ;;  %v4963_v56 = vld [vmem:[%s11524_s6 + $0x110] sm:$0xff]  ;;  %6531 = vmatpush3.msra.mxu0 %v4931_v61 }
 0x6e1   : > { %v10445_v62 = vpop.f32.mrf.mxu1  ;;  %6841 = vmatprep.subr.mxu1 %v4963_v56  ;;  %6532 = vmatprep.subr.mxu0 %v4946_v51 }
 0x6e2   : > { %7045 = vrot.lane.b32.xlu0 %v7044_v43, %s11645_s12  ;;  %4815 = vrot.lane.b32.xlu1 %v4786_v15, %s11645_s12  ;;  %v4962_v43 = vld [vmem:[%s11524_s6 + $0x108] sm:$0xff]  ;;  %v4775_v7 = vadd.f32 %v10445_v62, %v4726_v52 }
 0x6e3   : > { %v4776_v41 = vpop.f32.mrf.mxu1  ;;  %6842 = vmatpush3.msra.mxu1 %v4963_v56  ;;  %6533 = vmatpush3.msra.mxu0 %v4930_v11 }
 0x6e4   : > { %v6503_v41 = vadd.f32 %v6502_v39, %v6501_v4  ;;  %6843 = vmatprep.subr.mxu1 %v4962_v43  ;;  %6534 = vmatprep.subr.mxu0 %v4945_v17  ;;  %v4789_v22 = vmax.f32 %v4775_v7, 0.0  ;;  %v5307_v7 = vld [vmem:[%s11525_s7 + $0x178] sm:$0xff] }
 0x6e5   : > { %v10468_v48 = vpop.f32.mrf.mxu1  ;;  %6844 = vmatpush3.msra.mxu1 %v4962_v43  ;;  %6535 = vmatpush3.msra.mxu0 %v4929_v46  ;;  %v5323_v46 = vld [vmem:[%s11525_s7 + $0x1f8] sm:$0xff] }
 0x6e6   : > { %7050 = vrot.lane.b32.xlu1 %v7049_v45, %s11645_s12  ;;  %6845 = vmatprep.subr.mxu1 %v4961_v55  ;;  %v4729_v40 = vadd.f32 %v6503_v41, %v10400_v44 }
 0x6e7   : > { %v4779_v31 = vpop.f32.mrf.mxu1  ;;  %6846 = vmatpush3.msra.mxu1 %v4961_v55 }
 0x6e8   : > { %v4778_v0 = vadd.f32 %v10468_v48, %v4729_v40  ;;  %v4791_v48 = vmax.f32 %v10406_v12, 0.0  ;;  %6592 = vmatprep.subr.mxu1 %v5323_v46  ;;  %v5289_v40 = vld [vmem:[%s11525_s7 + $0xe8] sm:$0xff] }
 0x6ea   : > { %v4792_v19 = vmax.f32 %v4778_v0, 0.0  ;;  %v7064_v14 = vpack.i.bf16 %v4790_v18, %v4791_v48  ;;  %v5288_v0 = vld [vmem:[%s11525_s7 + $0xe0] sm:$0xff] }
 0x72a   : > { %v7041_v32 = vpop.permute.xlu1 %7040 }
 0x72b   : > { %v7043_v26 = vunpack.i.h.bf16 %v7041_v32  ;;  %v7042_v47 = vunpack.i.l.bf16 %v7041_v32 }
 0x72d   : > { %v4829_v45 = vsel %vm349_vm12, %v7043_v26, %v7042_v47 }
 0x72e   : > { %v4849_v2 = vmax.f32 %v4781_v34, %v4829_v45  ;;  %v5291_v45 = vld [vmem:[%s11525_s7 + $0xf8] sm:$0xff] }
 0x72f   : > { %6557 = vmatprep.subr.mxu0 %v5291_v45 }
 0x750   : > { %v4810_v58 = vpop.permute.xlu0 %4809 }
 0x751   : > { %v4830_v31 = vsel %vm349_vm12, %v7042_v47, %v4810_v58  ;;  %v4851_v23 = vmax.f32 %v4783_v1, %v4810_v58  ;;  %v5275_v58 = vld [vmem:[%s11525_s7 + $0x78] sm:$0xff] }
 0x752   : > { %v4850_v10 = vmax.f32 %v4782_v5, %v4830_v31  ;;  %v5290_v31 = vld [vmem:[%s11525_s7 + $0xf0] sm:$0xff] }
 0x753   : > { %4877 = vrot.lane.b32.xlu0 %v4851_v23, %s11624_s26 }
 0x754   : > { %v7054_v62 = vpack.i.bf16 %v4849_v2, %v4850_v10  ;;  %v7046_v63 = vpop.permute.xlu0 %7045  ;;  %v4816_v3 = vpop.permute.xlu1 %4815 }
 0x755   : > { %v7048_v1 = vunpack.i.h.bf16 %v7046_v63  ;;  %v7047_v13 = vunpack.i.l.bf16 %v7046_v63  ;;  %v4854_v44 = vmax.f32 %v4786_v15, %v4816_v3  ;;  %v5273_v63 = vld [vmem:[%s11525_s7 + $0x68] sm:$0xff] }
 0x756   : > { %7055 = vrot.lane.b32.xlu1 %v7054_v62, %s11624_s26  ;;  %v5321_v62 = vld [vmem:[%s11525_s7 + $0x1e8] sm:$0xff] }
 0x757   : > { %v4831_v20 = vsel %vm349_vm12, %v7048_v1, %v7047_v13  ;;  %v4832_v33 = vsel %vm349_vm12, %v7047_v13, %v4816_v3  ;;  %4821 = vrot.lane.b32.xlu0 %v4789_v22, %s11645_s12  ;;  %v5320_v1 = vld [vmem:[%s11525_s7 + $0x1e0] sm:$0xff] }
 0x758   : > { %v4852_v34 = vmax.f32 %v4784_v9, %v4831_v20  ;;  %v4853_v5 = vmax.f32 %v4785_v37, %v4832_v33  ;;  %v7051_v35 = vpop.permute.xlu1 %7050  ;;  %v5272_v13 = vld [vmem:[%s11525_s7 + $0x60] sm:$0xff]  ;;  %v5287_v20 = vld [vmem:[%s11525_s7 + $0xd8] sm:$0xff] }
 0x759   : > { %v7053_v42 = vunpack.i.h.bf16 %v7051_v35  ;;  %v7052_v37 = vunpack.i.l.bf16 %v7051_v35  ;;  %v5304_v3 = vld [vmem:[%s11525_s7 + $0x160] sm:$0xff]  ;;  %v5319_v33 = vld [vmem:[%s11525_s7 + $0x1d8] sm:$0xff]  ;;  %v5269_v35 = vld [vmem:[%s11525_s7 + $0x48] sm:$0xff] }
 0x75a   : > { %4883 = vrot.lane.b32.xlu1 %v4854_v44, %s11624_s26  ;;  %v7059_v36 = vpack.i.bf16 %v4852_v34, %v4853_v5 }
 0x75b   : > { %4827 = vrot.lane.b32.xlu0 %v4792_v19, %s11645_s12  ;;  %v4833_v12 = vsel %vm349_vm12, %v7053_v42, %v7052_v37  ;;  %v5301_v42 = vld [vmem:[%s11525_s7 + $0x148] sm:$0xff] }
 0x75c   : > { %v10600_v6 = vmax.f32 %v4787_v21, %v4833_v12  ;;  %v5300_v12 = vld [vmem:[%s11525_s7 + $0x140] sm:$0xff] }
 0x75e   : > { %7060 = vrot.lane.b32.xlu1 %v7059_v36, %s11624_s26  ;;  %v5285_v36 = vld [vmem:[%s11525_s7 + $0xc8] sm:$0xff] }
 0x75f   : > { %7065 = vrot.lane.b32.xlu0 %v7064_v14, %s11645_s12  ;;  %v5317_v14 = vld [vmem:[%s11525_s7 + $0x1c8] sm:$0xff] }
 0x7c5   : > { %v4878_v9 = vpop.permute.xlu0 %4877 }
 0x7c6   : > { %v4919_v16 = vmax.f32 %v4851_v23, %v4878_v9  ;;  %v5322_v23 = vld [vmem:[%s11525_s7 + $0x1f0] sm:$0xff] }
 0x7c8   : > { %6847 = vmatprep.mubr.msk.f32.mxu1 %vm4966_vm14, %v4919_v16  ;;  %v7056_v15 = vpop.permute.xlu1 %7055  ;;  %v5268_v16 = vld [vmem:[%s11525_s7 + $0x40] sm:$0xff] }
 0x7c9   : > { %v7058_v57 = vunpack.i.h.bf16 %v7056_v15  ;;  %v7057_v54 = vunpack.i.l.bf16 %v7056_v15  ;;  %v4822_v29 = vpop.permute.xlu0 %4821  ;;  %v5283_v15 = vld [vmem:[%s11525_s7 + $0xb8] sm:$0xff] }
 0x7ca   : > { %v4834_v28 = vsel %vm349_vm12, %v7052_v37, %v4822_v29  ;;  %v10595_v25 = vmax.f32 %v4789_v22, %v4822_v29  ;;  %v5305_v22 = vld [vmem:[%s11525_s7 + $0x168] sm:$0xff]  ;;  %v5284_v37 = vld [vmem:[%s11525_s7 + $0xc0] sm:$0xff]  ;;  %v5299_v29 = vld [vmem:[%s11525_s7 + $0x138] sm:$0xff] }
 0x7cb   : > { %v4897_v59 = vsel %vm11761_vm1, %v7058_v57, %v7057_v54  ;;  %v10604_v53 = vmax.f32 %v4788_v30, %v4834_v28  ;;  %v4898_v38 = vsel %vm11762_vm10, %v7057_v54, %v4878_v9  ;;  %v5316_v9 = vld [vmem:[%s11525_s7 + $0x1c0] sm:$0xff]  ;;  %v5315_v57 = vld [vmem:[%s11525_s7 + $0x1b8] sm:$0xff]  ;;  %v5282_v28 = vld [vmem:[%s11525_s7 + $0xb0] sm:$0xff] }
 0x7cc   : > { %v4917_v24 = vmax.f32 %v4849_v2, %v4897_v59  ;;  %4889 = vrot.lane.b32.xlu0 %v10595_v25, %s11624_s26  ;;  %v4884_v27 = vpop.permute.xlu1 %4883  ;;  %v4918_v4 = vmax.f32 %v4850_v10, %v4898_v38  ;;  %v5274_v2 = vld [vmem:[%s11525_s7 + $0x70] sm:$0xff]  ;;  %v5267_v54 = vld [vmem:[%s11525_s7 + $0x38] sm:$0xff]  ;;  %vm11778_vm10 = vmmov %vm11775_vm0 }
 0x7cd   : > { %v7069_v32 = vpack.i.bf16 %v10600_v6, %v10604_v53  ;;  %v4922_v49 = vmax.f32 %v4854_v44, %v4884_v27  ;;  %v4828_v26 = vpop.permute.xlu0 %4827  ;;  %v5306_v10 = vld [vmem:[%s11525_s7 + $0x170] sm:$0xff] }
 0x7ce   : > { %5046 = vmatprep.mubr.f32.mxu0 %v4918_v4  ;;  %v10613_v50 = vmax.f32 %v4792_v19, %v4828_v26  ;;  %v5286_v44 = vld [vmem:[%s11525_s7 + $0xd0] sm:$0xff]  ;;  %v5313_v4 = vld [vmem:[%s11525_s7 + $0x1a8] sm:$0xff] }
 0x7cf   : > { %7070 = vrot.lane.b32.xlu1 %v7069_v32, %s11624_s26  ;;  %5047 = vmatmul.mubr.f32.vlgmr.msra.gmra.mxu0 %v4917_v24  ;;  %v5270_v19 = vld [vmem:[%s11525_s7 + $0x50] sm:$0xff]  ;;  %v5265_v32 = vld [vmem:[%s11525_s7 + $0x28] sm:$0xff] }
 0x7d0   : > { %6848 = vmatmul.mubr.msk.f32.vlgmr.msra.gmra.mxu1 %vm4966_vm14, %v4922_v49  ;;  %v7061_v60 = vpop.permute.xlu1 %7060  ;;  %6558 = vmatpush3.msra.mxu0 %v5275_v58  ;;  %v5314_v59 = vld [vmem:[%s11525_s7 + $0x1b0] sm:$0xff]  ;;  %v5297_v49 = vld [vmem:[%s11525_s7 + $0x128] sm:$0xff] }
 0x7d1   : > { %v7063_v30 = vunpack.i.h.bf16 %v7061_v60  ;;  %v7062_v21 = vunpack.i.l.bf16 %v7061_v60  ;;  %v7066_v47 = vpop.permute.xlu0 %7065  ;;  %6593 = vmatpush3.msra.mxu1 %v5307_v7  ;;  %6559 = vmatprep.subr.mxu0 %v5290_v31  ;;  %v5266_v38 = vld [vmem:[%s11525_s7 + $0x30] sm:$0xff]  ;;  %v5312_v60 = vld [vmem:[%s11525_s7 + $0x1a0] sm:$0xff] }
 0x7d2   : > { %v7068_v39 = vunpack.i.h.bf16 %v7066_v47  ;;  %v7067_v8 = vunpack.i.l.bf16 %v7066_v47  ;;  %6594 = vmatprep.subr.mxu1 %v5322_v23  ;;  %6560 = vmatpush3.msra.mxu0 %v5274_v2  ;;  %v5298_v24 = vld [vmem:[%s11525_s7 + $0x130] sm:$0xff] }
 0x7d3   : > { %4895 = vrot.lane.b32.xlu1 %v10613_v50, %s11624_s26  ;;  %v4900_v56 = vsel %vm11763_vm13, %v7062_v21, %v4884_v27  ;;  %v4899_v61 = vsel %vm11764_vm11, %v7063_v30, %v7062_v21  ;;  %6595 = vmatpush3.msra.mxu1 %v5306_v10  ;;  %v5281_v27 = vld [vmem:[%s11525_s7 + $0xa8] sm:$0xff]  ;;  %v5264_v30 = vld [vmem:[%s11525_s7 + $0x20] sm:$0xff]  ;;  %v5310_v10 = vld [vmem:[%s11525_s7 + $0x190] sm:$0xff] }
 0x7d4   : > { %v4835_v51 = vsel %vm349_vm12, %v7068_v39, %v7067_v8  ;;  %v4836_v43 = vsel %vm349_vm12, %v7067_v8, %v4828_v26  ;;  %v4921_v11 = vmax.f32 %v4853_v5, %v4900_v56  ;;  %v4920_v17 = vmax.f32 %v4852_v34, %v4899_v61  ;;  %6561 = vmatprep.subr.mxu0 %v5289_v40  ;;  %v5271_v34 = vld [vmem:[%s11525_s7 + $0x58] sm:$0xff]  ;;  %v5280_v26 = vld [vmem:[%s11525_s7 + $0xa0] sm:$0xff]  ;;  %vm11765_vm12 = vmmov %vm11761_vm1 }
 0x7d5   : > { %v10621_v55 = vmax.f32 %v4790_v18, %v4835_v51  ;;  %v10623_v41 = vmax.f32 %v4791_v48, %v4836_v43  ;;  %6596 = vmatprep.subr.mxu1 %v5321_v62  ;;  %6562 = vmatpush3.msra.mxu0 %v5273_v63  ;;  %v5303_v5 = vld [vmem:[%s11525_s7 + $0x158] sm:$0xff]  ;;  %v5318_v48 = vld [vmem:[%s11525_s7 + $0x1d0] sm:$0xff]  ;;  %v5296_v21 = vld [vmem:[%s11525_s7 + $0x120] sm:$0xff] }
 0x7d6   : > { %5051 = vmatprep.mubr.f32.mxu0 %v4921_v11  ;;  %6597 = vmatpush3.msra.mxu1 %v5305_v22  ;;  %v5302_v18 = vld [vmem:[%s11525_s7 + $0x150] sm:$0xff]  ;;  %v5277_v63 = vld [vmem:[%s11525_s7 + $0x88] sm:$0xff]  ;;  %vm11777_vm1 = vmmov %vm11775_vm0 }
 0x7d7   : > { %5052 = vmatmul.mubr.f32.gmra.mxu0 %v4920_v17  ;;  %v7074_v52 = vpack.i.bf16 %v10621_v55, %v10623_v41  ;;  %6563 = vmatprep.subr.mxu0 %v5288_v0  ;;  %v5262_v40 = vld [vmem:[%s11525_s7 + $0x10] sm:$0xff]  ;;  %v5309_v22 = vld [vmem:[%s11525_s7 + $0x188] sm:$0xff]  ;;  %vm11779_vm13 = vmmov %vm11775_vm0 }
 0x7d8   : > { %6598 = vmatprep.subr.mxu1 %v5320_v1  ;;  %6564 = vmatpush3.msra.mxu0 %v5272_v13  ;;  %v5294_v62 = vld [vmem:[%s11525_s7 + $0x110] sm:$0xff]  ;;  %v5261_v1 = vld [vmem:[%s11525_s7 + $0x8] sm:$0xff]  ;;  %vm11780_vm11 = vmmov %vm11775_vm0 }
 0x7d9   : > { %7075 = vrot.lane.b32.xlu0 %v7074_v52, %s11624_s26  ;;  %6599 = vmatpush3.msra.mxu1 %v5304_v3  ;;  %v5293_v13 = vld [vmem:[%s11525_s7 + $0x108] sm:$0xff]  ;;  %v5276_v3 = vld [vmem:[%s11525_s7 + $0x80] sm:$0xff] }
 0x7da   : > { %6565 = vmatprep.subr.mxu0 %v5287_v20  ;;  %6600 = vmatprep.subr.mxu1 %v5319_v33  ;;  %v5308_v33 = vld [vmem:[%s11525_s7 + $0x180] sm:$0xff] }
 0x7db   : > { %6566 = vmatpush3.msra.mxu0 %v5271_v34  ;;  %6601 = vmatpush3.msra.mxu1 %v5303_v5  ;;  %v5260_v34 = vld [vmem:[%s11525_s7] sm:$0xff] }
 0x7dc   : > { %6567 = vmatprep.subr.mxu0 %v5286_v44  ;;  %6602 = vmatprep.subr.mxu1 %v5318_v48  ;;  %v5292_v5 = vld [vmem:[%s11525_s7 + $0x100] sm:$0xff]  ;;  %v5355_v48 = vld [vmem:[%s11525_s7 + $0x2f8] sm:$0xff] }
 0x7dd   : > { %6568 = vmatpush3.msra.mxu0 %v5270_v19  ;;  %6603 = vmatpush3.msra.mxu1 %v5302_v18  ;;  %v5387_v19 = vld [vmem:[%s11525_s7 + $0x3f8] sm:$0xff] }
 0x7de   : > { %6569 = vmatprep.subr.mxu0 %v5285_v36  ;;  %6604 = vmatprep.subr.mxu1 %v5317_v14 }
 0x7df   : > { %6570 = vmatpush3.msra.mxu0 %v5269_v35  ;;  %6605 = vmatpush3.msra.mxu1 %v5301_v42 }
 0x7e0   : > { %6571 = vmatprep.subr.mxu0 %v5284_v37  ;;  %6606 = vmatprep.subr.mxu1 %v5316_v9 }
 0x7e1   : > { %6572 = vmatpush3.msra.mxu0 %v5268_v16  ;;  %6607 = vmatpush3.msra.mxu1 %v5300_v12 }
 0x7e2   : > { %6573 = vmatprep.subr.mxu0 %v5283_v15  ;;  %6608 = vmatprep.subr.mxu1 %v5315_v57 }
 0x7e3   : > { %6574 = vmatpush3.msra.mxu0 %v5267_v54  ;;  %6609 = vmatpush3.msra.mxu1 %v5299_v29 }
 0x7e4   : > { %6575 = vmatprep.subr.mxu0 %v5282_v28  ;;  %6610 = vmatprep.subr.mxu1 %v5314_v59 }
 0x7e5   : > { %6576 = vmatpush3.msra.mxu0 %v5266_v38  ;;  %6611 = vmatpush3.msra.mxu1 %v5298_v24 }
 0x7e6   : > { %6577 = vmatprep.subr.mxu0 %v5281_v27  ;;  %6612 = vmatprep.subr.mxu1 %v5313_v4 }
 0x7e7   : > { %6578 = vmatpush3.msra.mxu0 %v5265_v32  ;;  %6613 = vmatpush3.msra.mxu1 %v5297_v49 }
 0x7e8   : > { %6579 = vmatprep.subr.mxu0 %v5280_v26  ;;  %6614 = vmatprep.subr.mxu1 %v5312_v60 }
 0x7e9   : > { %6580 = vmatpush3.msra.mxu0 %v5264_v30  ;;  %6615 = vmatpush3.msra.mxu1 %v5296_v21 }
 0x83e   : > { %v4890_v47 = vpop.permute.xlu0 %4889 }
 0x83f   : > { %v4925_v39 = vmax.f32 %v10595_v25, %v4890_v47 }
 0x841   : > { %6850 = vmatprep.mubr.msk.f32.mxu1 %vm4966_vm14, %v4925_v39  ;;  %v7071_v8 = vpop.permute.xlu1 %7070 }
 0x842   : > { %v7073_v56 = vunpack.i.h.bf16 %v7071_v8  ;;  %v7072_v61 = vunpack.i.l.bf16 %v7071_v8 }
 0x844   : > { %v4902_v51 = vsel %vm11765_vm12, %v7072_v61, %v4890_v47  ;;  %v4901_v43 = vsel %vm11766_vm3, %v7073_v56, %v7072_v61  ;;  %vm11781_vm12 = vmmov %vm11775_vm0 }
 0x845   : > { %v4896_v11 = vpop.permute.xlu1 %4895  ;;  %v4924_v17 = vmax.f32 %v10604_v53, %v4902_v51  ;;  %v4923_v52 = vmax.f32 %v10600_v6, %v4901_v43  ;;  %v5279_v6 = vld [vmem:[%s11525_s7 + $0x98] sm:$0xff]  ;;  %vm11782_vm3 = vmmov %vm11775_vm0 }
 0x846   : > { %v4928_v45 = vmax.f32 %v10613_v50, %v4896_v11  ;;  %v5311_v53 = vld [vmem:[%s11525_s7 + $0x198] sm:$0xff]  ;;  %6581 = vmatprep.subr.mxu0 %v5279_v6 }
 0x847   : > { %5056 = vmatprep.mubr.f32.mxu0 %v4924_v17  ;;  %v5263_v50 = vld [vmem:[%s11525_s7 + $0x18] sm:$0xff]  ;;  %6616 = vmatprep.subr.mxu1 %v5311_v53 }
 0x848   : > { %5057 = vmatmul.mubr.f32.gmra.mxu0 %v4923_v52  ;;  %6851 = vmatmul.mubr.msk.f32.gmra.mxu1 %vm4966_vm14, %v4928_v45  ;;  %vm11776_vm14 = vmmov %vm11775_vm0 }
 0x849   : > { %6582 = vmatpush3.msra.mxu0 %v5263_v50  ;;  %v5354_v50 = vld [vmem:[%s11525_s7 + $0x2f0] sm:$0xff] }
 0x84b   : > { %v7076_v25 = vpop.permute.xlu0 %7075 }
 0x84c   : > { %v7078_v46 = vunpack.i.h.bf16 %v7076_v25  ;;  %v7077_v58 = vunpack.i.l.bf16 %v7076_v25 }
 0x84e   : > { %v4904_v7 = vsel %vm11767_vm2, %v7077_v58, %v4896_v11  ;;  %v4903_v31 = vsel %vm11768_vm5, %v7078_v46, %v7077_v58  ;;  %v5371_v46 = vld [vmem:[%s11525_s7 + $0x378] sm:$0xff]  ;;  %vm11783_vm2 = vmmov %vm11775_vm0 }
 0x84f   : > { %v4927_v23 = vmax.f32 %v10623_v41, %v4904_v7  ;;  %v4926_v2 = vmax.f32 %v10621_v55, %v4903_v31  ;;  %v5295_v55 = vld [vmem:[%s11525_s7 + $0x118] sm:$0xff]  ;;  %v5278_v41 = vld [vmem:[%s11525_s7 + $0x90] sm:$0xff]  ;;  %vm11784_vm5 = vmmov %vm11775_vm0 }
 0x850   : > { %6617 = vmatpush3.msra.mxu1 %v5295_v55  ;;  %6583 = vmatprep.subr.mxu0 %v5278_v41  ;;  %v5339_v31 = vld [vmem:[%s11525_s7 + $0x278] sm:$0xff] }
 0x851   : > { %5061 = vmatprep.mubr.f32.mxu0 %v4927_v23  ;;  %6618 = vmatprep.subr.mxu1 %v5310_v10  ;;  %v5386_v23 = vld [vmem:[%s11525_s7 + $0x3f0] sm:$0xff] }
 0x852   : > { %5062 = vmatmul.mubr.f32.gmra.mxu0 %v4926_v2  ;;  %6619 = vmatpush3.msra.mxu1 %v5294_v62  ;;  %v5370_v10 = vld [vmem:[%s11525_s7 + $0x370] sm:$0xff] }
 0x853   : > { %6584 = vmatpush3.msra.mxu0 %v5262_v40  ;;  %6620 = vmatprep.subr.mxu1 %v5309_v22  ;;  %v5338_v62 = vld [vmem:[%s11525_s7 + $0x270] sm:$0xff] }
 0x854   : > { %6585 = vmatprep.subr.mxu0 %v5277_v63  ;;  %6621 = vmatpush3.msra.mxu1 %v5293_v13  ;;  %v5385_v63 = vld [vmem:[%s11525_s7 + $0x3e8] sm:$0xff] }
 0x855   : > { %6586 = vmatpush3.msra.mxu0 %v5261_v1  ;;  %6622 = vmatprep.subr.mxu1 %v5308_v33  ;;  %v5353_v1 = vld [vmem:[%s11525_s7 + $0x2e8] sm:$0xff] }
 0x856   : > { %6587 = vmatprep.subr.mxu0 %v5276_v3  ;;  %6623 = vmatpush3.msra.mxu1 %v5292_v5  ;;  %v5369_v13 = vld [vmem:[%s11525_s7 + $0x368] sm:$0xff]  ;;  %v5384_v5 = vld [vmem:[%s11525_s7 + $0x3e0] sm:$0xff] }
 0x857   : > { %6588 = vmatpush3.msra.mxu0 %v5260_v34  ;;  %6662 = vmatprep.subr.mxu1 %v5387_v19  ;;  %v5337_v34 = vld [vmem:[%s11525_s7 + $0x268] sm:$0xff]  ;;  %v5368_v19 = vld [vmem:[%s11525_s7 + $0x360] sm:$0xff] }
 0x858   : > { %6627 = vmatprep.subr.mxu0 %v5355_v48  ;;  %v5352_v48 = vld [vmem:[%s11525_s7 + $0x2e0] sm:$0xff] }
 0x88f   : > { %v6536_v0 = vpop.f32.mrf.mxu0 }
 0x890   : > { %v6849_v20 = vpop.f32.mrf.mxu1 }
 0x891   : > { %v6537_v44 = vpop.f32.mrf.mxu0 }
 0x892   : > { %v6538_v18 = vadd.f32 %v6537_v44, %v6536_v0  ;;  %v5133_v36 = vpop.f32.mrf.mxu1 }
 0x894   : > { %v5134_v14 = vadd.f32 %v6538_v18, %v5133_v36 }
 0x896   : > { %v5165_v35 = vrot.slane %v5134_v14, 5  ;;  %v5171_v42 = vrot.slane %v5134_v14, 7  ;;  %v5153_v37 = vrot.slane %v5134_v14, 1  ;;  %v5159_v9 = vrot.slane %v5134_v14, 3 }
 0x897   : > { %v6539_v16 = vpop.f32.mrf.mxu0  ;;  %v5169_v39 = vrot.slane %v5134_v14, 6  ;;  %v5163_v8 = vrot.slane %v5134_v14, 4  ;;  %v5157_v17 = vrot.slane %v5134_v14, 2 }
 0x898   : > { %v7084_v12 = vpack.i.bf16 %v5165_v35, %v5171_v42  ;;  %v7079_v15 = vpack.i.bf16 %v5153_v37, %v5159_v9  ;;  %v5336_v35 = vld [vmem:[%s11525_s7 + $0x260] sm:$0xff]  ;;  %v5351_v42 = vld [vmem:[%s11525_s7 + $0x2d8] sm:$0xff] }
 0x899   : > { %v6540_v57 = vpop.f32.mrf.mxu0  ;;  %v5383_v9 = vld [vmem:[%s11525_s7 + $0x3d8] sm:$0xff] }
 0x89a   : > { %v6541_v54 = vadd.f32 %v6540_v57, %v6539_v16  ;;  %7085 = vrot.lane.b32.xlu0 %v7084_v12, %s11635_s25  ;;  %7080 = vrot.lane.b32.xlu1 %v7079_v15, %s11635_s25  ;;  %v5335_v12 = vld [vmem:[%s11525_s7 + $0x258] sm:$0xff] }
 0x89c   : > { %v10840_v29 = vadd.f32 %v6849_v20, %v6541_v54 }
 0x89e   : > { %v5188_v28 = vrot.slane %v10840_v29, 5  ;;  %v5194_v59 = vrot.slane %v10840_v29, 7  ;;  %v5176_v38 = vrot.slane %v10840_v29, 1  ;;  %v5182_v24 = vrot.slane %v10840_v29, 3 }
 0x89f   : > { %v5180_v18 = vrot.slane %v10840_v29, 2  ;;  %v5192_v36 = vrot.slane %v10840_v29, 6 }
 0x8a0   : > { %v7094_v27 = vpack.i.bf16 %v5188_v28, %v5194_v59  ;;  %v7089_v4 = vpack.i.bf16 %v5176_v38, %v5182_v24  ;;  %v5367_v59 = vld [vmem:[%s11525_s7 + $0x358] sm:$0xff]  ;;  %v5350_v38 = vld [vmem:[%s11525_s7 + $0x2d0] sm:$0xff] }
 0x8a1   : > { %v5382_v24 = vld [vmem:[%s11525_s7 + $0x3d0] sm:$0xff] }
 0x8a2   : > { %7095 = vrot.lane.b32.xlu0 %v7094_v27, %s11635_s25  ;;  %7090 = vrot.lane.b32.xlu1 %v7089_v4, %s11635_s25  ;;  %v5334_v27 = vld [vmem:[%s11525_s7 + $0x250] sm:$0xff] }
 0x8a3   : > { %v5366_v4 = vld [vmem:[%s11525_s7 + $0x350] sm:$0xff] }
 0x908   : > { %v6542_v32 = vpop.f32.mrf.mxu0  ;;  %v6852_v49 = vpop.f32.mrf.mxu1 }
 0x90a   : > { %v6543_v26 = vpop.f32.mrf.mxu0  ;;  %v5143_v30 = vpop.f32.mrf.mxu1 }
 0x90b   : > { %v6544_v60 = vadd.f32 %v6543_v26, %v6542_v32  ;;  %v5349_v32 = vld [vmem:[%s11525_s7 + $0x2c8] sm:$0xff] }
 0x90c   : > { %v7086_v21 = vpop.permute.xlu0 %7085  ;;  %v7081_v47 = vpop.permute.xlu1 %7080  ;;  %v5381_v26 = vld [vmem:[%s11525_s7 + $0x3c8] sm:$0xff] }
 0x90d   : > { %v10848_v56 = vadd.f32 %v6544_v60, %v5143_v30  ;;  %v7088_v61 = vunpack.i.h.bf16 %v7086_v21  ;;  %v7087_v51 = vunpack.i.l.bf16 %v7086_v21  ;;  %v7083_v43 = vunpack.i.h.bf16 %v7081_v47  ;;  %v5365_v30 = vld [vmem:[%s11525_s7 + $0x348] sm:$0xff] }
 0x90e   : > { %v7082_v11 = vunpack.i.l.bf16 %v7081_v47  ;;  %v5333_v21 = vld [vmem:[%s11525_s7 + $0x248] sm:$0xff]  ;;  %v5380_v47 = vld [vmem:[%s11525_s7 + $0x3c0] sm:$0xff] }
 0x90f   : > { %v5201_v52 = vsel %vm11769_vm7, %v5169_v39, %v7087_v51  ;;  %v5198_v45 = vsel %vm11770_vm9, %v5134_v14, %v7083_v43  ;;  %v5200_v25 = vsel %vm11771_vm15, %v5163_v8, %v7088_v61  ;;  %v5219_v58 = vrot.slane %v10848_v56, 5  ;;  %v5348_v39 = vld [vmem:[%s11525_s7 + $0x2c0] sm:$0xff]  ;;  %v5379_v51 = vld [vmem:[%s11525_s7 + $0x3b8] sm:$0xff] }
 0x910   : > { %v5199_v7 = vsel %vm11772_vm6, %v5157_v17, %v7082_v11  ;;  %5651 = vmatprep.mubr.f32.mxu1 %v5201_v52  ;;  %v5225_v2 = vrot.slane %v10848_v56, 7  ;;  %v5207_v6 = vrot.slane %v10848_v56, 1  ;;  %v5213_v53 = vrot.slane %v10848_v56, 3  ;;  %v5364_v8 = vld [vmem:[%s11525_s7 + $0x340] sm:$0xff]  ;;  %v5347_v43 = vld [vmem:[%s11525_s7 + $0x2b8] sm:$0xff]  ;;  %v5378_v52 = vld [vmem:[%s11525_s7 + $0x3b0] sm:$0xff] }
 0x911   : > { %5581 = vmatprep.mubr.f32.mxu0 %v5199_v7  ;;  %5652 = vmatmul.mubr.f32.vlgmr.msra.gmra.mxu1 %v5200_v25  ;;  %v5332_v61 = vld [vmem:[%s11525_s7 + $0x240] sm:$0xff]  ;;  %v5363_v11 = vld [vmem:[%s11525_s7 + $0x338] sm:$0xff]  ;;  %v5362_v25 = vld [vmem:[%s11525_s7 + $0x330] sm:$0xff]  ;;  %vm6077_vm7 = vcmask 73728  }
 0x912   : > { %5582 = vmatmul.mubr.f32.vlgmr.msra.gmra.mxu0 %v5198_v45  ;;  %6663 = vmatpush3.msra.mxu1 %v5371_v46  ;;  %v6545_v55 = vpop.f32.mrf.mxu0  ;;  %v7104_v41 = vpack.i.bf16 %v5219_v58, %v5225_v2  ;;  %v7099_v40 = vpack.i.bf16 %v5207_v6, %v5213_v53  ;;  %v5331_v17 = vld [vmem:[%s11525_s7 + $0x238] sm:$0xff]  ;;  %v5346_v45 = vld [vmem:[%s11525_s7 + $0x2b0] sm:$0xff]  ;;  %v5377_v58 = vld [vmem:[%s11525_s7 + $0x3a8] sm:$0xff] }
 0x913   : > { %6628 = vmatpush3.msra.mxu0 %v5339_v31  ;;  %6664 = vmatprep.subr.mxu1 %v5386_v23  ;;  %v5330_v46 = vld [vmem:[%s11525_s7 + $0x230] sm:$0xff]  ;;  %v5345_v7 = vld [vmem:[%s11525_s7 + $0x2a8] sm:$0xff]  ;;  %v5376_v2 = vld [vmem:[%s11525_s7 + $0x3a0] sm:$0xff] }
 0x914   : > { %6629 = vmatprep.subr.mxu0 %v5354_v50  ;;  %7105 = vrot.lane.b32.xlu0 %v7104_v41, %s11635_s25  ;;  %v6546_v22 = vpop.f32.mrf.mxu0  ;;  %v10880_v0 = vpop.permute.xlu0 %7095  ;;  %v5361_v31 = vld [vmem:[%s11525_s7 + $0x328] sm:$0xff]  ;;  %v5344_v6 = vld [vmem:[%s11525_s7 + $0x2a0] sm:$0xff]  ;;  %v5343_v41 = vld [vmem:[%s11525_s7 + $0x298] sm:$0xff] }
 0x915   : > { %6665 = vmatpush3.msra.mxu1 %v5370_v10  ;;  %7100 = vrot.lane.b32.xlu1 %v7099_v40, %s11635_s25  ;;  %v6547_v3 = vadd.f32 %v6546_v22, %v6545_v55  ;;  %v7097_v20 = vunpack.i.l.bf16 %v10880_v0  ;;  %v10890_v33 = vpop.permute.xlu1 %7090  ;;  %v5329_v23 = vld [vmem:[%s11525_s7 + $0x228] sm:$0xff]  ;;  %v5360_v53 = vld [vmem:[%s11525_s7 + $0x320] sm:$0xff]  ;;  %v5375_v55 = vld [vmem:[%s11525_s7 + $0x398] sm:$0xff] }
 0x916   : > { %6630 = vmatpush3.msra.mxu0 %v5338_v62  ;;  %6666 = vmatprep.subr.mxu1 %v5385_v63  ;;  %v7092_v44 = vunpack.i.l.bf16 %v10890_v33  ;;  %v5328_v50 = vld [vmem:[%s11525_s7 + $0x220] sm:$0xff]  ;;  %v5359_v10 = vld [vmem:[%s11525_s7 + $0x318] sm:$0xff]  ;;  %v5374_v62 = vld [vmem:[%s11525_s7 + $0x390] sm:$0xff] }
 0x917   : > { %v10907_v14 = vadd.f32 %v6852_v49, %v6547_v3  ;;  %6631 = vmatprep.subr.mxu0 %v5353_v1  ;;  %6667 = vmatpush3.msra.mxu1 %v5369_v13  ;;  %v5205_v16 = vsel %vm11774_vm8, %v5192_v36, %v7097_v20  ;;  %v5327_v40 = vld [vmem:[%s11525_s7 + $0x218] sm:$0xff]  ;;  %v5342_v63 = vld [vmem:[%s11525_s7 + $0x290] sm:$0xff]  ;;  %v5373_v13 = vld [vmem:[%s11525_s7 + $0x388] sm:$0xff]  ;;  %v5186_v36 = vrot.slane %v10840_v29, 4 }
 0x918   : > { %6632 = vmatpush3.msra.mxu0 %v5337_v34  ;;  %6668 = vmatprep.subr.mxu1 %v5384_v5  ;;  %v5203_v37 = vsel %vm11773_vm4, %v5180_v18, %v7092_v44  ;;  %v5358_v22 = vld [vmem:[%s11525_s7 + $0x310] sm:$0xff]  ;;  %v5341_v3 = vld [vmem:[%s11525_s7 + $0x288] sm:$0xff]  ;;  %v7098_v34 = vunpack.i.h.bf16 %v10880_v0  ;;  %v5372_v44 = vld [vmem:[%s11525_s7 + $0x380] sm:$0xff] }
 0x919   : > { %6633 = vmatprep.subr.mxu0 %v5352_v48  ;;  %6669 = vmatpush3.msra.mxu1 %v5368_v19  ;;  %v5242_v15 = vrot.slane %v10907_v14, 5  ;;  %v5248_v57 = vrot.slane %v10907_v14, 7  ;;  %v5230_v54 = vrot.slane %v10907_v14, 1  ;;  %v5236_v28 = vrot.slane %v10907_v14, 3  ;;  %v5326_v1 = vld [vmem:[%s11525_s7 + $0x210] sm:$0xff]  ;;  %v5357_v20 = vld [vmem:[%s11525_s7 + $0x308] sm:$0xff] }
 0x91a   : > { %6634 = vmatpush3.msra.mxu0 %v5336_v35  ;;  %5721 = vmatprep.mubr.f32.mxu0 %v5203_v37  ;;  %v5325_v5 = vld [vmem:[%s11525_s7 + $0x208] sm:$0xff]  ;;  %v7093_v48 = vunpack.i.h.bf16 %v10890_v33  ;;  %v5340_v19 = vld [vmem:[%s11525_s7 + $0x280] sm:$0xff]  ;;  %v5419_v33 = vld [vmem:[%s11525_s7 + $0x4f8] sm:$0xff]  ;;  %v5204_v35 = vsel %vm11775_vm0, %v5186_v36, %v7098_v34 }
 0x91b   : > { %6635 = vmatprep.subr.mxu0 %v5351_v42  ;;  %6670 = vmatprep.subr.mxu1 %v5383_v9  ;;  %v7114_v49 = vpack.i.bf16 %v5242_v15, %v5248_v57  ;;  %v7109_v60 = vpack.i.bf16 %v5230_v54, %v5236_v28  ;;  %v5356_v0 = vld [vmem:[%s11525_s7 + $0x300] sm:$0xff]  ;;  %v5451_v42 = vld [vmem:[%s11525_s7 + $0x5f8] sm:$0xff]  ;;  %v5450_v15 = vld [vmem:[%s11525_s7 + $0x5f0] sm:$0xff] }
 0x91c   : > { %5791 = vmatprep.mubr.f32.mxu1 %v5205_v16  ;;  %6636 = vmatpush3.msra.mxu0 %v5335_v12  ;;  %v5324_v18 = vld [vmem:[%s11525_s7 + $0x200] sm:$0xff]  ;;  %v5403_v37 = vld [vmem:[%s11525_s7 + $0x478] sm:$0xff]  ;;  %v5202_v9 = vsel %vm11776_vm14, %v10840_v29, %v7093_v48  ;;  %v5418_v12 = vld [vmem:[%s11525_s7 + $0x4f0] sm:$0xff] }
 0x91d   : > { %6671 = vmatpush3.msra.mxu1 %v5367_v59  ;;  %6637 = vmatprep.subr.mxu0 %v5350_v38  ;;  %v5435_v16 = vld [vmem:[%s11525_s7 + $0x578] sm:$0xff]  ;;  %v5402_v57 = vld [vmem:[%s11525_s7 + $0x470] sm:$0xff]  ;;  %v5417_v54 = vld [vmem:[%s11525_s7 + $0x4e8] sm:$0xff] }
 0x91e   : > { %6672 = vmatprep.subr.mxu1 %v5382_v24  ;;  %6638 = vmatpush3.msra.mxu0 %v5334_v27  ;;  %v5434_v29 = vld [vmem:[%s11525_s7 + $0x570] sm:$0xff]  ;;  %v5449_v28 = vld [vmem:[%s11525_s7 + $0x5e8] sm:$0xff]  ;;  %v5416_v24 = vld [vmem:[%s11525_s7 + $0x4e0] sm:$0xff] }
 0x91f   : > { %6673 = vmatpush3.msra.mxu1 %v5366_v4  ;;  %6639 = vmatprep.subr.mxu0 %v5349_v32  ;;  %v5401_v59 = vld [vmem:[%s11525_s7 + $0x468] sm:$0xff]  ;;  %v5448_v27 = vld [vmem:[%s11525_s7 + $0x5e0] sm:$0xff]  ;;  %v5406_v34 = vld [vmem:[%s11525_s7 + $0x490] sm:$0xff] }
 0x920   : > { %6674 = vmatprep.subr.mxu1 %v5381_v26  ;;  %7115 = vrot.lane.b32.xlu0 %v7114_v49, %s11635_s25  ;;  %v5433_v38 = vld [vmem:[%s11525_s7 + $0x568] sm:$0xff]  ;;  %v5400_v4 = vld [vmem:[%s11525_s7 + $0x460] sm:$0xff]  ;;  %v5415_v49 = vld [vmem:[%s11525_s7 + $0x4d8] sm:$0xff] }
 0x921   : > { %6675 = vmatpush3.msra.mxu1 %v5365_v30  ;;  %7110 = vrot.lane.b32.xlu1 %v7109_v60, %s11635_s25  ;;  %v5432_v32 = vld [vmem:[%s11525_s7 + $0x560] sm:$0xff]  ;;  %v5447_v26 = vld [vmem:[%s11525_s7 + $0x5d8] sm:$0xff]  ;;  %v5422_v48 = vld [vmem:[%s11525_s7 + $0x510] sm:$0xff] }
 0x922   : > { %6640 = vmatpush3.msra.mxu0 %v5333_v21  ;;  %6676 = vmatprep.subr.mxu1 %v5380_v47  ;;  %v5399_v60 = vld [vmem:[%s11525_s7 + $0x458] sm:$0xff]  ;;  %v5414_v21 = vld [vmem:[%s11525_s7 + $0x4d0] sm:$0xff]  ;;  %v5421_v36 = vld [vmem:[%s11525_s7 + $0x508] sm:$0xff] }
 0x923   : > { %6641 = vmatprep.subr.mxu0 %v5348_v39  ;;  %6677 = vmatpush3.msra.mxu1 %v5364_v8  ;;  %v5431_v30 = vld [vmem:[%s11525_s7 + $0x558] sm:$0xff]  ;;  %v5446_v47 = vld [vmem:[%s11525_s7 + $0x5d0] sm:$0xff] }
 0x924   : > { %6642 = vmatpush3.msra.mxu0 %v5332_v61  ;;  %6678 = vmatprep.subr.mxu1 %v5379_v51  ;;  %v5398_v39 = vld [vmem:[%s11525_s7 + $0x450] sm:$0xff]  ;;  %v5413_v61 = vld [vmem:[%s11525_s7 + $0x4c8] sm:$0xff] }
 0x925   : > { %6643 = vmatprep.subr.mxu0 %v5347_v43  ;;  %6679 = vmatpush3.msra.mxu1 %v5363_v11  ;;  %v5430_v8 = vld [vmem:[%s11525_s7 + $0x550] sm:$0xff]  ;;  %v5445_v51 = vld [vmem:[%s11525_s7 + $0x5c8] sm:$0xff] }
 0x926   : > { %6644 = vmatpush3.msra.mxu0 %v5331_v17  ;;  %6680 = vmatprep.subr.mxu1 %v5378_v52  ;;  %v5397_v43 = vld [vmem:[%s11525_s7 + $0x448] sm:$0xff]  ;;  %v5412_v17 = vld [vmem:[%s11525_s7 + $0x4c0] sm:$0xff] }
 0x927   : > { %6645 = vmatprep.subr.mxu0 %v5346_v45  ;;  %6681 = vmatpush3.msra.mxu1 %v5362_v25  ;;  %v5429_v11 = vld [vmem:[%s11525_s7 + $0x548] sm:$0xff]  ;;  %v5444_v52 = vld [vmem:[%s11525_s7 + $0x5c0] sm:$0xff] }
 0x928   : > { %6646 = vmatpush3.msra.mxu0 %v5330_v46  ;;  %6682 = vmatprep.subr.mxu1 %v5377_v58  ;;  %v5396_v45 = vld [vmem:[%s11525_s7 + $0x440] sm:$0xff]  ;;  %v5411_v46 = vld [vmem:[%s11525_s7 + $0x4b8] sm:$0xff] }
 0x929   : > { %6647 = vmatprep.subr.mxu0 %v5345_v7  ;;  %6683 = vmatpush3.msra.mxu1 %v5361_v31  ;;  %v5428_v25 = vld [vmem:[%s11525_s7 + $0x540] sm:$0xff]  ;;  %v5443_v58 = vld [vmem:[%s11525_s7 + $0x5b8] sm:$0xff] }
 0x92a   : > { %6648 = vmatpush3.msra.mxu0 %v5329_v23  ;;  %6684 = vmatprep.subr.mxu1 %v5376_v2  ;;  %v5395_v7 = vld [vmem:[%s11525_s7 + $0x438] sm:$0xff]  ;;  %v5410_v23 = vld [vmem:[%s11525_s7 + $0x4b0] sm:$0xff] }
 0x92b   : > { %6649 = vmatprep.subr.mxu0 %v5344_v6  ;;  %6685 = vmatpush3.msra.mxu1 %v5360_v53  ;;  %v5427_v31 = vld [vmem:[%s11525_s7 + $0x538] sm:$0xff]  ;;  %v5442_v2 = vld [vmem:[%s11525_s7 + $0x5b0] sm:$0xff] }
 0x92c   : > { %6650 = vmatpush3.msra.mxu0 %v5328_v50  ;;  %6686 = vmatprep.subr.mxu1 %v5375_v55  ;;  %v5394_v6 = vld [vmem:[%s11525_s7 + $0x430] sm:$0xff]  ;;  %v5409_v50 = vld [vmem:[%s11525_s7 + $0x4a8] sm:$0xff] }
 0x92d   : > { %6651 = vmatprep.subr.mxu0 %v5343_v41  ;;  %6687 = vmatpush3.msra.mxu1 %v5359_v10  ;;  %v5426_v53 = vld [vmem:[%s11525_s7 + $0x530] sm:$0xff]  ;;  %v5441_v55 = vld [vmem:[%s11525_s7 + $0x5a8] sm:$0xff] }
 0x92e   : > { %6652 = vmatpush3.msra.mxu0 %v5327_v40  ;;  %6688 = vmatprep.subr.mxu1 %v5374_v62  ;;  %v5393_v41 = vld [vmem:[%s11525_s7 + $0x428] sm:$0xff]  ;;  %v5408_v40 = vld [vmem:[%s11525_s7 + $0x4a0] sm:$0xff] }
 0x92f   : > { %6653 = vmatprep.subr.mxu0 %v5342_v63  ;;  %6689 = vmatpush3.msra.mxu1 %v5358_v22  ;;  %v5425_v10 = vld [vmem:[%s11525_s7 + $0x528] sm:$0xff]  ;;  %v5440_v62 = vld [vmem:[%s11525_s7 + $0x5a0] sm:$0xff] }
 0x930   : > { %6654 = vmatpush3.msra.mxu0 %v5326_v1  ;;  %6690 = vmatprep.subr.mxu1 %v5373_v13  ;;  %v5392_v63 = vld [vmem:[%s11525_s7 + $0x420] sm:$0xff]  ;;  %v5407_v1 = vld [vmem:[%s11525_s7 + $0x498] sm:$0xff] }
 0x931   : > { %6655 = vmatprep.subr.mxu0 %v5341_v3  ;;  %6691 = vmatpush3.msra.mxu1 %v5357_v20  ;;  %v5424_v22 = vld [vmem:[%s11525_s7 + $0x520] sm:$0xff]  ;;  %v5439_v13 = vld [vmem:[%s11525_s7 + $0x598] sm:$0xff] }
 0x932   : > { %6656 = vmatpush3.msra.mxu0 %v5325_v5  ;;  %6692 = vmatprep.subr.mxu1 %v5372_v44  ;;  %v5391_v3 = vld [vmem:[%s11525_s7 + $0x418] sm:$0xff]  ;;  %v5438_v5 = vld [vmem:[%s11525_s7 + $0x590] sm:$0xff] }
 0x933   : > { %6657 = vmatprep.subr.mxu0 %v5340_v19  ;;  %6693 = vmatpush3.msra.mxu1 %v5356_v0  ;;  %v5423_v20 = vld [vmem:[%s11525_s7 + $0x518] sm:$0xff]  ;;  %v5390_v44 = vld [vmem:[%s11525_s7 + $0x410] sm:$0xff]  ;;  %v5405_v19 = vld [vmem:[%s11525_s7 + $0x488] sm:$0xff] }
 0x934   : > { %6658 = vmatpush3.msra.mxu0 %v5324_v18  ;;  %5792 = vmatmul.mubr.f32.vlgmr.msra.gmra.mxu1 %v5204_v35  ;;  %v5437_v0 = vld [vmem:[%s11525_s7 + $0x588] sm:$0xff]  ;;  %v5436_v35 = vld [vmem:[%s11525_s7 + $0x580] sm:$0xff] }
 0x935   : > { %5722 = vmatmul.mubr.f32.vlgmr.msra.gmra.mxu0 %v5202_v9  ;;  %6697 = vmatprep.subr.mxu0 %v5419_v33  ;;  %v5389_v18 = vld [vmem:[%s11525_s7 + $0x408] sm:$0xff]  ;;  %v5404_v33 = vld [vmem:[%s11525_s7 + $0x480] sm:$0xff]  ;;  %v5483_v9 = vld [vmem:[%s11525_s7 + $0x6f8] sm:$0xff] }
 0x936   : > { %6732 = vmatprep.subr.mxu1 %v5451_v42  ;;  %6698 = vmatpush3.msra.mxu0 %v5403_v37  ;;  %v5388_v42 = vld [vmem:[%s11525_s7 + $0x400] sm:$0xff] }
 0x937   : > { %6733 = vmatpush3.msra.mxu1 %v5435_v16  ;;  %6699 = vmatprep.subr.mxu0 %v5418_v12  ;;  %v5420_v37 = vld [vmem:[%s11525_s7 + $0x500] sm:$0xff]  ;;  %v5515_v16 = vld [vmem:[%s11525_s7 + $0x7f8] sm:$0xff] }
 0x938   : > { %6734 = vmatprep.subr.mxu1 %v5450_v15  ;;  %6700 = vmatpush3.msra.mxu0 %v5402_v57 }
 0x939   : > { %6735 = vmatpush3.msra.mxu1 %v5434_v29  ;;  %6701 = vmatprep.subr.mxu0 %v5417_v54  ;;  %v5223_v54 = vrot.slane %v10848_v56, 6 }
 0x93a   : > { %6736 = vmatprep.subr.mxu1 %v5449_v28  ;;  %6702 = vmatpush3.msra.mxu0 %v5401_v59  ;;  %v5217_v28 = vrot.slane %v10848_v56, 4 }
 0x93b   : > { %6737 = vmatpush3.msra.mxu1 %v5433_v38  ;;  %6703 = vmatprep.subr.mxu0 %v5416_v24  ;;  %v5211_v24 = vrot.slane %v10848_v56, 2 }
 0x93c   : > { %6738 = vmatprep.subr.mxu1 %v5448_v27  ;;  %6704 = vmatpush3.msra.mxu0 %v5400_v4 }
 0x93d   : > { %6739 = vmatpush3.msra.mxu1 %v5432_v32  ;;  %6705 = vmatprep.subr.mxu0 %v5415_v49  ;;  %v5499_v32 = vld [vmem:[%s11525_s7 + $0x778] sm:$0xff] }
 0x93e   : > { %6740 = vmatprep.subr.mxu1 %v5447_v26  ;;  %6706 = vmatpush3.msra.mxu0 %v5399_v60  ;;  %v5467_v60 = vld [vmem:[%s11525_s7 + $0x678] sm:$0xff] }
 0x93f   : > { %6741 = vmatpush3.msra.mxu1 %v5431_v30  ;;  %6707 = vmatprep.subr.mxu0 %v5414_v21  ;;  %v5514_v30 = vld [vmem:[%s11525_s7 + $0x7f0] sm:$0xff] }
 0x940   : > { %6742 = vmatprep.subr.mxu1 %v5446_v47  ;;  %6708 = vmatpush3.msra.mxu0 %v5398_v39  ;;  %v5482_v21 = vld [vmem:[%s11525_s7 + $0x6f0] sm:$0xff]  ;;  %v5513_v39 = vld [vmem:[%s11525_s7 + $0x7e8] sm:$0xff] }
 0x941   : > { %6743 = vmatpush3.msra.mxu1 %v5430_v8  ;;  %6709 = vmatprep.subr.mxu0 %v5413_v61  ;;  %v5498_v47 = vld [vmem:[%s11525_s7 + $0x770] sm:$0xff]  ;;  %v5481_v8 = vld [vmem:[%s11525_s7 + $0x6e8] sm:$0xff] }
 0x942   : > { %6744 = vmatprep.subr.mxu1 %v5445_v51  ;;  %6710 = vmatpush3.msra.mxu0 %v5397_v43  ;;  %v5497_v61 = vld [vmem:[%s11525_s7 + $0x768] sm:$0xff]  ;;  %v5512_v43 = vld [vmem:[%s11525_s7 + $0x7e0] sm:$0xff] }
 0x943   : > { %6745 = vmatpush3.msra.mxu1 %v5429_v11  ;;  %6711 = vmatprep.subr.mxu0 %v5412_v17  ;;  %v5465_v51 = vld [vmem:[%s11525_s7 + $0x668] sm:$0xff]  ;;  %v5480_v11 = vld [vmem:[%s11525_s7 + $0x6e0] sm:$0xff] }
 0x944   : > { %6746 = vmatprep.subr.mxu1 %v5444_v52  ;;  %6712 = vmatpush3.msra.mxu0 %v5396_v45  ;;  %v5496_v17 = vld [vmem:[%s11525_s7 + $0x760] sm:$0xff]  ;;  %v5511_v45 = vld [vmem:[%s11525_s7 + $0x7d8] sm:$0xff] }
 0x945   : > { %6747 = vmatpush3.msra.mxu1 %v5428_v25  ;;  %6713 = vmatprep.subr.mxu0 %v5411_v46  ;;  %v5464_v52 = vld [vmem:[%s11525_s7 + $0x660] sm:$0xff]  ;;  %v5479_v25 = vld [vmem:[%s11525_s7 + $0x6d8] sm:$0xff] }
 0x946   : > { %6748 = vmatprep.subr.mxu1 %v5443_v58  ;;  %6714 = vmatpush3.msra.mxu0 %v5395_v7  ;;  %v5495_v46 = vld [vmem:[%s11525_s7 + $0x758] sm:$0xff] }
 0x947   : > { %6749 = vmatpush3.msra.mxu1 %v5427_v31  ;;  %6715 = vmatprep.subr.mxu0 %v5410_v23  ;;  %v5463_v7 = vld [vmem:[%s11525_s7 + $0x658] sm:$0xff]  ;;  %v5510_v31 = vld [vmem:[%s11525_s7 + $0x7d0] sm:$0xff] }
 0x948   : > { %6750 = vmatprep.subr.mxu1 %v5442_v2  ;;  %6716 = vmatpush3.msra.mxu0 %v5394_v6  ;;  %v5478_v6 = vld [vmem:[%s11525_s7 + $0x6d0] sm:$0xff] }
 0x949   : > { %6751 = vmatpush3.msra.mxu1 %v5426_v53  ;;  %6717 = vmatprep.subr.mxu0 %v5409_v50  ;;  %v5246_v53 = vrot.slane %v10907_v14, 6 }
 0x94a   : > { %6752 = vmatprep.subr.mxu1 %v5441_v55  ;;  %6718 = vmatpush3.msra.mxu0 %v5393_v41  ;;  %v5234_v55 = vrot.slane %v10907_v14, 2  ;;  %v5462_v41 = vld [vmem:[%s11525_s7 + $0x650] sm:$0xff] }
 0x94b   : > { %6753 = vmatpush3.msra.mxu1 %v5425_v10  ;;  %6719 = vmatprep.subr.mxu0 %v5408_v40  ;;  %v5494_v40 = vld [vmem:[%s11525_s7 + $0x750] sm:$0xff] }
 0x94c   : > { %6754 = vmatprep.subr.mxu1 %v5440_v62  ;;  %6720 = vmatpush3.msra.mxu0 %v5392_v63  ;;  %v5477_v62 = vld [vmem:[%s11525_s7 + $0x6c8] sm:$0xff] }
 0x94d   : > { %6755 = vmatpush3.msra.mxu1 %v5424_v22  ;;  %6721 = vmatprep.subr.mxu0 %v5407_v1  ;;  %v5509_v22 = vld [vmem:[%s11525_s7 + $0x7c8] sm:$0xff] }
 0x94e   : > { %6756 = vmatprep.subr.mxu1 %v5439_v13  ;;  %6722 = vmatpush3.msra.mxu0 %v5391_v3  ;;  %v5461_v1 = vld [vmem:[%s11525_s7 + $0x648] sm:$0xff]  ;;  %v5476_v3 = vld [vmem:[%s11525_s7 + $0x6c0] sm:$0xff] }
 0x94f   : > { %6757 = vmatpush3.msra.mxu1 %v5423_v20  ;;  %6723 = vmatprep.subr.mxu0 %v5406_v34  ;;  %v5493_v13 = vld [vmem:[%s11525_s7 + $0x748] sm:$0xff]  ;;  %v5508_v20 = vld [vmem:[%s11525_s7 + $0x7c0] sm:$0xff] }
 0x950   : > { %6758 = vmatprep.subr.mxu1 %v5438_v5  ;;  %6724 = vmatpush3.msra.mxu0 %v5390_v44  ;;  %v5460_v34 = vld [vmem:[%s11525_s7 + $0x640] sm:$0xff]  ;;  %v5475_v44 = vld [vmem:[%s11525_s7 + $0x6b8] sm:$0xff] }
 0x951   : > { %6759 = vmatpush3.msra.mxu1 %v5422_v48  ;;  %6725 = vmatprep.subr.mxu0 %v5405_v19  ;;  %v5492_v5 = vld [vmem:[%s11525_s7 + $0x740] sm:$0xff]  ;;  %v5507_v48 = vld [vmem:[%s11525_s7 + $0x7b8] sm:$0xff] }
 0x952   : > { %6760 = vmatprep.subr.mxu1 %v5437_v0  ;;  %6726 = vmatpush3.msra.mxu0 %v5389_v18  ;;  %v5459_v19 = vld [vmem:[%s11525_s7 + $0x638] sm:$0xff]  ;;  %v5474_v18 = vld [vmem:[%s11525_s7 + $0x6b0] sm:$0xff] }
 0x953   : > { %6761 = vmatpush3.msra.mxu1 %v5421_v36  ;;  %6727 = vmatprep.subr.mxu0 %v5404_v33  ;;  %v5491_v0 = vld [vmem:[%s11525_s7 + $0x738] sm:$0xff]  ;;  %v5506_v36 = vld [vmem:[%s11525_s7 + $0x7b0] sm:$0xff] }
 0x954   : > { %6762 = vmatprep.subr.mxu1 %v5436_v35  ;;  %6728 = vmatpush3.msra.mxu0 %v5388_v42  ;;  %v5458_v33 = vld [vmem:[%s11525_s7 + $0x630] sm:$0xff]  ;;  %v5473_v42 = vld [vmem:[%s11525_s7 + $0x6a8] sm:$0xff] }
 0x955   : > { %6763 = vmatpush3.msra.mxu1 %v5420_v37  ;;  %6767 = vmatprep.subr.mxu0 %v5483_v9  ;;  %v5490_v35 = vld [vmem:[%s11525_s7 + $0x730] sm:$0xff]  ;;  %v5505_v37 = vld [vmem:[%s11525_s7 + $0x7a8] sm:$0xff] }
 0x956   : > { %6802 = vmatprep.subr.mxu1 %v5515_v16  ;;  %v5457_v9 = vld [vmem:[%s11525_s7 + $0x628] sm:$0xff] }
 0x957   : > { %v5489_v16 = vld [vmem:[%s11525_s7 + $0x728] sm:$0xff] }
 0x986   : > { %v7106_v12 = vpop.permute.xlu0 %7105 }
 0x987   : > { %v7108_v15 = vunpack.i.h.bf16 %v7106_v12  ;;  %v7107_v57 = vunpack.i.l.bf16 %v7106_v12  ;;  %v7101_v29 = vpop.permute.xlu1 %7100  ;;  %v5472_v12 = vld [vmem:[%s11525_s7 + $0x6a0] sm:$0xff] }
 0x988   : > { %v7103_v59 = vunpack.i.h.bf16 %v7101_v29  ;;  %v7102_v38 = vunpack.i.l.bf16 %v7101_v29  ;;  %v5488_v29 = vld [vmem:[%s11525_s7 + $0x720] sm:$0xff] }
 0x989   : > { %v5255_v27 = vsel %vm11777_vm1, %v5223_v54, %v7107_v57  ;;  %v5254_v4 = vsel %vm11778_vm10, %v5217_v28, %v7108_v15  ;;  %v5504_v15 = vld [vmem:[%s11525_s7 + $0x7a0] sm:$0xff]  ;;  %v5471_v54 = vld [vmem:[%s11525_s7 + $0x698] sm:$0xff] }
 0x98a   : > { %v5253_v49 = vsel %vm11779_vm13, %v5211_v24, %v7102_v38  ;;  %5931 = vmatprep.mubr.f32.mxu1 %v5255_v27  ;;  %v5252_v26 = vsel %vm11780_vm11, %v10848_v56, %v7103_v59  ;;  %v5466_v56 = vld [vmem:[%s11525_s7 + $0x670] sm:$0xff]  ;;  %v5456_v57 = vld [vmem:[%s11525_s7 + $0x620] sm:$0xff]  ;;  %v5503_v28 = vld [vmem:[%s11525_s7 + $0x798] sm:$0xff] }
 0x98b   : > { %5861 = vmatprep.mubr.f32.mxu0 %v5253_v49  ;;  %5932 = vmatmul.mubr.f32.vlgmr.msra.gmra.mxu1 %v5254_v4  ;;  %v5455_v59 = vld [vmem:[%s11525_s7 + $0x618] sm:$0xff]  ;;  %v5470_v24 = vld [vmem:[%s11525_s7 + $0x690] sm:$0xff]  ;;  %v5469_v49 = vld [vmem:[%s11525_s7 + $0x688] sm:$0xff] }
 0x98c   : > { %5862 = vmatmul.mubr.f32.vlgmr.msra.gmra.mxu0 %v5252_v26  ;;  %6803 = vmatpush3.msra.mxu1 %v5499_v32  ;;  %v5487_v38 = vld [vmem:[%s11525_s7 + $0x718] sm:$0xff]  ;;  %v5502_v27 = vld [vmem:[%s11525_s7 + $0x790] sm:$0xff]  ;;  %v5501_v26 = vld [vmem:[%s11525_s7 + $0x788] sm:$0xff] }
 0x98d   : > { %6768 = vmatpush3.msra.mxu0 %v5467_v60  ;;  %6804 = vmatprep.subr.mxu1 %v5514_v30  ;;  %v5454_v4 = vld [vmem:[%s11525_s7 + $0x610] sm:$0xff]  ;;  %v5453_v60 = vld [vmem:[%s11525_s7 + $0x608] sm:$0xff] }
 0x98e   : > { %6769 = vmatprep.subr.mxu0 %v5482_v21  ;;  %6805 = vmatpush3.msra.mxu1 %v5498_v47  ;;  %v5486_v32 = vld [vmem:[%s11525_s7 + $0x710] sm:$0xff]  ;;  %v5485_v21 = vld [vmem:[%s11525_s7 + $0x708] sm:$0xff]  ;;  %v5468_v47 = vld [vmem:[%s11525_s7 + $0x680] sm:$0xff] }
 0x98f   : > { %6770 = vmatpush3.msra.mxu0 %v5466_v56  ;;  %6806 = vmatprep.subr.mxu1 %v5513_v39  ;;  %v5500_v39 = vld [vmem:[%s11525_s7 + $0x780] sm:$0xff] }
 0x990   : > { %6771 = vmatprep.subr.mxu0 %v5481_v8  ;;  %6807 = vmatpush3.msra.mxu1 %v5497_v61  ;;  %v5452_v8 = vld [vmem:[%s11525_s7 + $0x600] sm:$0xff] }
 0x991   : > { %6772 = vmatpush3.msra.mxu0 %v5465_v51  ;;  %6808 = vmatprep.subr.mxu1 %v5512_v43  ;;  %v5484_v61 = vld [vmem:[%s11525_s7 + $0x700] sm:$0xff]  ;;  %v5240_v51 = vrot.slane %v10907_v14, 4 }
 0x992   : > { %v11327_v58 = vpop.permute.xlu0 %7115  ;;  %6773 = vmatprep.subr.mxu0 %v5480_v11  ;;  %6809 = vmatpush3.msra.mxu1 %v5496_v17 }
 0x993   : > { %v7117_v23 = vunpack.i.l.bf16 %v11327_v58  ;;  %v11336_v2 = vpop.permute.xlu1 %7110  ;;  %6774 = vmatpush3.msra.mxu0 %v5464_v52  ;;  %6810 = vmatprep.subr.mxu1 %v5511_v45  ;;  %v7118_v56 = vunpack.i.h.bf16 %v11327_v58  ;;  %v5516_v58 = vld [vmem:[%s11526_s8] sm:$0x1] }
 0x994   : > { %v7112_v50 = vunpack.i.l.bf16 %v11336_v2  ;;  %6775 = vmatprep.subr.mxu0 %v5479_v25  ;;  %6811 = vmatpush3.msra.mxu1 %v5495_v46  ;;  %v7113_v30 = vunpack.i.h.bf16 %v11336_v2 }
 0x995   : > { %6776 = vmatpush3.msra.mxu0 %v5463_v7  ;;  %6812 = vmatprep.subr.mxu1 %v5510_v31  ;;  %v5259_v10 = vsel %vm11781_vm12, %v5246_v53, %v7117_v23  ;;  %v5258_v11 = vsel %vm11784_vm5, %v5240_v51, %v7118_v56 }
 0x996   : > { %6777 = vmatprep.subr.mxu0 %v5478_v6  ;;  %v5257_v63 = vsel %vm11782_vm3, %v5234_v55, %v7112_v50  ;;  %6071 = vmatprep.mubr.f32.mxu1 %v5259_v10  ;;  %v5256_v43 = vsel %vm11783_vm2, %v10907_v14, %v7113_v30 }
 0x997   : > { %6001 = vmatprep.mubr.f32.mxu0 %v5257_v63  ;;  %6778 = vmatpush3.msra.mxu0 %v5462_v41 }
 0x998   : > { %6813 = vmatpush3.msra.mxu1 %v5494_v40  ;;  %6779 = vmatprep.subr.mxu0 %v5477_v62 }
 0x999   : > { %6814 = vmatprep.subr.mxu1 %v5509_v22  ;;  %6780 = vmatpush3.msra.mxu0 %v5461_v1 }
 0x99a   : > { %6815 = vmatpush3.msra.mxu1 %v5493_v13  ;;  %6781 = vmatprep.subr.mxu0 %v5476_v3 }
 0x99b   : > { %6816 = vmatprep.subr.mxu1 %v5508_v20  ;;  %6782 = vmatpush3.msra.mxu0 %v5460_v34 }
 0x99c   : > { %6817 = vmatpush3.msra.mxu1 %v5492_v5  ;;  %6783 = vmatprep.subr.mxu0 %v5475_v44 }
 0x99d   : > { %6818 = vmatprep.subr.mxu1 %v5507_v48  ;;  %6784 = vmatpush3.msra.mxu0 %v5459_v19 }
 0x99e   : > { %6819 = vmatpush3.msra.mxu1 %v5491_v0  ;;  %6785 = vmatprep.subr.mxu0 %v5474_v18 }
 0x99f   : > { %6820 = vmatprep.subr.mxu1 %v5506_v36  ;;  %6786 = vmatpush3.msra.mxu0 %v5458_v33 }
 0x9a0   : > { %6821 = vmatpush3.msra.mxu1 %v5490_v35  ;;  %6787 = vmatprep.subr.mxu0 %v5473_v42 }
 0x9a1   : > { %6822 = vmatprep.subr.mxu1 %v5505_v37  ;;  %6788 = vmatpush3.msra.mxu0 %v5457_v9 }
 0x9a2   : > { %6823 = vmatpush3.msra.mxu1 %v5489_v16  ;;  %6789 = vmatprep.subr.mxu0 %v5472_v12 }
 0x9a3   : > { %6824 = vmatprep.subr.mxu1 %v5504_v15  ;;  %6790 = vmatpush3.msra.mxu0 %v5456_v57 }
 0x9a4   : > { %6825 = vmatpush3.msra.mxu1 %v5488_v29  ;;  %6791 = vmatprep.subr.mxu0 %v5471_v54 }
 0x9a5   : > { %6826 = vmatprep.subr.mxu1 %v5503_v28  ;;  %6792 = vmatpush3.msra.mxu0 %v5455_v59 }
 0x9a6   : > { %6827 = vmatpush3.msra.mxu1 %v5487_v38  ;;  %6793 = vmatprep.subr.mxu0 %v5470_v24 }
 0x9a7   : > { %6828 = vmatprep.subr.mxu1 %v5502_v27  ;;  %6794 = vmatpush3.msra.mxu0 %v5454_v4 }
 0x9a8   : > { %6829 = vmatpush3.msra.mxu1 %v5486_v32  ;;  %6795 = vmatprep.subr.mxu0 %v5469_v49 }
 0x9a9   : > { %6830 = vmatprep.subr.mxu1 %v5501_v26  ;;  %6796 = vmatpush3.msra.mxu0 %v5453_v60 }
 0x9aa   : > { %6831 = vmatpush3.msra.mxu1 %v5485_v21  ;;  %6797 = vmatprep.subr.mxu0 %v5468_v47 }
 0x9ab   : > { %6832 = vmatprep.subr.mxu1 %v5500_v39  ;;  %6798 = vmatpush3.msra.mxu0 %v5452_v8 }
 0x9ac   : > { %6833 = vmatpush3.msra.mxu1 %v5484_v61  ;;  %6002 = vmatmul.mubr.f32.vlgmr.msra.gmra.mxu0 %v5256_v43 }
 0x9ad   : > { %6072 = vmatmul.mubr.f32.vlgmr.msra.gmra.mxu1 %v5258_v11 }
 0x9d1   : > { %v6624_v45 = vpop.f32.mrf.mxu1 }
 0x9d2   : > { %v6589_v17 = vpop.f32.mrf.mxu0 }
 0x9d3   : > { %v6625_v7 = vpop.f32.mrf.mxu1 }
 0x9d4   : > { %v6590_v52 = vpop.f32.mrf.mxu0  ;;  %v6626_v14 = vadd.f32 %v6625_v7, %v6624_v45 }
 0x9d5   : > { %v6591_v46 = vadd.f32 %v6590_v52, %v6589_v17 }
 0x9d7   : > { %v5584_v23 = vadd.f32 %v6591_v46, %v5516_v58 }
 0x9d9   : > { %v5654_v50 = vadd.f32 %v6626_v14, %v5584_v23 }
 0x9f4   : > { %v6694_v2 = vpop.f32.mrf.mxu1 }
 0x9f5   : > { %v6659_v25 = vpop.f32.mrf.mxu0 }
 0x9f6   : > { %v6695_v55 = vpop.f32.mrf.mxu1 }
 0x9f7   : > { %v6660_v31 = vpop.f32.mrf.mxu0  ;;  %v6696_v62 = vadd.f32 %v6695_v55, %v6694_v2 }
 0x9f8   : > { %v6661_v53 = vadd.f32 %v6660_v31, %v6659_v25 }
 0x9fa   : > { %v5724_v10 = vadd.f32 %v6661_v53, %v5654_v50 }
 0x9fc   : > { %v5794_v22 = vadd.f32 %v6696_v62, %v5724_v10 }
 0xa4b   : > { %v6764_v40 = vpop.f32.mrf.mxu1 }
 0xa4c   : > { %v6729_v6 = vpop.f32.mrf.mxu0 }
 0xa4d   : > { %v6765_v1 = vpop.f32.mrf.mxu1 }
 0xa4e   : > { %v6730_v41 = vpop.f32.mrf.mxu0  ;;  %v6766_v20 = vadd.f32 %v6765_v1, %v6764_v40 }
 0xa4f   : > { %v6731_v63 = vadd.f32 %v6730_v41, %v6729_v6 }
 0xa51   : > { %v5864_v13 = vadd.f32 %v6731_v63, %v5794_v22 }
 0xa53   : > { %v5934_v44 = vadd.f32 %v6766_v20, %v5864_v13 }
 0xa6c   : > { %v6799_v3 = vpop.f32.mrf.mxu0 }
 0xa6d   : > { %v6834_v34 = vpop.f32.mrf.mxu1 }
 0xa6e   : > { %v6800_v5 = vpop.f32.mrf.mxu0 }
 0xa6f   : > { %v6801_v48 = vadd.f32 %v6800_v5, %v6799_v3  ;;  %v6835_v19 = vpop.f32.mrf.mxu1 }
 0xa70   : > { %v6836_v18 = vadd.f32 %v6835_v19, %v6834_v34 }
 0xa71   : > { %v6004_v0 = vadd.f32 %v6801_v48, %v5934_v44 }
 0xa73   : > { %v6074_v36 = vadd.f32 %v6836_v18, %v6004_v0 }
 0xa75   : > { %v6078_v33 = vsel %vm6077_vm7, %v6074_v36, -inf }
 0xa76   : > { %6079 = vmax.xlane.f32.xlu1 %v6078_v33 }
 0xaff   : > { %v6080_v35 = vpop.xlane.xlu1 %6079 }
 0xb00   : > { %v6081_v42 = vsub.f32 %v6074_v36, %v6080_v35 }
 0xb02   : > { %v6082_v37 = vmul.f32 1.442695, %v6081_v42 }
 0xb04   : > { %7563 = vpow2.f32 %v6082_v37 }
 0xb11   : > { %v7564_v9 = vpop.eup %7563 }
 0xb12   : > { %v6084_v16 = vsel %vm6077_vm7, %v7564_v9, 0.0 }
 0xb13   : > { %6085 = vadd.xlane.f32.xlu0 %v6084_v16 }
 0xb9c   : > { %v6086_v12 = vpop.xlane.xlu0 %6085 }
 0xb9d   : > { %7565 = vrcp.f32 %v6086_v12 }
 0xbaa   : > { %v7566_v15 = vpop.eup %7565 }
 0xbab   : > { %v6088_v57 = vmul.f32 %v7566_v15, %v7564_v9 }
 0xbad   : > { %6089 = vst.msk [vmem:[%s322_s22] sm:$0x1] %vm6077_vm7, %v6088_v57 }
 0xbae   : > { %7580 = shalt.err (!%p7577_p3)
}
 0xbaf   : > { %s7581_s18 = scalar_lea.hbm %s6101_s27, 16  ;;  %s7585_s28 = scalar_lea.hbm %s11786_s17, 32 }
 0xbb0   : > { %p7582_p4 = scmp.ne.s32.totalorder %s6101_s27, %s7581_s18  ;;  %p7586_p9 = scmp.lt.s32.totalorder %s6101_s27, %s11786_s17 }
 0xbb1   : > { %p7587_p10 = scmp.lt.s32.totalorder %s7585_s28, %s7581_s18 }
 0xbb2   : > { %p7583_p7 = pnand %p7582_p4, %p7762_p5 }
 0xbb3   : > { %p7588_p11 = por %p7587_p10, %p7586_p9 }
 0xbb4   : > { %p7584_p8 = pneg %p7583_p7 }
 0xbb6   : > { %p7589_p12 = pnand %p7588_p11, %p7584_p8 }
 0xbb8   : > { %7592 = shalt.err (!%p7589_p12)
}
 0xbb9   : > { %6854 = dma.vmem_to_hbm [thread:$0]  (%p7762_p5), %s6104_s29, 16, %s6101_s27, %s6091_s16  }
 0xbba PF: > { %s11787_s3 = sld [smem:[#allocation9_spill]] }
 0xbbb   : > { %s11788_s25 = sld [smem:[#allocation7_spill]] }
 0xbc0   : > { %p6860_p13 = scmp.ge.s32.totalorder %s11787_s3, 2 }
 0xbc1   : > { %s6115_s9 = sand.u32 1, %s11788_s25  }
 0xbc2   : > { %p6857_p0 = pnand %p6860_p13, %p7766_p6  ;;  %s6116_s15 = scalar_lea.sflag [#allocation5], %s6115_s9 }
 0xbc4   : > { %p6858_p1 = pneg %p6857_p0 }
 0xbc6   : > { %7610 = dma.done.wait (%p6858_p1), %s6116_s15, 16  }
 0xbc7   : > { %7612 = vsyncadd (%p6858_p1), %s6116_s15, 4294967280  ;;  %s11790_s12 = sld [smem:[#allocation10_spill]]  ;;  %s11793_s30 = smov %s7619_s10 }
 0xbc8   : > { %s11791_s19 = sld [smem:[#allocation8_spill]] }
 0xbc9   : > { %s11792_s11 = sld [smem:[#allocation11_spill]] }
 0xbcd   : > { %p19_p2 = scmp.ge.s32.totalorder %s11790_s12, 4  }
 0xbce   : > { %s11794_s10 = smov %s11791_s19 }
 0xbcf   :  { %21 = sbr.rel (!%p19_p2) target bundleno = 9 (0x9), region = 140 }
 0xbd4   :  { %6120 = vsyncpa [#allocation5], 1 }
 0xbd5   :  { %6122 = vsyncpa [#allocation5 + $0x1], 1 }

</bundles_post_ra>
